<compile_context>
chip_gen: v7x
topology: tpu7x:2x2x1
jax: 0.10.0
libtpu: 0.0.40
codegen_flags: <defaults>
</compile_context>

<pallas_src>
import functools

import jax
import jax.numpy as jnp
from jax.experimental import pallas as pl
from jax.experimental.pallas import tpu as pltpu


def _fused_branch_kernel(xp_ref, w_ref, shift_ref, out_ref, acc_ref,
                         *, nb, H, W, Cin):
    """Fused 4-branch 3x3 conv (9 shifted-window matmuls) + BN + ReLU + pool.

    xp_ref   : (H+2, W+2, nb, Cin)  bf16 zero-padded input block (batch on sublanes)
    w_ref    : (9*Cin, ct)          bf16 weight tile, tap-major, BN scale folded in
    shift_ref: (1, ct)              f32 folded-BN shift (absorbs conv bias)
    out_ref  : (nb, ct)             f32 pooled branch outputs
    acc_ref  : (H*W*nb, ct)         f32 accumulator scratch (VMEM)
    """
    for tap in range(9):
        dy, dx = divmod(tap, 3)
        # Shifted 3x3 tap window; the reshape is tile-preserving because the
        # last two dims (nb=8, Cin%128==0) already sit on (sublane, lane).
        win = xp_ref[dy:dy + H, dx:dx + W, :, :].reshape(H * W * nb, Cin)
        part = jnp.dot(win, w_ref[tap * Cin:(tap + 1) * Cin, :],
                       preferred_element_type=jnp.float32)
        if tap == 0:
            acc_ref[...] = part
        else:
            acc_ref[...] += part

    # BN shift (scale already folded into the weights) + ReLU, then global
    # average pool per sample (reduction over the leading, non-lane axis).
    y = jnp.maximum(acc_ref[...] + shift_ref[...], 0.0)
    out_ref[...] = jnp.mean(y.reshape(H * W, nb, -1), axis=0)


def fused_conv_bn_relu_pool(xp_t, w2d, shift, *, H, W, cout_tile=None, nb=8):
    """xp_t: (H+2, W+2, N_pad, Cin) bf16 padded input; w2d: (9*Cin, 4*C) bf16.

    Returns (N_pad, 4*C) f32 pooled outputs for the four fused branches.
    """
    Hp, Wp, Np, Cin = xp_t.shape
    K, Ctot = w2d.shape
    assert K == 9 * Cin
    assert Cin % 128 == 0, "channel dim must be lane-aligned (multiple of 128)"
    assert Np % nb == 0 and nb % 8 == 0

    # Chip-aware VMEM budgeting: 128 MiB VMEM (v5e/v6e) -> bigger cout tile and
    # ~100 MiB limit; otherwise (v7x, 64 MiB) -> ct<=512 and 56 MiB limit.
    try:
        vmem_cap = int(pltpu.get_tpu_info().vmem_capacity_bytes)
    except Exception:
        vmem_cap = 64 * 1024 * 1024  # conservative fallback
    big_vmem = vmem_cap >= 100 * 1024 * 1024

    if cout_tile is None:
        ct = min(Ctot, 1024 if big_vmem else 512)
        while Ctot % ct:
            ct -= 128
    else:
        ct = cout_tile
    assert Ctot % ct == 0 and ct % 128 == 0

    vmem_limit = (100 if big_vmem else 56) * 1024 * 1024

    grid = (Ctot // ct, Np // nb)  # weight index depends only on the cout axis

    out = pl.pallas_call(
        functools.partial(_fused_branch_kernel, nb=nb, H=H, W=W, Cin=Cin),
        out_shape=jax.ShapeDtypeStruct((Np, Ctot), jnp.float32),
        grid_spec=pltpu.PrefetchScalarGridSpec(
            num_scalar_prefetch=0,
            grid=grid,
            in_specs=[
                pl.BlockSpec((Hp, Wp, nb, Cin), lambda c, n: (0, 0, n, 0)),
                pl.BlockSpec((K, ct), lambda c, n: (0, c)),   # resident over n
                pl.BlockSpec((1, ct), lambda c, n: (0, c)),
            ],
            out_specs=pl.BlockSpec((nb, ct), lambda c, n: (n, c)),
            scratch_shapes=[pltpu.VMEM((H * W * nb, ct), jnp.float32)],
        ),
        compiler_params=pltpu.CompilerParams(
            dimension_semantics=("parallel", "parallel"),
            vmem_limit_bytes=vmem_limit),
    )(xp_t, w2d, shift)
    return out


def model_forward(x_nchw, params, m=None, eps=1e-5, cout_tile=None):
    """Forward pass. x_nchw: (N, C, H, W). Returns (N, C, 5).

    `m` is accepted for signature parity with the PyTorch forward but unused
    (it is unused in the reference module as well).
    """
    del m
    # TODO(synk): the pretrained resnet50 base is not implemented; the input is
    # treated as the backbone feature map (base == identity).
    N, C, H, W = x_nchw.shape
    assert C % 128 == 0

    # All four branches use bn1, matching the PyTorch forward.
    gamma, beta, mean, var = params["bn1"]
    scale = gamma / jnp.sqrt(var + eps)
    shift0 = beta - mean * scale

    # Fuse the 4 branches: fold the BN scale into each weight column, fold the
    # conv bias into the BN shift, concat along Cout.  Weight laid out
    # (9*Cin, 4*C) tap-major (matches the per-tap matmul in the kernel).
    # TODO(synk): real PyTorch checkpoints store OIHW weights; permute to HWIO
    # before feeding them here (init_params generates HWIO directly).
    ws, shifts = [], []
    for i in range(4):
        w, b = params["conv%d" % (i + 1)]                  # (3, 3, C, C) HWIO
        ws.append((w * scale[None, None, None, :]).reshape(9 * C, C))
        shifts.append(b * scale + shift0)
    w_full = jnp.concatenate(ws, axis=1).astype(jnp.bfloat16)       # (9C, 4C)
    shift_full = jnp.concatenate(shifts)[None, :].astype(jnp.float32)

    # Global pool of the un-convolved feature map straight from NCHW (f32).
    x0 = jnp.mean(x_nchw.astype(jnp.float32), axis=(2, 3))          # (N, C)

    # Kernel layout: (H+2, W+2, N_pad, C) bf16 with batch padded to a multiple
    # of 8 so it sits on the 8-sublane axis (keeps in-kernel reshapes free and
    # BlockSpec dims (8, 128)-aligned).  Cast fused with the transpose.
    nb = 8
    N_pad = -(-N // nb) * nb
    x_t = jnp.transpose(x_nchw.astype(jnp.bfloat16), (2, 3, 0, 1))  # (H, W, N, C)
    xp_t = jnp.pad(x_t, ((1, 1), (1, 1), (0, N_pad - N), (0, 0)))

    branches = fused_conv_bn_relu_pool(
        xp_t, w_full, shift_full, H=H, W=W, cout_tile=cout_tile, nb=nb)
    branches = branches[:N]

    x1, x2, x3, x4 = jnp.split(branches, 4, axis=1)
    # torch.stack((x, x1, x2, x3, x4), dim=2) -> (N, C, 5)
    return jnp.stack([x0, x1, x2, x3, x4], axis=2)


def init_params(key, C):
    """Deterministic synthetic parameters (shapes follow the module, channels=C)."""
    params = {}
    for i in range(4):
        key, kw, kb = jax.random.split(key, 3)
        w = jax.random.normal(kw, (3, 3, C, C), jnp.float32) * 0.02
        b = jax.random.normal(kb, (C,), jnp.float32) * 0.01
        params["conv%d" % (i + 1)] = (w, b)
    key, kg, kb, km, kv = jax.random.split(key, 5)
    gamma = 1.0 + 0.1 * jax.random.normal(kg, (C,), jnp.float32)
    beta = 0.1 * jax.random.normal(kb, (C,), jnp.float32)
    mean = 0.1 * jax.random.normal(km, (C,), jnp.float32)
    var = 1.0 + 0.1 * jax.random.uniform(kv, (C,), jnp.float32)
    params["bn1"] = (gamma, beta, mean, var)
    return params


def _reference(x_nchw, params, eps=1e-5):
    """Pure-JAX f32 reference of the module forward (base == identity)."""
    x = jnp.transpose(x_nchw, (0, 2, 3, 1)).astype(jnp.float32)     # NHWC
    gamma, beta, mean, var = params["bn1"]
    scale = gamma / jnp.sqrt(var + eps)
    shift = beta - mean * scale
    outs = [jnp.mean(x, axis=(1, 2))]
    for i in range(4):
        w, b = params["conv%d" % (i + 1)]                           # HWIO
        y = jax.lax.conv_general_dilated(
            x, w, window_strides=(1, 1), padding="SAME",
            dimension_numbers=("NHWC", "HWIO", "NHWC"))
        y = jnp.maximum((y + b) * scale + shift, 0.0)
        outs.append(jnp.mean(y, axis=(1, 2)))
    return jnp.stack(outs, axis=2)


if __name__ == "__main__":
    # Small shapes standing in for the (N, 2048, H, W) resnet50 feature map.
    # C must be lane-aligned (multiple of 128); 128 keeps the test small.
    N, C, H, W = 2, 128, 8, 8
    key = jax.random.PRNGKey(0)
    key, kx = jax.random.split(key)
    x = jax.random.normal(kx, (N, C, H, W), jnp.float32)
    params = init_params(key, C)

    # cout_tile=256 -> 2 cout tiles on the toy shapes, exercising the weight
    # tiling path used at real C=2048 (where 4*C = 8192 channels are tiled).
    fwd = jax.jit(functools.partial(model_forward, cout_tile=256))
    out = fwd(x, params)
    out = jax.block_until_ready(out)
    assert out.shape == (N, C, 5), out.shape

    # Loose-tolerance check against the f32 reference (kernel matmuls are bf16).
    ref = _reference(x, params)
    err = float(jnp.max(jnp.abs(out - ref)))
    assert err < 5e-2, ("max abs error", err)

    print("KERNEL_OK")
</pallas_src>

<mosaic_0001>
module attributes {stable_mosaic.version = 11 : i64} {
  func.func @_fused_branch_kernel(%arg0: i32, %arg1: i32, %arg2: memref<10x10x8x128xbf16, #tpu.memory_space<vmem>>, %arg3: memref<1152x256xbf16, #tpu.memory_space<vmem>>, %arg4: memref<1x256xf32, #tpu.memory_space<vmem>>, %arg5: memref<8x256xf32, #tpu.memory_space<vmem>>, %arg6: memref<512x256xf32, #tpu.memory_space<vmem>>) attributes {dimension_semantics = [#tpu.dimension_semantics<parallel>, #tpu.dimension_semantics<parallel>], iteration_bounds = array<i64: 2, 1>, scalar_prefetch = 0 : i64, scratch_operands = 1 : i64, tpu.core_type = #tpu.core_type<tc>, window_params = [{transform_indices = @transform_0, window_bounds = array<i64: 10, 10, 8, 128>}, {transform_indices = @transform_1, window_bounds = array<i64: 1152, 256>}, {transform_indices = @transform_2, window_bounds = array<i64: 1, 256>}, {transform_indices = @transform_3, window_bounds = array<i64: 8, 256>}]} {
    %c0 = arith.constant 0 : index
    %c0_0 = arith.constant 0 : index
    %c0_1 = arith.constant 0 : index
    %c0_2 = arith.constant 0 : index
    %0 = vector.load %arg2[%c0, %c0_0, %c0_1, %c0_2] : memref<10x10x8x128xbf16, #tpu.memory_space<vmem>>, vector<8x8x8x128xbf16>
    %1 = vector.shape_cast %0 : vector<8x8x8x128xbf16> to vector<512x128xbf16>
    %c0_3 = arith.constant 0 : index
    %c0_4 = arith.constant 0 : index
    %2 = vector.load %arg3[%c0_3, %c0_4] : memref<1152x256xbf16, #tpu.memory_space<vmem>>, vector<128x256xbf16>
    %cst = arith.constant dense<0.000000e+00> : vector<512x256xf32>
    %3 = tpu.matmul %1, %2, %cst {dimension_numbers = #tpu.dot_dimension_numbers<[1], [0], [0], [1], [0, 0, 1, 1], [], []>} : vector<512x128xbf16>, vector<128x256xbf16>, vector<512x256xf32> -> vector<512x256xf32>
    %c0_5 = arith.constant 0 : index
    %c0_6 = arith.constant 0 : index
    %4 = vector.load %arg6[%c0_5, %c0_6] : memref<512x256xf32, #tpu.memory_space<vmem>>, vector<512x256xf32>
    tpu.vector_store %arg6[%c0_5, %c0_6], %3 {strides = array<i32>} : memref<512x256xf32, #tpu.memory_space<vmem>>, vector<512x256xf32>,
    %c0_7 = arith.constant 0 : index
    %c1 = arith.constant 1 : index
    %c0_8 = arith.constant 0 : index
    %c0_9 = arith.constant 0 : index
    %5 = vector.load %arg2[%c0_7, %c1, %c0_8, %c0_9] : memref<10x10x8x128xbf16, #tpu.memory_space<vmem>>, vector<8x8x8x128xbf16>
    %6 = vector.shape_cast %5 : vector<8x8x8x128xbf16> to vector<512x128xbf16>
    %c128 = arith.constant 128 : index
    %c0_10 = arith.constant 0 : index
    %7 = vector.load %arg3[%c128, %c0_10] : memref<1152x256xbf16, #tpu.memory_space<vmem>>, vector<128x256xbf16>
    %cst_11 = arith.constant dense<0.000000e+00> : vector<512x256xf32>
    %8 = tpu.matmul %6, %7, %cst_11 {dimension_numbers = #tpu.dot_dimension_numbers<[1], [0], [0], [1], [0, 0, 1, 1], [], []>} : vector<512x128xbf16>, vector<128x256xbf16>, vector<512x256xf32> -> vector<512x256xf32>
    %c0_12 = arith.constant 0 : index
    %c0_13 = arith.constant 0 : index
    %9 = vector.load %arg6[%c0_12, %c0_13] : memref<512x256xf32, #tpu.memory_space<vmem>>, vector<512x256xf32>
    %10 = arith.addf %9, %8 : vector<512x256xf32>
    %c0_14 = arith.constant 0 : index
    %c0_15 = arith.constant 0 : index
    %11 = vector.load %arg6[%c0_14, %c0_15] : memref<512x256xf32, #tpu.memory_space<vmem>>, vector<512x256xf32>
    tpu.vector_store %arg6[%c0_14, %c0_15], %10 {strides = array<i32>} : memref<512x256xf32, #tpu.memory_space<vmem>>, vector<512x256xf32>,
    %c0_16 = arith.constant 0 : index
    %c2 = arith.constant 2 : index
    %c0_17 = arith.constant 0 : index
    %c0_18 = arith.constant 0 : index
    %12 = vector.load %arg2[%c0_16, %c2, %c0_17, %c0_18] : memref<10x10x8x128xbf16, #tpu.memory_space<vmem>>, vector<8x8x8x128xbf16>
    %13 = vector.shape_cast %12 : vector<8x8x8x128xbf16> to vector<512x128xbf16>
    %c256 = arith.constant 256 : index
    %c0_19 = arith.constant 0 : index
    %14 = vector.load %arg3[%c256, %c0_19] : memref<1152x256xbf16, #tpu.memory_space<vmem>>, vector<128x256xbf16>
    %cst_20 = arith.constant dense<0.000000e+00> : vector<512x256xf32>
    %15 = tpu.matmul %13, %14, %cst_20 {dimension_numbers = #tpu.dot_dimension_numbers<[1], [0], [0], [1], [0, 0, 1, 1], [], []>} : vector<512x128xbf16>, vector<128x256xbf16>, vector<512x256xf32> -> vector<512x256xf32>
    %c0_21 = arith.constant 0 : index
    %c0_22 = arith.constant 0 : index
    %16 = vector.load %arg6[%c0_21, %c0_22] : memref<512x256xf32, #tpu.memory_space<vmem>>, vector<512x256xf32>
    %17 = arith.addf %16, %15 : vector<512x256xf32>
    %c0_23 = arith.constant 0 : index
    %c0_24 = arith.constant 0 : index
    %18 = vector.load %arg6[%c0_23, %c0_24] : memref<512x256xf32, #tpu.memory_space<vmem>>, vector<512x256xf32>
    tpu.vector_store %arg6[%c0_23, %c0_24], %17 {strides = array<i32>} : memref<512x256xf32, #tpu.memory_space<vmem>>, vector<512x256xf32>,
    %c1_25 = arith.constant 1 : index
    %c0_26 = arith.constant 0 : index
    %c0_27 = arith.constant 0 : index
    %c0_28 = arith.constant 0 : index
    %19 = vector.load %arg2[%c1_25, %c0_26, %c0_27, %c0_28] : memref<10x10x8x128xbf16, #tpu.memory_space<vmem>>, vector<8x8x8x128xbf16>
    %20 = vector.shape_cast %19 : vector<8x8x8x128xbf16> to vector<512x128xbf16>
    %c384 = arith.constant 384 : index
    %c0_29 = arith.constant 0 : index
    %21 = vector.load %arg3[%c384, %c0_29] : memref<1152x256xbf16, #tpu.memory_space<vmem>>, vector<128x256xbf16>
    %cst_30 = arith.constant dense<0.000000e+00> : vector<512x256xf32>
    %22 = tpu.matmul %20, %21, %cst_30 {dimension_numbers = #tpu.dot_dimension_numbers<[1], [0], [0], [1], [0, 0, 1, 1], [], []>} : vector<512x128xbf16>, vector<128x256xbf16>, vector<512x256xf32> -> vector<512x256xf32>
    %c0_31 = arith.constant 0 : index
    %c0_32 = arith.constant 0 : index
    %23 = vector.load %arg6[%c0_31, %c0_32] : memref<512x256xf32, #tpu.memory_space<vmem>>, vector<512x256xf32>
    %24 = arith.addf %23, %22 : vector<512x256xf32>
    %c0_33 = arith.constant 0 : index
    %c0_34 = arith.constant 0 : index
    %25 = vector.load %arg6[%c0_33, %c0_34] : memref<512x256xf32, #tpu.memory_space<vmem>>, vector<512x256xf32>
    tpu.vector_store %arg6[%c0_33, %c0_34], %24 {strides = array<i32>} : memref<512x256xf32, #tpu.memory_space<vmem>>, vector<512x256xf32>,
    %c1_35 = arith.constant 1 : index
    %c1_36 = arith.constant 1 : index
    %c0_37 = arith.constant 0 : index
    %c0_38 = arith.constant 0 : index
    %26 = vector.load %arg2[%c1_35, %c1_36, %c0_37, %c0_38] : memref<10x10x8x128xbf16, #tpu.memory_space<vmem>>, vector<8x8x8x128xbf16>
    %27 = vector.shape_cast %26 : vector<8x8x8x128xbf16> to vector<512x128xbf16>
    %c512 = arith.constant 512 : index
    %c0_39 = arith.constant 0 : index
    %28 = vector.load %arg3[%c512, %c0_39] : memref<1152x256xbf16, #tpu.memory_space<vmem>>, vector<128x256xbf16>
    %cst_40 = arith.constant dense<0.000000e+00> : vector<512x256xf32>
    %29 = tpu.matmul %27, %28, %cst_40 {dimension_numbers = #tpu.dot_dimension_numbers<[1], [0], [0], [1], [0, 0, 1, 1], [], []>} : vector<512x128xbf16>, vector<128x256xbf16>, vector<512x256xf32> -> vector<512x256xf32>
    %c0_41 = arith.constant 0 : index
    %c0_42 = arith.constant 0 : index
    %30 = vector.load %arg6[%c0_41, %c0_42] : memref<512x256xf32, #tpu.memory_space<vmem>>, vector<512x256xf32>
    %31 = arith.addf %30, %29 : vector<512x256xf32>
    %c0_43 = arith.constant 0 : index
    %c0_44 = arith.constant 0 : index
    %32 = vector.load %arg6[%c0_43, %c0_44] : memref<512x256xf32, #tpu.memory_space<vmem>>, vector<512x256xf32>
    tpu.vector_store %arg6[%c0_43, %c0_44], %31 {strides = array<i32>} : memref<512x256xf32, #tpu.memory_space<vmem>>, vector<512x256xf32>,
    %c1_45 = arith.constant 1 : index
    %c2_46 = arith.constant 2 : index
    %c0_47 = arith.constant 0 : index
    %c0_48 = arith.constant 0 : index
    %33 = vector.load %arg2[%c1_45, %c2_46, %c0_47, %c0_48] : memref<10x10x8x128xbf16, #tpu.memory_space<vmem>>, vector<8x8x8x128xbf16>
    %34 = vector.shape_cast %33 : vector<8x8x8x128xbf16> to vector<512x128xbf16>
    %c640 = arith.constant 640 : index
    %c0_49 = arith.constant 0 : index
    %35 = vector.load %arg3[%c640, %c0_49] : memref<1152x256xbf16, #tpu.memory_space<vmem>>, vector<128x256xbf16>
    %cst_50 = arith.constant dense<0.000000e+00> : vector<512x256xf32>
    %36 = tpu.matmul %34, %35, %cst_50 {dimension_numbers = #tpu.dot_dimension_numbers<[1], [0], [0], [1], [0, 0, 1, 1], [], []>} : vector<512x128xbf16>, vector<128x256xbf16>, vector<512x256xf32> -> vector<512x256xf32>
    %c0_51 = arith.constant 0 : index
    %c0_52 = arith.constant 0 : index
    %37 = vector.load %arg6[%c0_51, %c0_52] : memref<512x256xf32, #tpu.memory_space<vmem>>, vector<512x256xf32>
    %38 = arith.addf %37, %36 : vector<512x256xf32>
    %c0_53 = arith.constant 0 : index
    %c0_54 = arith.constant 0 : index
    %39 = vector.load %arg6[%c0_53, %c0_54] : memref<512x256xf32, #tpu.memory_space<vmem>>, vector<512x256xf32>
    tpu.vector_store %arg6[%c0_53, %c0_54], %38 {strides = array<i32>} : memref<512x256xf32, #tpu.memory_space<vmem>>, vector<512x256xf32>,
    %c2_55 = arith.constant 2 : index
    %c0_56 = arith.constant 0 : index
    %c0_57 = arith.constant 0 : index
    %c0_58 = arith.constant 0 : index
    %40 = vector.load %arg2[%c2_55, %c0_56, %c0_57, %c0_58] : memref<10x10x8x128xbf16, #tpu.memory_space<vmem>>, vector<8x8x8x128xbf16>
    %41 = vector.shape_cast %40 : vector<8x8x8x128xbf16> to vector<512x128xbf16>
    %c768 = arith.constant 768 : index
    %c0_59 = arith.constant 0 : index
    %42 = vector.load %arg3[%c768, %c0_59] : memref<1152x256xbf16, #tpu.memory_space<vmem>>, vector<128x256xbf16>
    %cst_60 = arith.constant dense<0.000000e+00> : vector<512x256xf32>
    %43 = tpu.matmul %41, %42, %cst_60 {dimension_numbers = #tpu.dot_dimension_numbers<[1], [0], [0], [1], [0, 0, 1, 1], [], []>} : vector<512x128xbf16>, vector<128x256xbf16>, vector<512x256xf32> -> vector<512x256xf32>
    %c0_61 = arith.constant 0 : index
    %c0_62 = arith.constant 0 : index
    %44 = vector.load %arg6[%c0_61, %c0_62] : memref<512x256xf32, #tpu.memory_space<vmem>>, vector<512x256xf32>
    %45 = arith.addf %44, %43 : vector<512x256xf32>
    %c0_63 = arith.constant 0 : index
    %c0_64 = arith.constant 0 : index
    %46 = vector.load %arg6[%c0_63, %c0_64] : memref<512x256xf32, #tpu.memory_space<vmem>>, vector<512x256xf32>
    tpu.vector_store %arg6[%c0_63, %c0_64], %45 {strides = array<i32>} : memref<512x256xf32, #tpu.memory_space<vmem>>, vector<512x256xf32>,
    %c2_65 = arith.constant 2 : index
    %c1_66 = arith.constant 1 : index
    %c0_67 = arith.constant 0 : index
    %c0_68 = arith.constant 0 : index
    %47 = vector.load %arg2[%c2_65, %c1_66, %c0_67, %c0_68] : memref<10x10x8x128xbf16, #tpu.memory_space<vmem>>, vector<8x8x8x128xbf16>
    %48 = vector.shape_cast %47 : vector<8x8x8x128xbf16> to vector<512x128xbf16>
    %c896 = arith.constant 896 : index
    %c0_69 = arith.constant 0 : index
    %49 = vector.load %arg3[%c896, %c0_69] : memref<1152x256xbf16, #tpu.memory_space<vmem>>, vector<128x256xbf16>
    %cst_70 = arith.constant dense<0.000000e+00> : vector<512x256xf32>
    %50 = tpu.matmul %48, %49, %cst_70 {dimension_numbers = #tpu.dot_dimension_numbers<[1], [0], [0], [1], [0, 0, 1, 1], [], []>} : vector<512x128xbf16>, vector<128x256xbf16>, vector<512x256xf32> -> vector<512x256xf32>
    %c0_71 = arith.constant 0 : index
    %c0_72 = arith.constant 0 : index
    %51 = vector.load %arg6[%c0_71, %c0_72] : memref<512x256xf32, #tpu.memory_space<vmem>>, vector<512x256xf32>
    %52 = arith.addf %51, %50 : vector<512x256xf32>
    %c0_73 = arith.constant 0 : index
    %c0_74 = arith.constant 0 : index
    %53 = vector.load %arg6[%c0_73, %c0_74] : memref<512x256xf32, #tpu.memory_space<vmem>>, vector<512x256xf32>
    tpu.vector_store %arg6[%c0_73, %c0_74], %52 {strides = array<i32>} : memref<512x256xf32, #tpu.memory_space<vmem>>, vector<512x256xf32>,
    %c2_75 = arith.constant 2 : index
    %c2_76 = arith.constant 2 : index
    %c0_77 = arith.constant 0 : index
    %c0_78 = arith.constant 0 : index
    %54 = vector.load %arg2[%c2_75, %c2_76, %c0_77, %c0_78] : memref<10x10x8x128xbf16, #tpu.memory_space<vmem>>, vector<8x8x8x128xbf16>
    %55 = vector.shape_cast %54 : vector<8x8x8x128xbf16> to vector<512x128xbf16>
    %c1024 = arith.constant 1024 : index
    %c0_79 = arith.constant 0 : index
    %56 = vector.load %arg3[%c1024, %c0_79] : memref<1152x256xbf16, #tpu.memory_space<vmem>>, vector<128x256xbf16>
    %cst_80 = arith.constant dense<0.000000e+00> : vector<512x256xf32>
    %57 = tpu.matmul %55, %56, %cst_80 {dimension_numbers = #tpu.dot_dimension_numbers<[1], [0], [0], [1], [0, 0, 1, 1], [], []>} : vector<512x128xbf16>, vector<128x256xbf16>, vector<512x256xf32> -> vector<512x256xf32>
    %c0_81 = arith.constant 0 : index
    %c0_82 = arith.constant 0 : index
    %58 = vector.load %arg6[%c0_81, %c0_82] : memref<512x256xf32, #tpu.memory_space<vmem>>, vector<512x256xf32>
    %59 = arith.addf %58, %57 : vector<512x256xf32>
    %c0_83 = arith.constant 0 : index
    %c0_84 = arith.constant 0 : index
    %60 = vector.load %arg6[%c0_83, %c0_84] : memref<512x256xf32, #tpu.memory_space<vmem>>, vector<512x256xf32>
    tpu.vector_store %arg6[%c0_83, %c0_84], %59 {strides = array<i32>} : memref<512x256xf32, #tpu.memory_space<vmem>>, vector<512x256xf32>,
    %c0_85 = arith.constant 0 : index
    %c0_86 = arith.constant 0 : index
    %61 = vector.load %arg6[%c0_85, %c0_86] : memref<512x256xf32, #tpu.memory_space<vmem>>, vector<512x256xf32>
    %c0_87 = arith.constant 0 : index
    %c0_88 = arith.constant 0 : index
    %62 = vector.load %arg4[%c0_87, %c0_88] : memref<1x256xf32, #tpu.memory_space<vmem>>, vector<1x256xf32>
    %63 = vector.broadcast %62 : vector<1x256xf32> to vector<512x256xf32>
    %64 = arith.addf %61, %63 : vector<512x256xf32>
    %cst_89 = arith.constant 0.000000e+00 : f32
    %65 = vector.broadcast %cst_89 : f32 to vector<512x256xf32>
    %66 = arith.maximumf %64, %65 : vector<512x256xf32>
    %67 = vector.shape_cast %66 : vector<512x256xf32> to vector<64x8x256xf32>
    %cst_90 = arith.constant dense<0.000000e+00> : vector<8x256xf32>
    %68 = vector.multi_reduction <add>, %67, %cst_90 [0] : vector<64x8x256xf32> to vector<8x256xf32>
    %cst_91 = arith.constant 6.400000e+01 : f32
    %69 = vector.broadcast %cst_91 : f32 to vector<8x256xf32>
    %70 = arith.divf %68, %69 : vector<8x256xf32>
    %c0_92 = arith.constant 0 : index
    %c0_93 = arith.constant 0 : index
    %71 = vector.load %arg5[%c0_92, %c0_93] : memref<8x256xf32, #tpu.memory_space<vmem>>, vector<8x256xf32>
    tpu.vector_store %arg5[%c0_92, %c0_93], %70 {strides = array<i32>} : memref<8x256xf32, #tpu.memory_space<vmem>>, vector<8x256xf32>,
    return
  }
  func.func @transform_0(%arg0: i32, %arg1: i32) -> (i32, i32, i32, i32) {
    %c0_i32 = arith.constant 0 : i32
    %c0_i32_0 = arith.constant 0 : i32
    %c0_i32_1 = arith.constant 0 : i32
    %c0_i32_2 = arith.constant 0 : i32
    return %c0_i32, %c0_i32_0, %arg1, %c0_i32_1 : i32, i32, i32, i32
  }
  func.func @transform_1(%arg0: i32, %arg1: i32) -> (i32, i32) {
    %c0_i32 = arith.constant 0 : i32
    %c0_i32_0 = arith.constant 0 : i32
    return %c0_i32, %arg0 : i32, i32
  }
  func.func @transform_2(%arg0: i32, %arg1: i32) -> (i32, i32) {
    %c0_i32 = arith.constant 0 : i32
    %c0_i32_0 = arith.constant 0 : i32
    return %c0_i32, %arg0 : i32, i32
  }
  func.func @transform_3(%arg0: i32, %arg1: i32) -> (i32, i32) {
    %c0_i32 = arith.constant 0 : i32
    return %arg1, %arg0 : i32, i32
  }
}

</mosaic_0001>

<bundles_post_ra>
// kernel: model_forward.1
= control target key start
LH: loop header
LB: loop body
LE: loop exit
PB: predicated region body
PF: predicated region fallthrough
CT: control target
= control target key end

     0   :  { %s13652_s12 = smov 0   ;;  %s13654_s13 = smov 0   ;;  %s15654_s0 = inlined_call_operand.vmem [shape: bf16[10,10,8,128], index: 0, kind: input, shape index: {}]   ;;  %s15655_s1 = inlined_call_operand.vmem [shape: bf16[1152,512], index: 1, kind: input, shape index: {}]   ;;  %s15656_s2 = inlined_call_operand.vmem [shape: f32[1,512], index: 2, kind: input, shape index: {}]   ;;  %s15657_s3 = inlined_call_operand.vmem [shape: f32[8,512], index: 3, kind: output, shape index: {}]  }
   0x1   :  { %s13656_s14 = smov 0   ;;  %s13658_s15 = smov 0  }
   0x2   :  { %s13660_s16 = smov 0  }
   0x3 LB: > { %s25_s17 = sadd.s32 1, %s13625_s15  ;;  %p65_p1 = scmp.ne.s32.totalorder %s13617_s13, %s13613_s12  ;;  %s13629_s16 = sphi %s13660_s16, %s13_s16   ;;  %s13625_s15 = sphi %s13658_s15, %s15698_s15   ;;  %s13621_s14 = sphi %s13656_s14, %s15697_s14   ;;  %s13617_s13 = sphi %s13654_s13, %s15696_s13   ;;  %s13613_s12 = sphi %s13652_s12, %s15695_s12  }
   0x4   : > { %p27_p0 = scmp.ge.s32.totalorder %s25_s17, 2  ;;  %p66_p2 = scmp.eq.s32.totalorder %s13629_s16, 0 }
   0x5   : > { %s58_s19 = sadd.s32 1, %s13617_s13  ;;  %p11034_p5 = scmp.ge.s32.totalorder %s13629_s16, 2 }
   0x6   : > { %s15700_s17 = smov (%p27_p0, %s25_s17), 0  ;;  %p67_p3 = por %p66_p2, %p65_p1 }
   0x7   : > { %s55_s18 = ssub.s32 %s13625_s15, %s15700_s17  ;;  %152 = sbr.rel (%p11034_p5) target bundleno = 90 (0x5a), region = 20 }
   0x8   : > { %p56_p4 = scmp.eq.s32.totalorder %s55_s18, 0 }
   0xa   : > { %s13687_s20 = scalar_select %p56_p4, %s13617_s13, %s58_s19  }
   0xe   : > { %155 = sbr.rel (!%p67_p3) target bundleno = 90 (0x5a), region = 24  ;;  %s157_s21 = sand.u32 (%p67_p3), 1, %s13617_s13  }
   0xf   : > { %s11987_s22 = sshll.u32 (%p67_p3), %s13625_s15, 3  ;;  %s13028_s23 = smul.u32 (%p67_p3), 1152, %s157_s21 }
  0x10   : > { %s13695_s26 = scalar_lea.vmem (%p67_p3), %s15655_s1, %s11987_s22 }
  0x11   : > { %v476_v0 = vld [vmem:[%s13695_s26] sm:$0xff] (%p67_p3)  ;;  %v478_v1 = vld [vmem:[%s13695_s26 + $0x10] sm:$0xff] (%p67_p3)  ;;  %s13703_s27 = scalar_lea.vmem (%p67_p3), [#allocation3], %s13028_s23 }
  0x12   : > { %v480_v2 = vld [vmem:[%s13695_s26 + $0x20] sm:$0xff] (%p67_p3)  ;;  %v482_v3 = vld [vmem:[%s13695_s26 + $0x30] sm:$0xff] (%p67_p3)  ;;  %477 = vst [vmem:[%s13703_s27] sm:$0xff] (%p67_p3), %v476_v0  ;;  %479 = vst [vmem:[%s13703_s27 + $0x8] sm:$0xff] (%p67_p3), %v478_v1 }
  0x13   : > { %v484_v4 = vld [vmem:[%s13695_s26 + $0x40] sm:$0xff] (%p67_p3)  ;;  %v486_v5 = vld [vmem:[%s13695_s26 + $0x50] sm:$0xff] (%p67_p3)  ;;  %481 = vst [vmem:[%s13703_s27 + $0x10] sm:$0xff] (%p67_p3), %v480_v2  ;;  %483 = vst [vmem:[%s13703_s27 + $0x18] sm:$0xff] (%p67_p3), %v482_v3 }
  0x14   : > { %485 = vst [vmem:[%s13703_s27 + $0x20] sm:$0xff] (%p67_p3), %v484_v4  ;;  %487 = vst [vmem:[%s13703_s27 + $0x28] sm:$0xff] (%p67_p3), %v486_v5  ;;  %v488_v6 = vld [vmem:[%s13695_s26 + $0x60] sm:$0xff] (%p67_p3)  ;;  %v490_v7 = vld [vmem:[%s13695_s26 + $0x70] sm:$0xff] (%p67_p3) }
  0x15   : > { %v492_v8 = vld [vmem:[%s13695_s26 + $0x80] sm:$0xff]  ;;  %489 = vst [vmem:[%s13703_s27 + $0x30] sm:$0xff] %v488_v6  ;;  %491 = vst [vmem:[%s13703_s27 + $0x38] sm:$0xff] %v490_v7  ;;  %v494_v9 = vld [vmem:[%s13695_s26 + $0x90] sm:$0xff] }
  0x16   : > { %493 = vst [vmem:[%s13703_s27 + $0x40] sm:$0xff] %v492_v8  ;;  %v496_v10 = vld [vmem:[%s13695_s26 + $0xa0] sm:$0xff]  ;;  %v498_v11 = vld [vmem:[%s13695_s26 + $0xb0] sm:$0xff]  ;;  %495 = vst [vmem:[%s13703_s27 + $0x48] sm:$0xff] %v494_v9 }
  0x17   : > { %497 = vst [vmem:[%s13703_s27 + $0x50] sm:$0xff] %v496_v10  ;;  %499 = vst [vmem:[%s13703_s27 + $0x58] sm:$0xff] %v498_v11  ;;  %v500_v12 = vld [vmem:[%s13695_s26 + $0xc0] sm:$0xff]  ;;  %v502_v13 = vld [vmem:[%s13695_s26 + $0xd0] sm:$0xff] }
  0x18   : > { %v504_v14 = vld [vmem:[%s13695_s26 + $0xe0] sm:$0xff]  ;;  %501 = vst [vmem:[%s13703_s27 + $0x60] sm:$0xff] %v500_v12  ;;  %503 = vst [vmem:[%s13703_s27 + $0x68] sm:$0xff] %v502_v13  ;;  %v506_v15 = vld [vmem:[%s13695_s26 + $0xf0] sm:$0xff] }
  0x19   : > { %505 = vst [vmem:[%s13703_s27 + $0x70] sm:$0xff] %v504_v14  ;;  %v508_v16 = vld [vmem:[%s13695_s26 + $0x100] sm:$0xff]  ;;  %v510_v17 = vld [vmem:[%s13695_s26 + $0x110] sm:$0xff]  ;;  %507 = vst [vmem:[%s13703_s27 + $0x78] sm:$0xff] %v506_v15 }
  0x1a   : > { %509 = vst [vmem:[%s13703_s27 + $0x80] sm:$0xff] %v508_v16  ;;  %511 = vst [vmem:[%s13703_s27 + $0x88] sm:$0xff] %v510_v17  ;;  %v512_v18 = vld [vmem:[%s13695_s26 + $0x120] sm:$0xff]  ;;  %v514_v19 = vld [vmem:[%s13695_s26 + $0x130] sm:$0xff] }
  0x1b   : > { %v516_v20 = vld [vmem:[%s13695_s26 + $0x140] sm:$0xff]  ;;  %513 = vst [vmem:[%s13703_s27 + $0x90] sm:$0xff] %v512_v18  ;;  %515 = vst [vmem:[%s13703_s27 + $0x98] sm:$0xff] %v514_v19  ;;  %v518_v21 = vld [vmem:[%s13695_s26 + $0x150] sm:$0xff] }
  0x1c   : > { %517 = vst [vmem:[%s13703_s27 + $0xa0] sm:$0xff] %v516_v20  ;;  %v520_v22 = vld [vmem:[%s13695_s26 + $0x160] sm:$0xff]  ;;  %v522_v23 = vld [vmem:[%s13695_s26 + $0x170] sm:$0xff]  ;;  %519 = vst [vmem:[%s13703_s27 + $0xa8] sm:$0xff] %v518_v21 }
  0x1d   : > { %521 = vst [vmem:[%s13703_s27 + $0xb0] sm:$0xff] %v520_v22  ;;  %523 = vst [vmem:[%s13703_s27 + $0xb8] sm:$0xff] %v522_v23  ;;  %v524_v24 = vld [vmem:[%s13695_s26 + $0x180] sm:$0xff]  ;;  %v526_v25 = vld [vmem:[%s13695_s26 + $0x190] sm:$0xff] }
  0x1e   : > { %v528_v26 = vld [vmem:[%s13695_s26 + $0x1a0] sm:$0xff]  ;;  %525 = vst [vmem:[%s13703_s27 + $0xc0] sm:$0xff] %v524_v24  ;;  %527 = vst [vmem:[%s13703_s27 + $0xc8] sm:$0xff] %v526_v25  ;;  %v530_v27 = vld [vmem:[%s13695_s26 + $0x1b0] sm:$0xff] }
  0x1f   : > { %529 = vst [vmem:[%s13703_s27 + $0xd0] sm:$0xff] %v528_v26  ;;  %v532_v28 = vld [vmem:[%s13695_s26 + $0x1c0] sm:$0xff]  ;;  %v534_v29 = vld [vmem:[%s13695_s26 + $0x1d0] sm:$0xff]  ;;  %531 = vst [vmem:[%s13703_s27 + $0xd8] sm:$0xff] %v530_v27 }
  0x20   : > { %533 = vst [vmem:[%s13703_s27 + $0xe0] sm:$0xff] %v532_v28  ;;  %535 = vst [vmem:[%s13703_s27 + $0xe8] sm:$0xff] %v534_v29  ;;  %v536_v30 = vld [vmem:[%s13695_s26 + $0x1e0] sm:$0xff]  ;;  %v538_v31 = vld [vmem:[%s13695_s26 + $0x1f0] sm:$0xff] }
  0x21   : > { %v540_v32 = vld [vmem:[%s13695_s26 + $0x200] sm:$0xff]  ;;  %537 = vst [vmem:[%s13703_s27 + $0xf0] sm:$0xff] %v536_v30  ;;  %539 = vst [vmem:[%s13703_s27 + $0xf8] sm:$0xff] %v538_v31  ;;  %v542_v33 = vld [vmem:[%s13695_s26 + $0x210] sm:$0xff] }
  0x22   : > { %541 = vst [vmem:[%s13703_s27 + $0x100] sm:$0xff] %v540_v32  ;;  %v544_v34 = vld [vmem:[%s13695_s26 + $0x220] sm:$0xff]  ;;  %v546_v35 = vld [vmem:[%s13695_s26 + $0x230] sm:$0xff]  ;;  %543 = vst [vmem:[%s13703_s27 + $0x108] sm:$0xff] %v542_v33 }
  0x23   : > { %545 = vst [vmem:[%s13703_s27 + $0x110] sm:$0xff] %v544_v34  ;;  %547 = vst [vmem:[%s13703_s27 + $0x118] sm:$0xff] %v546_v35  ;;  %v548_v36 = vld [vmem:[%s13695_s26 + $0x240] sm:$0xff]  ;;  %v550_v37 = vld [vmem:[%s13695_s26 + $0x250] sm:$0xff] }
  0x24   : > { %v552_v38 = vld [vmem:[%s13695_s26 + $0x260] sm:$0xff]  ;;  %549 = vst [vmem:[%s13703_s27 + $0x120] sm:$0xff] %v548_v36  ;;  %551 = vst [vmem:[%s13703_s27 + $0x128] sm:$0xff] %v550_v37  ;;  %v554_v39 = vld [vmem:[%s13695_s26 + $0x270] sm:$0xff] }
  0x25   : > { %553 = vst [vmem:[%s13703_s27 + $0x130] sm:$0xff] %v552_v38  ;;  %v556_v40 = vld [vmem:[%s13695_s26 + $0x280] sm:$0xff]  ;;  %v558_v41 = vld [vmem:[%s13695_s26 + $0x290] sm:$0xff]  ;;  %555 = vst [vmem:[%s13703_s27 + $0x138] sm:$0xff] %v554_v39 }
  0x26   : > { %557 = vst [vmem:[%s13703_s27 + $0x140] sm:$0xff] %v556_v40  ;;  %559 = vst [vmem:[%s13703_s27 + $0x148] sm:$0xff] %v558_v41  ;;  %v560_v42 = vld [vmem:[%s13695_s26 + $0x2a0] sm:$0xff]  ;;  %v562_v43 = vld [vmem:[%s13695_s26 + $0x2b0] sm:$0xff] }
  0x27   : > { %v564_v44 = vld [vmem:[%s13695_s26 + $0x2c0] sm:$0xff]  ;;  %561 = vst [vmem:[%s13703_s27 + $0x150] sm:$0xff] %v560_v42  ;;  %563 = vst [vmem:[%s13703_s27 + $0x158] sm:$0xff] %v562_v43  ;;  %v566_v45 = vld [vmem:[%s13695_s26 + $0x2d0] sm:$0xff] }
  0x28   : > { %565 = vst [vmem:[%s13703_s27 + $0x160] sm:$0xff] %v564_v44  ;;  %v568_v46 = vld [vmem:[%s13695_s26 + $0x2e0] sm:$0xff]  ;;  %v570_v47 = vld [vmem:[%s13695_s26 + $0x2f0] sm:$0xff]  ;;  %567 = vst [vmem:[%s13703_s27 + $0x168] sm:$0xff] %v566_v45 }
  0x29   : > { %569 = vst [vmem:[%s13703_s27 + $0x170] sm:$0xff] %v568_v46  ;;  %571 = vst [vmem:[%s13703_s27 + $0x178] sm:$0xff] %v570_v47  ;;  %v572_v48 = vld [vmem:[%s13695_s26 + $0x300] sm:$0xff]  ;;  %v574_v49 = vld [vmem:[%s13695_s26 + $0x310] sm:$0xff] }
  0x2a   : > { %v576_v50 = vld [vmem:[%s13695_s26 + $0x320] sm:$0xff]  ;;  %573 = vst [vmem:[%s13703_s27 + $0x180] sm:$0xff] %v572_v48  ;;  %575 = vst [vmem:[%s13703_s27 + $0x188] sm:$0xff] %v574_v49  ;;  %v578_v51 = vld [vmem:[%s13695_s26 + $0x330] sm:$0xff] }
  0x2b   : > { %577 = vst [vmem:[%s13703_s27 + $0x190] sm:$0xff] %v576_v50  ;;  %v580_v52 = vld [vmem:[%s13695_s26 + $0x340] sm:$0xff]  ;;  %v582_v53 = vld [vmem:[%s13695_s26 + $0x350] sm:$0xff]  ;;  %579 = vst [vmem:[%s13703_s27 + $0x198] sm:$0xff] %v578_v51 }
  0x2c   : > { %581 = vst [vmem:[%s13703_s27 + $0x1a0] sm:$0xff] %v580_v52  ;;  %583 = vst [vmem:[%s13703_s27 + $0x1a8] sm:$0xff] %v582_v53  ;;  %v584_v54 = vld [vmem:[%s13695_s26 + $0x360] sm:$0xff]  ;;  %v586_v55 = vld [vmem:[%s13695_s26 + $0x370] sm:$0xff] }
  0x2d   : > { %v588_v56 = vld [vmem:[%s13695_s26 + $0x380] sm:$0xff]  ;;  %585 = vst [vmem:[%s13703_s27 + $0x1b0] sm:$0xff] %v584_v54  ;;  %587 = vst [vmem:[%s13703_s27 + $0x1b8] sm:$0xff] %v586_v55  ;;  %v590_v57 = vld [vmem:[%s13695_s26 + $0x390] sm:$0xff] }
  0x2e   : > { %589 = vst [vmem:[%s13703_s27 + $0x1c0] sm:$0xff] %v588_v56  ;;  %v592_v58 = vld [vmem:[%s13695_s26 + $0x3a0] sm:$0xff]  ;;  %v594_v59 = vld [vmem:[%s13695_s26 + $0x3b0] sm:$0xff]  ;;  %591 = vst [vmem:[%s13703_s27 + $0x1c8] sm:$0xff] %v590_v57 }
  0x2f   : > { %593 = vst [vmem:[%s13703_s27 + $0x1d0] sm:$0xff] %v592_v58  ;;  %595 = vst [vmem:[%s13703_s27 + $0x1d8] sm:$0xff] %v594_v59  ;;  %v596_v60 = vld [vmem:[%s13695_s26 + $0x3c0] sm:$0xff]  ;;  %v598_v61 = vld [vmem:[%s13695_s26 + $0x3d0] sm:$0xff] }
  0x30   : > { %v600_v62 = vld [vmem:[%s13695_s26 + $0x3e0] sm:$0xff]  ;;  %597 = vst [vmem:[%s13703_s27 + $0x1e0] sm:$0xff] %v596_v60  ;;  %599 = vst [vmem:[%s13703_s27 + $0x1e8] sm:$0xff] %v598_v61  ;;  %v602_v63 = vld [vmem:[%s13695_s26 + $0x3f0] sm:$0xff] }
  0x31   : > { %601 = vst [vmem:[%s13703_s27 + $0x1f0] sm:$0xff] %v600_v62  ;;  %v604_v0 = vld [vmem:[%s13695_s26 + $0x400] sm:$0xff]  ;;  %v606_v1 = vld [vmem:[%s13695_s26 + $0x410] sm:$0xff]  ;;  %603 = vst [vmem:[%s13703_s27 + $0x1f8] sm:$0xff] %v602_v63 }
  0x32   : > { %605 = vst [vmem:[%s13703_s27 + $0x200] sm:$0xff] %v604_v0  ;;  %607 = vst [vmem:[%s13703_s27 + $0x208] sm:$0xff] %v606_v1  ;;  %v608_v2 = vld [vmem:[%s13695_s26 + $0x420] sm:$0xff]  ;;  %v610_v3 = vld [vmem:[%s13695_s26 + $0x430] sm:$0xff] }
  0x33   : > { %v612_v4 = vld [vmem:[%s13695_s26 + $0x440] sm:$0xff]  ;;  %609 = vst [vmem:[%s13703_s27 + $0x210] sm:$0xff] %v608_v2  ;;  %611 = vst [vmem:[%s13703_s27 + $0x218] sm:$0xff] %v610_v3  ;;  %v614_v5 = vld [vmem:[%s13695_s26 + $0x450] sm:$0xff] }
  0x34   : > { %613 = vst [vmem:[%s13703_s27 + $0x220] sm:$0xff] %v612_v4  ;;  %v616_v6 = vld [vmem:[%s13695_s26 + $0x460] sm:$0xff]  ;;  %v618_v7 = vld [vmem:[%s13695_s26 + $0x470] sm:$0xff]  ;;  %615 = vst [vmem:[%s13703_s27 + $0x228] sm:$0xff] %v614_v5 }
  0x35   : > { %617 = vst [vmem:[%s13703_s27 + $0x230] sm:$0xff] %v616_v6  ;;  %619 = vst [vmem:[%s13703_s27 + $0x238] sm:$0xff] %v618_v7  ;;  %v620_v8 = vld [vmem:[%s13695_s26 + $0x480] sm:$0xff]  ;;  %v622_v9 = vld [vmem:[%s13695_s26 + $0x490] sm:$0xff] }
  0x36   : > { %v624_v10 = vld [vmem:[%s13695_s26 + $0x4a0] sm:$0xff]  ;;  %621 = vst [vmem:[%s13703_s27 + $0x240] sm:$0xff] %v620_v8  ;;  %623 = vst [vmem:[%s13703_s27 + $0x248] sm:$0xff] %v622_v9  ;;  %v626_v11 = vld [vmem:[%s13695_s26 + $0x4b0] sm:$0xff] }
  0x37   : > { %625 = vst [vmem:[%s13703_s27 + $0x250] sm:$0xff] %v624_v10  ;;  %v628_v12 = vld [vmem:[%s13695_s26 + $0x4c0] sm:$0xff]  ;;  %v630_v13 = vld [vmem:[%s13695_s26 + $0x4d0] sm:$0xff]  ;;  %627 = vst [vmem:[%s13703_s27 + $0x258] sm:$0xff] %v626_v11 }
  0x38   : > { %629 = vst [vmem:[%s13703_s27 + $0x260] sm:$0xff] %v628_v12  ;;  %631 = vst [vmem:[%s13703_s27 + $0x268] sm:$0xff] %v630_v13  ;;  %v632_v14 = vld [vmem:[%s13695_s26 + $0x4e0] sm:$0xff]  ;;  %v634_v15 = vld [vmem:[%s13695_s26 + $0x4f0] sm:$0xff] }
  0x39   : > { %v636_v16 = vld [vmem:[%s13695_s26 + $0x500] sm:$0xff]  ;;  %633 = vst [vmem:[%s13703_s27 + $0x270] sm:$0xff] %v632_v14  ;;  %635 = vst [vmem:[%s13703_s27 + $0x278] sm:$0xff] %v634_v15  ;;  %v638_v17 = vld [vmem:[%s13695_s26 + $0x510] sm:$0xff] }
  0x3a   : > { %637 = vst [vmem:[%s13703_s27 + $0x280] sm:$0xff] %v636_v16  ;;  %v640_v18 = vld [vmem:[%s13695_s26 + $0x520] sm:$0xff]  ;;  %v642_v19 = vld [vmem:[%s13695_s26 + $0x530] sm:$0xff]  ;;  %639 = vst [vmem:[%s13703_s27 + $0x288] sm:$0xff] %v638_v17 }
  0x3b   : > { %641 = vst [vmem:[%s13703_s27 + $0x290] sm:$0xff] %v640_v18  ;;  %643 = vst [vmem:[%s13703_s27 + $0x298] sm:$0xff] %v642_v19  ;;  %v644_v20 = vld [vmem:[%s13695_s26 + $0x540] sm:$0xff]  ;;  %v646_v21 = vld [vmem:[%s13695_s26 + $0x550] sm:$0xff] }
  0x3c   : > { %v648_v22 = vld [vmem:[%s13695_s26 + $0x560] sm:$0xff]  ;;  %645 = vst [vmem:[%s13703_s27 + $0x2a0] sm:$0xff] %v644_v20  ;;  %647 = vst [vmem:[%s13703_s27 + $0x2a8] sm:$0xff] %v646_v21  ;;  %v650_v23 = vld [vmem:[%s13695_s26 + $0x570] sm:$0xff] }
  0x3d   : > { %649 = vst [vmem:[%s13703_s27 + $0x2b0] sm:$0xff] %v648_v22  ;;  %v652_v24 = vld [vmem:[%s13695_s26 + $0x580] sm:$0xff]  ;;  %v654_v25 = vld [vmem:[%s13695_s26 + $0x590] sm:$0xff]  ;;  %651 = vst [vmem:[%s13703_s27 + $0x2b8] sm:$0xff] %v650_v23 }
  0x3e   : > { %653 = vst [vmem:[%s13703_s27 + $0x2c0] sm:$0xff] %v652_v24  ;;  %655 = vst [vmem:[%s13703_s27 + $0x2c8] sm:$0xff] %v654_v25  ;;  %v656_v26 = vld [vmem:[%s13695_s26 + $0x5a0] sm:$0xff]  ;;  %v658_v27 = vld [vmem:[%s13695_s26 + $0x5b0] sm:$0xff] }
  0x3f   : > { %v660_v28 = vld [vmem:[%s13695_s26 + $0x5c0] sm:$0xff]  ;;  %657 = vst [vmem:[%s13703_s27 + $0x2d0] sm:$0xff] %v656_v26  ;;  %659 = vst [vmem:[%s13703_s27 + $0x2d8] sm:$0xff] %v658_v27  ;;  %v662_v29 = vld [vmem:[%s13695_s26 + $0x5d0] sm:$0xff] }
  0x40   : > { %661 = vst [vmem:[%s13703_s27 + $0x2e0] sm:$0xff] %v660_v28  ;;  %v664_v30 = vld [vmem:[%s13695_s26 + $0x5e0] sm:$0xff]  ;;  %v666_v31 = vld [vmem:[%s13695_s26 + $0x5f0] sm:$0xff]  ;;  %663 = vst [vmem:[%s13703_s27 + $0x2e8] sm:$0xff] %v662_v29 }
  0x41   : > { %665 = vst [vmem:[%s13703_s27 + $0x2f0] sm:$0xff] %v664_v30  ;;  %667 = vst [vmem:[%s13703_s27 + $0x2f8] sm:$0xff] %v666_v31  ;;  %v668_v32 = vld [vmem:[%s13695_s26 + $0x600] sm:$0xff]  ;;  %v670_v33 = vld [vmem:[%s13695_s26 + $0x610] sm:$0xff] }
  0x42   : > { %v672_v34 = vld [vmem:[%s13695_s26 + $0x620] sm:$0xff]  ;;  %669 = vst [vmem:[%s13703_s27 + $0x300] sm:$0xff] %v668_v32  ;;  %671 = vst [vmem:[%s13703_s27 + $0x308] sm:$0xff] %v670_v33  ;;  %v674_v35 = vld [vmem:[%s13695_s26 + $0x630] sm:$0xff] }
  0x43   : > { %673 = vst [vmem:[%s13703_s27 + $0x310] sm:$0xff] %v672_v34  ;;  %v676_v36 = vld [vmem:[%s13695_s26 + $0x640] sm:$0xff]  ;;  %v678_v37 = vld [vmem:[%s13695_s26 + $0x650] sm:$0xff]  ;;  %675 = vst [vmem:[%s13703_s27 + $0x318] sm:$0xff] %v674_v35 }
  0x44   : > { %677 = vst [vmem:[%s13703_s27 + $0x320] sm:$0xff] %v676_v36  ;;  %679 = vst [vmem:[%s13703_s27 + $0x328] sm:$0xff] %v678_v37  ;;  %v680_v38 = vld [vmem:[%s13695_s26 + $0x660] sm:$0xff]  ;;  %v682_v39 = vld [vmem:[%s13695_s26 + $0x670] sm:$0xff] }
  0x45   : > { %v684_v40 = vld [vmem:[%s13695_s26 + $0x680] sm:$0xff]  ;;  %681 = vst [vmem:[%s13703_s27 + $0x330] sm:$0xff] %v680_v38  ;;  %683 = vst [vmem:[%s13703_s27 + $0x338] sm:$0xff] %v682_v39  ;;  %v686_v41 = vld [vmem:[%s13695_s26 + $0x690] sm:$0xff] }
  0x46   : > { %685 = vst [vmem:[%s13703_s27 + $0x340] sm:$0xff] %v684_v40  ;;  %v688_v42 = vld [vmem:[%s13695_s26 + $0x6a0] sm:$0xff]  ;;  %v690_v43 = vld [vmem:[%s13695_s26 + $0x6b0] sm:$0xff]  ;;  %687 = vst [vmem:[%s13703_s27 + $0x348] sm:$0xff] %v686_v41 }
  0x47   : > { %689 = vst [vmem:[%s13703_s27 + $0x350] sm:$0xff] %v688_v42  ;;  %691 = vst [vmem:[%s13703_s27 + $0x358] sm:$0xff] %v690_v43  ;;  %v692_v44 = vld [vmem:[%s13695_s26 + $0x6c0] sm:$0xff]  ;;  %v694_v45 = vld [vmem:[%s13695_s26 + $0x6d0] sm:$0xff] }
  0x48   : > { %v696_v46 = vld [vmem:[%s13695_s26 + $0x6e0] sm:$0xff]  ;;  %693 = vst [vmem:[%s13703_s27 + $0x360] sm:$0xff] %v692_v44  ;;  %695 = vst [vmem:[%s13703_s27 + $0x368] sm:$0xff] %v694_v45  ;;  %v698_v47 = vld [vmem:[%s13695_s26 + $0x6f0] sm:$0xff] }
  0x49   : > { %697 = vst [vmem:[%s13703_s27 + $0x370] sm:$0xff] %v696_v46  ;;  %v700_v48 = vld [vmem:[%s13695_s26 + $0x700] sm:$0xff]  ;;  %v702_v49 = vld [vmem:[%s13695_s26 + $0x710] sm:$0xff]  ;;  %699 = vst [vmem:[%s13703_s27 + $0x378] sm:$0xff] %v698_v47 }
  0x4a   : > { %701 = vst [vmem:[%s13703_s27 + $0x380] sm:$0xff] %v700_v48  ;;  %703 = vst [vmem:[%s13703_s27 + $0x388] sm:$0xff] %v702_v49  ;;  %v704_v50 = vld [vmem:[%s13695_s26 + $0x720] sm:$0xff]  ;;  %v706_v51 = vld [vmem:[%s13695_s26 + $0x730] sm:$0xff] }
  0x4b   : > { %v708_v52 = vld [vmem:[%s13695_s26 + $0x740] sm:$0xff]  ;;  %705 = vst [vmem:[%s13703_s27 + $0x390] sm:$0xff] %v704_v50  ;;  %707 = vst [vmem:[%s13703_s27 + $0x398] sm:$0xff] %v706_v51  ;;  %v710_v53 = vld [vmem:[%s13695_s26 + $0x750] sm:$0xff] }
  0x4c   : > { %709 = vst [vmem:[%s13703_s27 + $0x3a0] sm:$0xff] %v708_v52  ;;  %v712_v54 = vld [vmem:[%s13695_s26 + $0x760] sm:$0xff]  ;;  %v714_v55 = vld [vmem:[%s13695_s26 + $0x770] sm:$0xff]  ;;  %711 = vst [vmem:[%s13703_s27 + $0x3a8] sm:$0xff] %v710_v53 }
  0x4d   : > { %713 = vst [vmem:[%s13703_s27 + $0x3b0] sm:$0xff] %v712_v54  ;;  %715 = vst [vmem:[%s13703_s27 + $0x3b8] sm:$0xff] %v714_v55  ;;  %v716_v56 = vld [vmem:[%s13695_s26 + $0x780] sm:$0xff]  ;;  %v718_v57 = vld [vmem:[%s13695_s26 + $0x790] sm:$0xff] }
  0x4e   : > { %v720_v58 = vld [vmem:[%s13695_s26 + $0x7a0] sm:$0xff]  ;;  %717 = vst [vmem:[%s13703_s27 + $0x3c0] sm:$0xff] %v716_v56  ;;  %719 = vst [vmem:[%s13703_s27 + $0x3c8] sm:$0xff] %v718_v57  ;;  %v722_v59 = vld [vmem:[%s13695_s26 + $0x7b0] sm:$0xff] }
  0x4f   : > { %721 = vst [vmem:[%s13703_s27 + $0x3d0] sm:$0xff] %v720_v58  ;;  %v724_v60 = vld [vmem:[%s13695_s26 + $0x7c0] sm:$0xff]  ;;  %v726_v61 = vld [vmem:[%s13695_s26 + $0x7d0] sm:$0xff]  ;;  %723 = vst [vmem:[%s13703_s27 + $0x3d8] sm:$0xff] %v722_v59 }
  0x50   : > { %725 = vst [vmem:[%s13703_s27 + $0x3e0] sm:$0xff] %v724_v60  ;;  %727 = vst [vmem:[%s13703_s27 + $0x3e8] sm:$0xff] %v726_v61  ;;  %v728_v62 = vld [vmem:[%s13695_s26 + $0x7e0] sm:$0xff]  ;;  %v730_v63 = vld [vmem:[%s13695_s26 + $0x7f0] sm:$0xff] }
  0x51   : > { %v732_v0 = vld [vmem:[%s13695_s26 + $0x800] sm:$0xff]  ;;  %729 = vst [vmem:[%s13703_s27 + $0x3f0] sm:$0xff] %v728_v62  ;;  %731 = vst [vmem:[%s13703_s27 + $0x3f8] sm:$0xff] %v730_v63  ;;  %v734_v1 = vld [vmem:[%s13695_s26 + $0x810] sm:$0xff] }
  0x52   : > { %733 = vst [vmem:[%s13703_s27 + $0x400] sm:$0xff] %v732_v0  ;;  %v736_v2 = vld [vmem:[%s13695_s26 + $0x820] sm:$0xff]  ;;  %v738_v3 = vld [vmem:[%s13695_s26 + $0x830] sm:$0xff]  ;;  %735 = vst [vmem:[%s13703_s27 + $0x408] sm:$0xff] %v734_v1 }
  0x53   : > { %737 = vst [vmem:[%s13703_s27 + $0x410] sm:$0xff] %v736_v2  ;;  %739 = vst [vmem:[%s13703_s27 + $0x418] sm:$0xff] %v738_v3  ;;  %v740_v4 = vld [vmem:[%s13695_s26 + $0x840] sm:$0xff]  ;;  %v742_v5 = vld [vmem:[%s13695_s26 + $0x850] sm:$0xff] }
  0x54   : > { %v744_v6 = vld [vmem:[%s13695_s26 + $0x860] sm:$0xff]  ;;  %741 = vst [vmem:[%s13703_s27 + $0x420] sm:$0xff] %v740_v4  ;;  %743 = vst [vmem:[%s13703_s27 + $0x428] sm:$0xff] %v742_v5  ;;  %v746_v7 = vld [vmem:[%s13695_s26 + $0x870] sm:$0xff] }
  0x55   : > { %745 = vst [vmem:[%s13703_s27 + $0x430] sm:$0xff] %v744_v6  ;;  %v748_v8 = vld [vmem:[%s13695_s26 + $0x880] sm:$0xff]  ;;  %v750_v9 = vld [vmem:[%s13695_s26 + $0x890] sm:$0xff]  ;;  %747 = vst [vmem:[%s13703_s27 + $0x438] sm:$0xff] %v746_v7 }
  0x56   : > { %749 = vst [vmem:[%s13703_s27 + $0x440] sm:$0xff] %v748_v8  ;;  %751 = vst [vmem:[%s13703_s27 + $0x448] sm:$0xff] %v750_v9  ;;  %v752_v10 = vld [vmem:[%s13695_s26 + $0x8a0] sm:$0xff]  ;;  %v754_v11 = vld [vmem:[%s13695_s26 + $0x8b0] sm:$0xff] }
  0x57   : > { %v756_v12 = vld [vmem:[%s13695_s26 + $0x8c0] sm:$0xff]  ;;  %753 = vst [vmem:[%s13703_s27 + $0x450] sm:$0xff] %v752_v10  ;;  %755 = vst [vmem:[%s13703_s27 + $0x458] sm:$0xff] %v754_v11  ;;  %v758_v13 = vld [vmem:[%s13695_s26 + $0x8d0] sm:$0xff] }
  0x58   : > { %757 = vst [vmem:[%s13703_s27 + $0x460] sm:$0xff] %v756_v12  ;;  %v760_v14 = vld [vmem:[%s13695_s26 + $0x8e0] sm:$0xff]  ;;  %v762_v15 = vld [vmem:[%s13695_s26 + $0x8f0] sm:$0xff]  ;;  %759 = vst [vmem:[%s13703_s27 + $0x468] sm:$0xff] %v758_v13 }
  0x59   : > { %761 = vst [vmem:[%s13703_s27 + $0x470] sm:$0xff] %v760_v14  ;;  %763 = vst [vmem:[%s13703_s27 + $0x478] sm:$0xff] %v762_v15 }
  0x5a PF: > { %p11037_p6 = scmp.ge.s32.totalorder %s13629_s16, 1  ;;  %p776_p7 = scmp.lt.s32.totalorder %s13629_s16, 3 }
  0x5c   : > { %p777_p8 = pnand %p11037_p6, %p776_p7 }
  0x5e   : > { %780 = sbr.rel (%p777_p8) target bundleno = 1509 (0x5e5), region = 66 }
  0x65   : > { %s783_s28 = sand.u32 1, %s13613_s12   ;;  %v15658_v16 = vmov 0   ;;  %v13119_v51 = vld [vmem:[%s15654_s0] sm:$0xff]   ;;  %v13123_v53 = vld [vmem:[%s15654_s0 + $0x2c] sm:$0xff]   ;;  %v13128_v61 = vld [vmem:[%s15654_s0 + $0x34] sm:$0xff]   ;;  %s11038_s5 = sshll.u32 %s13621_s14, 1 }
  0x66   : > { %s13029_s29 = smul.u32 1152, %s783_s28  ;;  %1223 = vmatprep.mubr.bf16.mxu1 %v15658_v16  ;;  %5327 = vmatprep.mubr.bf16.mxu0 %v15658_v16  ;;  %v13127_v60 = vld [vmem:[%s15654_s0 + $0x8] sm:$0xff]   ;;  %v13129_v2 = vld [vmem:[%s15654_s0 + $0x10] sm:$0xff]   ;;  %v13130_v5 = vld [vmem:[%s15654_s0 + $0x3c] sm:$0xff]   ;;  %p824_p9 = scmp.lt.s32.totalorder %s11038_s5, 3 }
  0x67   : > { %v13134_v8 = vld [vmem:[%s15654_s0 + $0x18] sm:$0xff]   ;;  %v13135_v10 = vld [vmem:[%s15654_s0 + $0x44] sm:$0xff]  }
  0x68   : > { %s13992_s30 = scalar_lea.vmem [#allocation3], %s13029_s29  ;;  %v13136_v15 = vld [vmem:[%s15654_s0 + $0x28] sm:$0xff]   ;;  %s15702_s5 = smov (!%p824_p9, %s11038_s5), 3 }
  0x69   : > { %v13071_v17 = vld [vmem:[%s13992_s30 + $0x4] ss:$8 sps:$4 sm:$0xff]   ;;  %v13075_v19 = vld [vmem:[%s13992_s30] ss:$8 sps:$4 sm:$0xff]   ;;  %v13077_v21 = vld [vmem:[%s13992_s30 + $0x14] ss:$8 sps:$4 sm:$0xff]   ;;  %s826_s19 = scalar_lea.vmem %s15656_s2, %s15702_s5 }
  0x6a   : > { %v13073_v18 = vld [vmem:[%s13992_s30 + $0x204] ss:$8 sps:$4 sm:$0xff]   ;;  %1191 = vmatprep.subr.bf16.mxu1 %v13071_v17  ;;  %v13076_v20 = vld [vmem:[%s13992_s30 + $0x200] ss:$8 sps:$4 sm:$0xff]   ;;  %v13079_v22 = vld [vmem:[%s13992_s30 + $0x214] ss:$8 sps:$4 sm:$0xff]  }
  0x6b   : > { %5295 = vmatprep.subr.bf16.mxu0 %v13073_v18  ;;  %1192 = vmatpush1.bf16.msra.mxu1 %v13075_v19  ;;  %v13081_v23 = vld [vmem:[%s13992_s30 + $0x10] ss:$8 sps:$4 sm:$0xff]   ;;  %v13083_v25 = vld [vmem:[%s13992_s30 + $0x24] ss:$8 sps:$4 sm:$0xff]   ;;  %v13087_v27 = vld [vmem:[%s13992_s30 + $0x20] ss:$8 sps:$4 sm:$0xff]  }
  0x6c   : > { %5296 = vmatpush1.bf16.msra.mxu0 %v13076_v20  ;;  %1193 = vmatprep.subr.bf16.mxu1 %v13077_v21  ;;  %v13082_v24 = vld [vmem:[%s13992_s30 + $0x210] ss:$8 sps:$4 sm:$0xff]   ;;  %v13085_v26 = vld [vmem:[%s13992_s30 + $0x224] ss:$8 sps:$4 sm:$0xff]   ;;  %v13088_v28 = vld [vmem:[%s13992_s30 + $0x220] ss:$8 sps:$4 sm:$0xff]  }
  0x6d   : > { %5297 = vmatprep.subr.bf16.mxu0 %v13079_v22  ;;  %v13089_v29 = vld [vmem:[%s13992_s30 + $0x34] ss:$8 sps:$4 sm:$0xff]   ;;  %v13093_v31 = vld [vmem:[%s13992_s30 + $0x30] ss:$8 sps:$4 sm:$0xff]   ;;  %v13095_v33 = vld [vmem:[%s13992_s30 + $0x44] ss:$8 sps:$4 sm:$0xff]  }
  0x6e   : > { %v13091_v30 = vld [vmem:[%s13992_s30 + $0x234] ss:$8 sps:$4 sm:$0xff]   ;;  %v13094_v32 = vld [vmem:[%s13992_s30 + $0x230] ss:$8 sps:$4 sm:$0xff]   ;;  %v13097_v34 = vld [vmem:[%s13992_s30 + $0x244] ss:$8 sps:$4 sm:$0xff]  }
  0x6f   : > { %1194 = vmatpush1.bf16.msra.mxu1 %v13081_v23  ;;  %v13099_v35 = vld [vmem:[%s13992_s30 + $0x40] ss:$8 sps:$4 sm:$0xff]   ;;  %v13101_v37 = vld [vmem:[%s13992_s30 + $0x54] ss:$8 sps:$4 sm:$0xff]   ;;  %v13105_v39 = vld [vmem:[%s13992_s30 + $0x50] ss:$8 sps:$4 sm:$0xff]  }
  0x70   : > { %5298 = vmatpush1.bf16.msra.mxu0 %v13082_v24  ;;  %1195 = vmatprep.subr.bf16.mxu1 %v13083_v25  ;;  %v13100_v36 = vld [vmem:[%s13992_s30 + $0x240] ss:$8 sps:$4 sm:$0xff]   ;;  %v13103_v38 = vld [vmem:[%s13992_s30 + $0x254] ss:$8 sps:$4 sm:$0xff]   ;;  %v13106_v40 = vld [vmem:[%s13992_s30 + $0x250] ss:$8 sps:$4 sm:$0xff]  }
  0x71   : > { %5299 = vmatprep.subr.bf16.mxu0 %v13085_v26  ;;  %v13107_v41 = vld [vmem:[%s13992_s30 + $0x64] ss:$8 sps:$4 sm:$0xff]   ;;  %v13111_v43 = vld [vmem:[%s13992_s30 + $0x60] ss:$8 sps:$4 sm:$0xff]   ;;  %v13113_v45 = vld [vmem:[%s13992_s30 + $0x74] ss:$8 sps:$4 sm:$0xff]  }
  0x72   : > { %v13109_v42 = vld [vmem:[%s13992_s30 + $0x264] ss:$8 sps:$4 sm:$0xff]   ;;  %v13112_v44 = vld [vmem:[%s13992_s30 + $0x260] ss:$8 sps:$4 sm:$0xff]   ;;  %v13115_v46 = vld [vmem:[%s13992_s30 + $0x274] ss:$8 sps:$4 sm:$0xff]  }
  0x73   : > { %1196 = vmatpush1.bf16.msra.mxu1 %v13087_v27  ;;  %v13117_v47 = vld [vmem:[%s13992_s30 + $0x70] ss:$8 sps:$4 sm:$0xff]   ;;  %v13122_v49 = vld [vmem:[%s13992_s30 + $0x84] ss:$8 sps:$4 sm:$0xff]   ;;  %v13120_v52 = vld [vmem:[%s13992_s30 + $0x80] ss:$8 sps:$4 sm:$0xff]  }
  0x74   : > { %5300 = vmatpush1.bf16.msra.mxu0 %v13088_v28  ;;  %1197 = vmatprep.subr.bf16.mxu1 %v13089_v29  ;;  %v13118_v48 = vld [vmem:[%s13992_s30 + $0x270] ss:$8 sps:$4 sm:$0xff]   ;;  %v13126_v50 = vld [vmem:[%s13992_s30 + $0x284] ss:$8 sps:$4 sm:$0xff]   ;;  %v13124_v54 = vld [vmem:[%s13992_s30 + $0x280] ss:$8 sps:$4 sm:$0xff]  }
  0x75   : > { %5301 = vmatprep.subr.bf16.mxu0 %v13091_v30  ;;  %v13133_v55 = vld [vmem:[%s13992_s30 + $0x294] ss:$8 sps:$4 sm:$0xff]   ;;  %v13131_v57 = vld [vmem:[%s13992_s30 + $0x290] ss:$8 sps:$4 sm:$0xff]   ;;  %v13143_v59 = vld [vmem:[%s13992_s30 + $0x2a4] ss:$8 sps:$4 sm:$0xff]  }
  0x76   : > { %v13139_v56 = vld [vmem:[%s13992_s30 + $0x94] ss:$8 sps:$4 sm:$0xff]   ;;  %v13137_v58 = vld [vmem:[%s13992_s30 + $0x90] ss:$8 sps:$4 sm:$0xff]   ;;  %v13141_v62 = vld [vmem:[%s13992_s30 + $0x2a0] ss:$8 sps:$4 sm:$0xff]  }
  0x77   : > { %1198 = vmatpush1.bf16.msra.mxu1 %v13093_v31  ;;  %v13150_v63 = vld [vmem:[%s13992_s30 + $0x2b4] ss:$8 sps:$4 sm:$0xff]   ;;  %v13154_v0 = vld [vmem:[%s13992_s30 + $0xa0] ss:$8 sps:$4 sm:$0xff]   ;;  %v13156_v1 = vld [vmem:[%s13992_s30 + $0xa4] ss:$8 sps:$4 sm:$0xff]  }
  0x78   : > { %5302 = vmatpush1.bf16.msra.mxu0 %v13094_v32  ;;  %1199 = vmatprep.subr.bf16.mxu1 %v13095_v33  ;;  %v13148_v3 = vld [vmem:[%s13992_s30 + $0x2b0] ss:$8 sps:$4 sm:$0xff]   ;;  %v13160_v4 = vld [vmem:[%s13992_s30 + $0x2c4] ss:$8 sps:$4 sm:$0xff]   ;;  %v13158_v6 = vld [vmem:[%s13992_s30 + $0x2c0] ss:$8 sps:$4 sm:$0xff]  }
  0x79   : > { %5303 = vmatprep.subr.bf16.mxu0 %v13097_v34  ;;  %v13167_v7 = vld [vmem:[%s13992_s30 + $0x2d4] ss:$8 sps:$4 sm:$0xff]   ;;  %v13165_v9 = vld [vmem:[%s13992_s30 + $0x2d0] ss:$8 sps:$4 sm:$0xff]   ;;  %v13175_v13 = vld [vmem:[%s13992_s30 + $0x2e0] ss:$8 sps:$4 sm:$0xff]  }
  0x7a   : > { %v13171_v11 = vld [vmem:[%s13992_s30 + $0xb0] ss:$8 sps:$4 sm:$0xff]   ;;  %v13173_v12 = vld [vmem:[%s13992_s30 + $0xb4] ss:$8 sps:$4 sm:$0xff]   ;;  %v13177_v14 = vld [vmem:[%s13992_s30 + $0x2e4] ss:$8 sps:$4 sm:$0xff]  }
  0x7b   : > { %1200 = vmatpush1.bf16.msra.mxu1 %v13099_v35  ;;  %v13140_v17 = vld [vmem:[%s15654_s0 + $0x54] sm:$0xff]   ;;  %v13188_v20 = vld [vmem:[%s13992_s30 + $0xc0] ss:$8 sps:$4 sm:$0xff]   ;;  %v13190_v21 = vld [vmem:[%s13992_s30 + $0xc4] ss:$8 sps:$4 sm:$0xff]  }
  0x7c   : > { %5304 = vmatpush1.bf16.msra.mxu0 %v13100_v36  ;;  %1201 = vmatprep.subr.bf16.mxu1 %v13101_v37  ;;  %v13182_v18 = vld [vmem:[%s13992_s30 + $0x2f0] ss:$8 sps:$4 sm:$0xff]   ;;  %v13184_v19 = vld [vmem:[%s13992_s30 + $0x2f4] ss:$8 sps:$4 sm:$0xff]   ;;  %v13194_v23 = vld [vmem:[%s13992_s30 + $0x304] ss:$8 sps:$4 sm:$0xff]  }
  0x7d   : > { %5305 = vmatprep.subr.bf16.mxu0 %v13103_v38  ;;  %v13144_v22 = vld [vmem:[%s15654_s0 + $0x30] sm:$0xff]   ;;  %v13145_v24 = vld [vmem:[%s15654_s0 + $0x5c] sm:$0xff]   ;;  %v13147_v28 = vld [vmem:[%s15654_s0 + $0x64] sm:$0xff]  }
  0x7e   : > { %v13146_v25 = vld [vmem:[%s15654_s0 + $0x38] sm:$0xff]   ;;  %v13151_v29 = vld [vmem:[%s15654_s0 + $0x40] sm:$0xff]   ;;  %v13152_v30 = vld [vmem:[%s15654_s0 + $0x6c] sm:$0xff]  }
  0x7f   : > { %1202 = vmatpush1.bf16.msra.mxu1 %v13105_v39  ;;  %v13202_v26 = vld [vmem:[%s13992_s30 + $0xd0] ss:$8 sps:$4 sm:$0xff]   ;;  %v13204_v27 = vld [vmem:[%s13992_s30 + $0xd4] ss:$8 sps:$4 sm:$0xff]   ;;  %v13216_v33 = vld [vmem:[%s13992_s30 + $0xe0] ss:$8 sps:$4 sm:$0xff]  }
  0x80   : > { %5306 = vmatpush1.bf16.msra.mxu0 %v13106_v40  ;;  %1203 = vmatprep.subr.bf16.mxu1 %v13107_v41  ;;  %v13153_v31 = vld [vmem:[%s15654_s0 + $0x50] sm:$0xff]   ;;  %v13157_v32 = vld [vmem:[%s15654_s0 + $0x7c] sm:$0xff]   ;;  %v13218_v34 = vld [vmem:[%s13992_s30 + $0xe4] ss:$8 sps:$4 sm:$0xff]  }
  0x81   : > { %5307 = vmatprep.subr.bf16.mxu0 %v13109_v42  ;;  %v13161_v35 = vld [vmem:[%s15654_s0 + $0x58] sm:$0xff]   ;;  %v13162_v36 = vld [vmem:[%s15654_s0 + $0x84] sm:$0xff]   ;;  %v13164_v38 = vld [vmem:[%s15654_s0 + $0x8c] sm:$0xff]  }
  0x82   : > { %v13163_v37 = vld [vmem:[%s15654_s0 + $0x60] sm:$0xff]   ;;  %v13168_v39 = vld [vmem:[%s15654_s0 + $0x68] sm:$0xff]   ;;  %v13169_v40 = vld [vmem:[%s15654_s0 + $0x94] sm:$0xff]  }
  0x83   : > { %1204 = vmatpush1.bf16.msra.mxu1 %v13111_v43  ;;  %v13170_v41 = vld [vmem:[%s15654_s0 + $0x78] sm:$0xff]   ;;  %v13174_v42 = vld [vmem:[%s15654_s0 + $0xa4] sm:$0xff]  }
  0x84   : > { %5308 = vmatpush1.bf16.msra.mxu0 %v13112_v44  ;;  %1205 = vmatprep.subr.bf16.mxu1 %v13113_v45  ;;  %v13230_v43 = vld [vmem:[%s13992_s30 + $0xf0] ss:$8 sps:$4 sm:$0xff]   ;;  %v13232_v44 = vld [vmem:[%s13992_s30 + $0xf4] ss:$8 sps:$4 sm:$0xff]   ;;  %v13178_v45 = vld [vmem:[%s15654_s0 + $0x80] sm:$0xff]  }
  0x85   : > { %5309 = vmatprep.subr.bf16.mxu0 %v13115_v46  ;;  %v13179_v46 = vld [vmem:[%s15654_s0 + $0xac] sm:$0xff]  }
  0x87   : > { %1206 = vmatpush1.bf16.msra.mxu1 %v13117_v47  ;;  %v13180_v47 = vld [vmem:[%s15654_s0 + $0x88] sm:$0xff]  }
  0x88   : > { %5310 = vmatpush1.bf16.msra.mxu0 %v13118_v48  ;;  %2025 = vmatprep.subr.bf16.mxu1 %v13122_v49  ;;  %v13181_v48 = vld [vmem:[%s15654_s0 + $0xb4] sm:$0xff]  }
  0x89   : > { %6385 = vmatprep.subr.bf16.mxu0 %v13126_v50  ;;  %v13185_v49 = vld [vmem:[%s15654_s0 + $0x90] sm:$0xff]   ;;  %v13186_v50 = vld [vmem:[%s15654_s0 + $0xbc] sm:$0xff]  }
  0x8a   : > { %1224 = vmatmul.mubr.bf16.vlgmr.msra.gmra.mrb[0].mxu1 %v13119_v51  ;;  %v13187_v51 = vld [vmem:[%s15654_s0 + $0xa0] sm:$0xff]  }
  0x8b   : > { %5328 = vmatmul.mubr.bf16.vlgmr.msra.gmra.mrb[0].mxu0 %v13123_v53  ;;  %2026 = vmatpush1.bf16.msra.mxu1 %v13120_v52  ;;  %v13191_v52 = vld [vmem:[%s15654_s0 + $0x30] sm:$0xff]   ;;  %v13192_v53 = vld [vmem:[%s13992_s30 + $0x300] ss:$8 sps:$4 sm:$0xff]  }
  0x8c   : > { %6386 = vmatpush1.bf16.msra.mxu0 %v13124_v54  ;;  %1233 = vmatprep.mubr.bf16.mxu1 %v15658_v16  ;;  %v13208_v54 = vld [vmem:[%s13992_s30 + $0x314] ss:$8 sps:$4 sm:$0xff]  }
  0x8d   : > { %5337 = vmatprep.mubr.bf16.mxu0 %v15658_v16  ;;  %6387 = vmatprep.subr.bf16.mxu0 %v13133_v55  ;;  %v13246_v55 = vld [vmem:[%s13992_s30 + $0x104] ss:$8 sps:$4 sm:$0xff]  }
  0x8e   : > { %2027 = vmatprep.subr.bf16.mxu1 %v13139_v56  ;;  %v13206_v56 = vld [vmem:[%s13992_s30 + $0x310] ss:$8 sps:$4 sm:$0xff]  }
  0x8f   : > { %2028 = vmatpush1.bf16.msra.mxu1 %v13137_v58  ;;  %v13196_v58 = vld [vmem:[%s15654_s0 + $0x38] sm:$0xff]  }
  0x90   : > { %6388 = vmatpush1.bf16.msra.mxu0 %v13131_v57  ;;  %2029 = vmatprep.subr.bf16.mxu1 %v13156_v1  ;;  %v13195_v57 = vld [vmem:[%s15654_s0 + $0xa8] sm:$0xff]   ;;  %v13198_v1 = vld [vmem:[%s15654_s0 + $0x40] sm:$0xff]  }
  0x91   : > { %6389 = vmatprep.subr.bf16.mxu0 %v13143_v59  ;;  %v13222_v59 = vld [vmem:[%s13992_s30 + $0x324] ss:$8 sps:$4 sm:$0xff]  }
  0x92   : > { %1234 = vmatmul.mubr.bf16.gmra.mrb[4].mxu1 %v13127_v60  ;;  %v13220_v60 = vld [vmem:[%s13992_s30 + $0x320] ss:$8 sps:$4 sm:$0xff]  }
  0x93   : > { %5338 = vmatmul.mubr.bf16.gmra.mrb[4].mxu0 %v13128_v61  ;;  %1243 = vmatprep.mubr.bf16.mxu1 %v15658_v16  ;;  %v13236_v61 = vld [vmem:[%s13992_s30 + $0x334] ss:$8 sps:$4 sm:$0xff]  }
  0x94   : > { %5347 = vmatprep.mubr.bf16.mxu0 %v15658_v16  ;;  %6390 = vmatpush1.bf16.msra.mxu0 %v13141_v62  ;;  %v13234_v62 = vld [vmem:[%s13992_s30 + $0x330] ss:$8 sps:$4 sm:$0xff]  }
  0x95   : > { %6391 = vmatprep.subr.bf16.mxu0 %v13150_v63  ;;  %2030 = vmatpush1.bf16.msra.mxu1 %v13154_v0  ;;  %v13250_v63 = vld [vmem:[%s13992_s30 + $0x344] ss:$8 sps:$4 sm:$0xff]   ;;  %v13197_v0 = vld [vmem:[%s15654_s0 + $0xb0] sm:$0xff]  }
  0x96   : > { %2031 = vmatprep.subr.bf16.mxu1 %v13173_v12  ;;  %v13212_v12 = vld [vmem:[%s15654_s0 + $0x68] sm:$0xff]  }
  0x98   : > { %6392 = vmatpush1.bf16.msra.mxu0 %v13148_v3  ;;  %v13199_v3 = vld [vmem:[%s15654_s0 + $0xb8] sm:$0xff]  }
  0x99   : > { %6393 = vmatprep.subr.bf16.mxu0 %v13160_v4  ;;  %2032 = vmatpush1.bf16.msra.mxu1 %v13171_v11  ;;  %v13200_v4 = vld [vmem:[%s15654_s0 + $0x48] sm:$0xff]   ;;  %v13211_v11 = vld [vmem:[%s15654_s0 + $0xd8] sm:$0xff]  }
  0x9a   : > { %1244 = vmatmul.mubr.bf16.gmra.mrb[8].mxu1 %v13129_v2  ;;  %2033 = vmatprep.subr.bf16.mxu1 %v13190_v21  ;;  %v13248_v2 = vld [vmem:[%s13992_s30 + $0x340] ss:$8 sps:$4 sm:$0xff]  }
  0x9b   : > { %5348 = vmatmul.mubr.bf16.gmra.mrb[8].mxu0 %v13130_v5  ;;  %1253 = vmatprep.mubr.bf16.mxu1 %v15658_v16  ;;  %v13201_v5 = vld [vmem:[%s15654_s0 + $0xc8] sm:$0xff]  }
  0x9c   : > { %5357 = vmatprep.mubr.bf16.mxu0 %v15658_v16  ;;  %6394 = vmatpush1.bf16.msra.mxu0 %v13158_v6  ;;  %v13205_v6 = vld [vmem:[%s15654_s0 + $0x58] sm:$0xff]   ;;  %v13224_v21 = vld [vmem:[%s15654_s0 + $0x88] sm:$0xff]  }
  0x9d   : > { %6395 = vmatprep.subr.bf16.mxu0 %v13167_v7  ;;  %2034 = vmatpush1.bf16.msra.mxu1 %v13188_v20  ;;  %v13262_v7 = vld [vmem:[%s13992_s30 + $0x350] ss:$8 sps:$4 sm:$0xff]  }
  0x9e   : > { %2035 = vmatprep.subr.bf16.mxu1 %v13204_v27  ;;  %v13223_v20 = vld [vmem:[%s15654_s0 + $0xf8] sm:$0xff]   ;;  %v13233_v27 = vld [vmem:[%s15654_s0 + $0xa8] sm:$0xff]  }
  0xa0   : > { %6396 = vmatpush1.bf16.msra.mxu0 %v13165_v9  ;;  %v13209_v9 = vld [vmem:[%s15654_s0 + $0xd0] sm:$0xff]  }
  0xa1   : > { %6397 = vmatprep.subr.bf16.mxu0 %v13177_v14  ;;  %2036 = vmatpush1.bf16.msra.mxu1 %v13202_v26  ;;  %v13214_v14 = vld [vmem:[%s15654_s0 + $0x70] sm:$0xff]   ;;  %v13229_v26 = vld [vmem:[%s15654_s0 + $0x118] sm:$0xff]  }
  0xa2   : > { %1254 = vmatmul.mubr.bf16.gmra.mrb[12].mxu1 %v13134_v8  ;;  %2037 = vmatprep.subr.bf16.mxu1 %v13218_v34  ;;  %v13264_v8 = vld [vmem:[%s13992_s30 + $0x354] ss:$8 sps:$4 sm:$0xff]  }
  0xa3   : > { %5358 = vmatmul.mubr.bf16.gmra.mrb[12].mxu0 %v13135_v10  ;;  %1263 = vmatprep.mubr.bf16.mxu1 %v15658_v16  ;;  %v13210_v10 = vld [vmem:[%s15654_s0 + $0x60] sm:$0xff]   ;;  %v13241_v34 = vld [vmem:[%s15654_s0 + $0x130] sm:$0xff]  }
  0xa4   : > { %5367 = vmatprep.mubr.bf16.mxu0 %v15658_v16  ;;  %6398 = vmatpush1.bf16.msra.mxu0 %v13175_v13  ;;  %v13213_v13 = vld [vmem:[%s15654_s0 + $0xe0] sm:$0xff]  }
  0xa5   : > { %6399 = vmatprep.subr.bf16.mxu0 %v13184_v19  ;;  %2038 = vmatpush1.bf16.msra.mxu1 %v13216_v33  ;;  %v13278_v19 = vld [vmem:[%s13992_s30 + $0x364] ss:$8 sps:$4 sm:$0xff]   ;;  %v13240_v33 = vld [vmem:[%s15654_s0 + $0xb8] sm:$0xff]  }
  0xa6   : > { %2039 = vmatprep.subr.bf16.mxu1 %v13232_v44  ;;  %v13274_v44 = vld [vmem:[%s13992_s30 + $0x124] ss:$8 sps:$4 sm:$0xff]  }
  0xa8   : > { %6400 = vmatpush1.bf16.msra.mxu0 %v13182_v18  ;;  %v13276_v18 = vld [vmem:[%s13992_s30 + $0x360] ss:$8 sps:$4 sm:$0xff]  }
  0xa9   : > { %7475 = vmatprep.subr.bf16.mxu0 %v13194_v23  ;;  %2040 = vmatpush1.bf16.msra.mxu1 %v13230_v43  ;;  %v13226_v23 = vld [vmem:[%s15654_s0 + $0x90] sm:$0xff]   ;;  %v13252_v43 = vld [vmem:[%s15654_s0 + $0xd8] sm:$0xff]  }
  0xaa   : > { %1264 = vmatmul.mubr.bf16.gmra.mrb[16].mxu1 %v13136_v15  ;;  %3115 = vmatprep.subr.bf16.mxu1 %v13246_v55  ;;  %v13215_v15 = vld [vmem:[%s15654_s0 + $0xf0] sm:$0xff]   ;;  %v13261_v55 = vld [vmem:[%s15654_s0 + $0xf8] sm:$0xff]  }
  0xab   : > { %5368 = vmatmul.mubr.bf16.gmra.mrb[16].mxu0 %v13140_v17  ;;  %1273 = vmatprep.mubr.bf16.mxu1 %v15658_v16  ;;  %v13219_v17 = vld [vmem:[%s15654_s0 + $0x80] sm:$0xff]  }
  0xac   : > { %5377 = vmatprep.mubr.bf16.mxu0 %v15658_v16 }
  0xb2   : > { %1274 = vmatmul.mubr.bf16.gmra.mrb[20].mxu1 %v13144_v22  ;;  %v13225_v22 = vld [vmem:[%s15654_s0 + $0x100] sm:$0xff]  }
  0xb3   : > { %5378 = vmatmul.mubr.bf16.gmra.mrb[20].mxu0 %v13145_v24  ;;  %1283 = vmatprep.mubr.bf16.mxu1 %v15658_v16  ;;  %v13227_v24 = vld [vmem:[%s15654_s0 + $0x108] sm:$0xff]  }
  0xb4   : > { %5387 = vmatprep.mubr.bf16.mxu0 %v15658_v16 }
  0xba   : > { %1284 = vmatmul.mubr.bf16.gmra.mrb[24].mxu1 %v13146_v25  ;;  %v13228_v25 = vld [vmem:[%s15654_s0 + $0x98] sm:$0xff]  }
  0xbb   : > { %5388 = vmatmul.mubr.bf16.gmra.mrb[24].mxu0 %v13147_v28  ;;  %1293 = vmatprep.mubr.bf16.mxu1 %v15658_v16  ;;  %v13290_v28 = vld [vmem:[%s13992_s30 + $0x370] ss:$8 sps:$4 sm:$0xff]  }
  0xbc   : > { %5397 = vmatprep.mubr.bf16.mxu0 %v15658_v16 }
  0xc2   : > { %1294 = vmatmul.mubr.bf16.gmra.mrb[28].mxu1 %v13151_v29  ;;  %v13292_v29 = vld [vmem:[%s13992_s30 + $0x374] ss:$8 sps:$4 sm:$0xff]  }
  0xc3   : > { %5398 = vmatmul.mubr.bf16.gmra.mrb[28].mxu0 %v13152_v30  ;;  %1303 = vmatprep.mubr.bf16.mxu1 %v15658_v16  ;;  %v13237_v30 = vld [vmem:[%s15654_s0 + $0x120] sm:$0xff]  }
  0xc4   : > { %5407 = vmatprep.mubr.bf16.mxu0 %v15658_v16 }
  0xca   : > { %1304 = vmatmul.mubr.bf16.gmra.mrb[32].mxu1 %v13153_v31  ;;  %v13238_v31 = vld [vmem:[%s15654_s0 + $0xb0] sm:$0xff]  }
  0xcb   : > { %5408 = vmatmul.mubr.bf16.gmra.mrb[32].mxu0 %v13157_v32  ;;  %1313 = vmatprep.mubr.bf16.mxu1 %v15658_v16  ;;  %v13239_v32 = vld [vmem:[%s15654_s0 + $0x128] sm:$0xff]  }
  0xcc   : > { %5417 = vmatprep.mubr.bf16.mxu0 %v15658_v16 }
  0xd2   : > { %1314 = vmatmul.mubr.bf16.gmra.mrb[36].mxu1 %v13161_v35  ;;  %v13242_v35 = vld [vmem:[%s15654_s0 + $0xc0] sm:$0xff]  }
  0xd3   : > { %5418 = vmatmul.mubr.bf16.gmra.mrb[36].mxu0 %v13162_v36  ;;  %1323 = vmatprep.mubr.bf16.mxu1 %v15658_v16  ;;  %v13243_v36 = vld [vmem:[%s15654_s0 + $0x4] sm:$0xff]  }
  0xd4   : > { %5427 = vmatprep.mubr.bf16.mxu0 %v15658_v16 }
  0xda   : > { %1324 = vmatmul.mubr.bf16.gmra.mrb[40].mxu1 %v13163_v37  ;;  %v13247_v37 = vld [vmem:[%s15654_s0 + $0xd0] sm:$0xff]  }
  0xdb   : > { %5428 = vmatmul.mubr.bf16.gmra.mrb[40].mxu0 %v13164_v38  ;;  %1333 = vmatprep.mubr.bf16.mxu1 %v15658_v16  ;;  %v13244_v38 = vld [vmem:[%s13992_s30 + $0x100] ss:$8 sps:$4 sm:$0xff]  }
  0xdc   : > { %5437 = vmatprep.mubr.bf16.mxu0 %v15658_v16 }
  0xe2   : > { %1334 = vmatmul.mubr.bf16.gmra.mrb[44].mxu1 %v13168_v39  ;;  %v13260_v39 = vld [vmem:[%s13992_s30 + $0x114] ss:$8 sps:$4 sm:$0xff]  }
  0xe3   : > { %5438 = vmatmul.mubr.bf16.gmra.mrb[44].mxu0 %v13169_v40  ;;  %1343 = vmatprep.mubr.bf16.mxu1 %v15658_v16  ;;  %v13258_v40 = vld [vmem:[%s13992_s30 + $0x110] ss:$8 sps:$4 sm:$0xff]  }
  0xe4   : > { %5447 = vmatprep.mubr.bf16.mxu0 %v15658_v16 }
  0xea   : > { %1344 = vmatmul.mubr.bf16.gmra.mrb[48].mxu1 %v13170_v41  ;;  %v13306_v41 = vld [vmem:[%s13992_s30 + $0x384] ss:$8 sps:$4 sm:$0xff]  }
  0xeb   : > { %5448 = vmatmul.mubr.bf16.gmra.mrb[48].mxu0 %v13174_v42  ;;  %1353 = vmatprep.mubr.bf16.mxu1 %v15658_v16  ;;  %v13251_v42 = vld [vmem:[%s15654_s0 + $0xc] sm:$0xff]  }
  0xec   : > { %5457 = vmatprep.mubr.bf16.mxu0 %v15658_v16 }
  0xf2   : > { %1354 = vmatmul.mubr.bf16.gmra.mrb[52].mxu1 %v13178_v45  ;;  %v13272_v45 = vld [vmem:[%s13992_s30 + $0x120] ss:$8 sps:$4 sm:$0xff]  }
  0xf3   : > { %5458 = vmatmul.mubr.bf16.gmra.mrb[52].mxu0 %v13179_v46  ;;  %1363 = vmatprep.mubr.bf16.mxu1 %v15658_v16  ;;  %v13288_v46 = vld [vmem:[%s13992_s30 + $0x134] ss:$8 sps:$4 sm:$0xff]  }
  0xf4   : > { %5467 = vmatprep.mubr.bf16.mxu0 %v15658_v16 }
  0xfa   : > { %1364 = vmatmul.mubr.bf16.gmra.mrb[56].mxu1 %v13180_v47  ;;  %v13286_v47 = vld [vmem:[%s13992_s30 + $0x130] ss:$8 sps:$4 sm:$0xff]  }
  0xfb   : > { %5468 = vmatmul.mubr.bf16.gmra.mrb[56].mxu0 %v13181_v48  ;;  %1373 = vmatprep.mubr.bf16.mxu1 %v15658_v16  ;;  %v13302_v48 = vld [vmem:[%s13992_s30 + $0x144] ss:$8 sps:$4 sm:$0xff]  }
  0xfc   : > { %5477 = vmatprep.mubr.bf16.mxu0 %v15658_v16 }
 0x102   : > { %1374 = vmatmul.mubr.bf16.gmra.mrb[60].mxu1 %v13185_v49  ;;  %v13253_v49 = vld [vmem:[%s15654_s0 + $0x14] sm:$0xff]  }
 0x103   : > { %5478 = vmatmul.mubr.bf16.gmra.mrb[60].mxu0 %v13186_v50  ;;  %1383 = vmatprep.mubr.bf16.mxu1 %v15658_v16  ;;  %v13254_v50 = vld [vmem:[%s15654_s0 + $0xe0] sm:$0xff]  }
 0x104   : > { %6417 = vmatprep.mubr.bf16.mxu0 %v15658_v16 }
 0x10a   : > { %1384 = vmatmul.mubr.bf16.gmra.mrb[64].mxu1 %v13187_v51  ;;  %v13300_v51 = vld [vmem:[%s13992_s30 + $0x140] ss:$8 sps:$4 sm:$0xff]  }
 0x10b   : > { %6418 = vmatmul.mubr.bf16.vlgmr.msra.gmra.mrb[0].mxu0 %v13191_v52  ;;  %1393 = vmatprep.mubr.bf16.mxu1 %v15658_v16  ;;  %v13255_v52 = vld [vmem:[%s15654_s0 + $0x1c] sm:$0xff]  }
 0x10c   : > { %7476 = vmatpush1.bf16.msra.mxu0 %v13192_v53  ;;  %6427 = vmatprep.mubr.bf16.mxu0 %v15658_v16  ;;  %v13256_v53 = vld [vmem:[%s15654_s0 + $0xe8] sm:$0xff]  }
 0x10d   : > { %7477 = vmatprep.subr.bf16.mxu0 %v13208_v54  ;;  %v13257_v54 = vld [vmem:[%s15654_s0 + $0x2c] sm:$0xff]  }
 0x110   : > { %7478 = vmatpush1.bf16.msra.mxu0 %v13206_v56  ;;  %v13314_v56 = vld [vmem:[%s13992_s30 + $0x150] ss:$8 sps:$4 sm:$0xff]  }
 0x111   : > { %7479 = vmatprep.subr.bf16.mxu0 %v13222_v59  ;;  %v13266_v59 = vld [vmem:[%s15654_s0 + $0x100] sm:$0xff]  }
 0x112   : > { %1394 = vmatmul.mubr.bf16.gmra.mrb[68].mxu1 %v13195_v57  ;;  %v13316_v57 = vld [vmem:[%s13992_s30 + $0x154] ss:$8 sps:$4 sm:$0xff]  }
 0x113   : > { %6428 = vmatmul.mubr.bf16.gmra.mrb[4].mxu0 %v13196_v58  ;;  %1403 = vmatprep.mubr.bf16.mxu1 %v15658_v16  ;;  %v13265_v58 = vld [vmem:[%s15654_s0 + $0x34] sm:$0xff]  }
 0x114   : > { %6437 = vmatprep.mubr.bf16.mxu0 %v15658_v16  ;;  %7480 = vmatpush1.bf16.msra.mxu0 %v13220_v60  ;;  %v13267_v60 = vld [vmem:[%s15654_s0 + $0x3c] sm:$0xff]  }
 0x115   : > { %7481 = vmatprep.subr.bf16.mxu0 %v13236_v61  ;;  %v13268_v61 = vld [vmem:[%s15654_s0 + $0x108] sm:$0xff]  }
 0x118   : > { %7482 = vmatpush1.bf16.msra.mxu0 %v13234_v62  ;;  %v13269_v62 = vld [vmem:[%s15654_s0 + $0x44] sm:$0xff]  }
 0x119   : > { %7483 = vmatprep.subr.bf16.mxu0 %v13250_v63  ;;  %v13270_v63 = vld [vmem:[%s15654_s0 + $0x110] sm:$0xff]  }
 0x11a   : > { %1404 = vmatmul.mubr.bf16.gmra.mrb[72].mxu1 %v13197_v0  ;;  %v13271_v0 = vld [vmem:[%s15654_s0 + $0x54] sm:$0xff]  }
 0x11b   : > { %6438 = vmatmul.mubr.bf16.gmra.mrb[8].mxu0 %v13198_v1  ;;  %1413 = vmatprep.mubr.bf16.mxu1 %v15658_v16  ;;  %v13275_v1 = vld [vmem:[%s15654_s0 + $0x120] sm:$0xff]  }
 0x11c   : > { %6447 = vmatprep.mubr.bf16.mxu0 %v15658_v16  ;;  %7484 = vmatpush1.bf16.msra.mxu0 %v13248_v2  ;;  %v13328_v2 = vld [vmem:[%s13992_s30 + $0x160] ss:$8 sps:$4 sm:$0xff]  }
 0x11d   : > { %7485 = vmatprep.subr.bf16.mxu0 %v13264_v8  ;;  %v13283_v8 = vld [vmem:[%s15654_s0 + $0x6c] sm:$0xff]  }
 0x120   : > { %7486 = vmatpush1.bf16.msra.mxu0 %v13262_v7  ;;  %v13282_v7 = vld [vmem:[%s15654_s0 + $0x130] sm:$0xff]  }
 0x121   : > { %7487 = vmatprep.subr.bf16.mxu0 %v13278_v19  ;;  %v13297_v19 = vld [vmem:[%s15654_s0 + $0x94] sm:$0xff]  }
 0x122   : > { %1414 = vmatmul.mubr.bf16.gmra.mrb[76].mxu1 %v13199_v3  ;;  %v13330_v3 = vld [vmem:[%s13992_s30 + $0x164] ss:$8 sps:$4 sm:$0xff]  }
 0x123   : > { %6448 = vmatmul.mubr.bf16.gmra.mrb[12].mxu0 %v13200_v4  ;;  %1423 = vmatprep.mubr.bf16.mxu1 %v15658_v16  ;;  %v13279_v4 = vld [vmem:[%s15654_s0 + $0x5c] sm:$0xff]  }
 0x124   : > { %6457 = vmatprep.mubr.bf16.mxu0 %v15658_v16  ;;  %7488 = vmatpush1.bf16.msra.mxu0 %v13276_v18  ;;  %v13296_v18 = vld [vmem:[%s15654_s0 + $0x158] sm:$0xff]  }
 0x125   : > { %7489 = vmatprep.subr.bf16.mxu0 %v13292_v29  ;;  %v13308_v29 = vld [vmem:[%s15654_s0 + $0x58] sm:$0xff]  }
 0x128   : > { %7490 = vmatpush1.bf16.msra.mxu0 %v13290_v28  ;;  %v13307_v28 = vld [vmem:[%s15654_s0 + $0xac] sm:$0xff]  }
 0x129   : > { %8565 = vmatprep.subr.bf16.mxu0 %v13306_v41  ;;  %v13374_v41 = vld [vmem:[%s13992_s30 + $0x3d0] ss:$8 sps:$4 sm:$0xff]  }
 0x12a   : > { %1424 = vmatmul.mubr.bf16.gmra.mrb[80].mxu1 %v13201_v5  ;;  %v13280_v5 = vld [vmem:[%s15654_s0 + $0x128] sm:$0xff]  }
 0x12b   : > { %6458 = vmatmul.mubr.bf16.gmra.mrb[16].mxu0 %v13205_v6  ;;  %1433 = vmatprep.mubr.bf16.mxu1 %v15658_v16  ;;  %v13281_v6 = vld [vmem:[%s15654_s0 + $0x64] sm:$0xff]  }
 0x12c   : > { %6467 = vmatprep.mubr.bf16.mxu0 %v15658_v16 }
 0x132   : > { %1434 = vmatmul.mubr.bf16.gmra.mrb[84].mxu1 %v13209_v9  ;;  %v13284_v9 = vld [vmem:[%s15654_s0 + $0x138] sm:$0xff]  }
 0x133   : > { %6468 = vmatmul.mubr.bf16.gmra.mrb[20].mxu0 %v13210_v10  ;;  %1443 = vmatprep.mubr.bf16.mxu1 %v15658_v16  ;;  %v13285_v10 = vld [vmem:[%s15654_s0 + $0x7c] sm:$0xff]  }
 0x134   : > { %6477 = vmatprep.mubr.bf16.mxu0 %v15658_v16 }
 0x13a   : > { %1444 = vmatmul.mubr.bf16.gmra.mrb[88].mxu1 %v13211_v11  ;;  %v13289_v11 = vld [vmem:[%s15654_s0 + $0x148] sm:$0xff]  }
 0x13b   : > { %6478 = vmatmul.mubr.bf16.gmra.mrb[24].mxu0 %v13212_v12  ;;  %1453 = vmatprep.mubr.bf16.mxu1 %v15658_v16  ;;  %v13342_v12 = vld [vmem:[%s13992_s30 + $0x170] ss:$8 sps:$4 sm:$0xff]  }
 0x13c   : > { %6487 = vmatprep.mubr.bf16.mxu0 %v15658_v16 }
 0x142   : > { %1454 = vmatmul.mubr.bf16.gmra.mrb[92].mxu1 %v13213_v13  ;;  %v13344_v13 = vld [vmem:[%s13992_s30 + $0x174] ss:$8 sps:$4 sm:$0xff]  }
 0x143   : > { %6488 = vmatmul.mubr.bf16.gmra.mrb[28].mxu0 %v13214_v14  ;;  %1463 = vmatprep.mubr.bf16.mxu1 %v15658_v16  ;;  %v13293_v14 = vld [vmem:[%s15654_s0 + $0x84] sm:$0xff]  }
 0x144   : > { %6497 = vmatprep.mubr.bf16.mxu0 %v15658_v16 }
 0x14a   : > { %1464 = vmatmul.mubr.bf16.gmra.mrb[96].mxu1 %v13215_v15  ;;  %v13294_v15 = vld [vmem:[%s15654_s0 + $0x150] sm:$0xff]  }
 0x14b   : > { %6498 = vmatmul.mubr.bf16.gmra.mrb[32].mxu0 %v13219_v17  ;;  %1473 = vmatprep.mubr.bf16.mxu1 %v15658_v16  ;;  %v13295_v17 = vld [vmem:[%s15654_s0 + $0x8c] sm:$0xff]  }
 0x14c   : > { %6507 = vmatprep.mubr.bf16.mxu0 %v15658_v16 }
 0x152   : > { %1474 = vmatmul.mubr.bf16.gmra.mrb[100].mxu1 %v13223_v20  ;;  %v13298_v20 = vld [vmem:[%s15654_s0 + $0x160] sm:$0xff]  }
 0x153   : > { %6508 = vmatmul.mubr.bf16.gmra.mrb[36].mxu0 %v13224_v21  ;;  %1483 = vmatprep.mubr.bf16.mxu1 %v15658_v16  ;;  %v13299_v21 = vld [vmem:[%s15654_s0 + $0xa4] sm:$0xff]  }
 0x154   : > { %6517 = vmatprep.mubr.bf16.mxu0 %v15658_v16 }
 0x15a   : > { %1484 = vmatmul.mubr.bf16.gmra.mrb[104].mxu1 %v13225_v22  ;;  %v13303_v22 = vld [vmem:[%s15654_s0 + $0x50] sm:$0xff]  }
 0x15b   : > { %6518 = vmatmul.mubr.bf16.gmra.mrb[40].mxu0 %v13226_v23  ;;  %1493 = vmatprep.mubr.bf16.mxu1 %v15658_v16  ;;  %v13304_v23 = vld [vmem:[%s13992_s30 + $0x380] ss:$8 sps:$4 sm:$0xff]  }
 0x15c   : > { %6527 = vmatprep.mubr.bf16.mxu0 %v15658_v16 }
 0x162   : > { %1494 = vmatmul.mubr.bf16.gmra.mrb[108].mxu1 %v13227_v24  ;;  %v13320_v24 = vld [vmem:[%s13992_s30 + $0x394] ss:$8 sps:$4 sm:$0xff]  }
 0x163   : > { %6528 = vmatmul.mubr.bf16.gmra.mrb[44].mxu0 %v13228_v25  ;;  %1503 = vmatprep.mubr.bf16.mxu1 %v15658_v16  ;;  %v13358_v25 = vld [vmem:[%s13992_s30 + $0x184] ss:$8 sps:$4 sm:$0xff]  }
 0x164   : > { %6537 = vmatprep.mubr.bf16.mxu0 %v15658_v16 }
 0x16a   : > { %1504 = vmatmul.mubr.bf16.gmra.mrb[112].mxu1 %v13229_v26  ;;  %v13318_v26 = vld [vmem:[%s13992_s30 + $0x390] ss:$8 sps:$4 sm:$0xff]  }
 0x16b   : > { %6538 = vmatmul.mubr.bf16.gmra.mrb[48].mxu0 %v13233_v27  ;;  %1513 = vmatprep.mubr.bf16.mxu1 %v15658_v16  ;;  %v13334_v27 = vld [vmem:[%s13992_s30 + $0x3a4] ss:$8 sps:$4 sm:$0xff]  }
 0x16c   : > { %6547 = vmatprep.mubr.bf16.mxu0 %v15658_v16 }
 0x172   : > { %1514 = vmatmul.mubr.bf16.gmra.mrb[116].mxu1 %v13237_v30  ;;  %v13332_v30 = vld [vmem:[%s13992_s30 + $0x3a0] ss:$8 sps:$4 sm:$0xff]  }
 0x173   : > { %6548 = vmatmul.mubr.bf16.gmra.mrb[52].mxu0 %v13238_v31  ;;  %1523 = vmatprep.mubr.bf16.mxu1 %v15658_v16  ;;  %v13348_v31 = vld [vmem:[%s13992_s30 + $0x3b4] ss:$8 sps:$4 sm:$0xff]  }
 0x174   : > { %6557 = vmatprep.mubr.bf16.mxu0 %v15658_v16 }
 0x17a   : > { %1524 = vmatmul.mubr.bf16.gmra.mrb[120].mxu1 %v13239_v32  ;;  %v13346_v32 = vld [vmem:[%s13992_s30 + $0x3b0] ss:$8 sps:$4 sm:$0xff]  }
 0x17b   : > { %6558 = vmatmul.mubr.bf16.gmra.mrb[56].mxu0 %v13240_v33  ;;  %1533 = vmatprep.mubr.bf16.mxu1 %v15658_v16  ;;  %v13362_v33 = vld [vmem:[%s13992_s30 + $0x3c4] ss:$8 sps:$4 sm:$0xff]  }
 0x17c   : > { %6567 = vmatprep.mubr.bf16.mxu0 %v15658_v16 }
 0x182   : > { %1534 = vmatmul.mubr.bf16.gmra.mrb[124].mxu1 %v13241_v34  ;;  %v13309_v34 = vld [vmem:[%s15654_s0 + $0xb4] sm:$0xff]  }
 0x183   : > { %6568 = vmatmul.mubr.bf16.gmra.mrb[60].mxu0 %v13242_v35  ;;  %2057 = vmatprep.mubr.bf16.mxu1 %v15658_v16  ;;  %v13310_v35 = vld [vmem:[%s15654_s0 + $0x60] sm:$0xff]  }
 0x184   : > { %6577 = vmatprep.mubr.bf16.mxu0 %v15658_v16 }
 0x18a   : > { %2058 = vmatmul.mubr.bf16.vlgmr.msra.gmra.mrb[0].mxu1 %v13243_v36  ;;  %v13360_v36 = vld [vmem:[%s13992_s30 + $0x3c0] ss:$8 sps:$4 sm:$0xff]  }
 0x18b   : > { %6578 = vmatmul.mubr.bf16.gmra.mrb[64].mxu0 %v13247_v37  ;;  %3116 = vmatpush1.bf16.msra.mxu1 %v13244_v38  ;;  %v13311_v37 = vld [vmem:[%s15654_s0 + $0xbc] sm:$0xff]   ;;  %v13312_v38 = vld [vmem:[%s15654_s0 + $0x68] sm:$0xff]  }
 0x18c   : > { %2067 = vmatprep.mubr.bf16.mxu1 %v15658_v16  ;;  %6587 = vmatprep.mubr.bf16.mxu0 %v15658_v16 }
 0x18d   : > { %3117 = vmatprep.subr.bf16.mxu1 %v13260_v39  ;;  %v13313_v39 = vld [vmem:[%s15654_s0 + $0xcc] sm:$0xff]  }
 0x18f   : > { %3118 = vmatpush1.bf16.msra.mxu1 %v13258_v40  ;;  %v13317_v40 = vld [vmem:[%s15654_s0 + $0x78] sm:$0xff]  }
 0x190   : > { %3119 = vmatprep.subr.bf16.mxu1 %v13274_v44  ;;  %v13322_v44 = vld [vmem:[%s15654_s0 + $0x80] sm:$0xff]  }
 0x192   : > { %2068 = vmatmul.mubr.bf16.gmra.mrb[4].mxu1 %v13251_v42  ;;  %v13376_v42 = vld [vmem:[%s13992_s30 + $0x3d4] ss:$8 sps:$4 sm:$0xff]  }
 0x193   : > { %6588 = vmatmul.mubr.bf16.gmra.mrb[68].mxu0 %v13252_v43  ;;  %2077 = vmatprep.mubr.bf16.mxu1 %v15658_v16  ;;  %v13321_v43 = vld [vmem:[%s15654_s0 + $0xd4] sm:$0xff]  }
 0x194   : > { %6597 = vmatprep.mubr.bf16.mxu0 %v15658_v16  ;;  %3120 = vmatpush1.bf16.msra.mxu1 %v13272_v45  ;;  %v13323_v45 = vld [vmem:[%s15654_s0 + $0xdc] sm:$0xff]  }
 0x195   : > { %3121 = vmatprep.subr.bf16.mxu1 %v13288_v46  ;;  %v13324_v46 = vld [vmem:[%s15654_s0 + $0x88] sm:$0xff]  }
 0x198   : > { %3122 = vmatpush1.bf16.msra.mxu1 %v13286_v47  ;;  %v13325_v47 = vld [vmem:[%s15654_s0 + $0xe4] sm:$0xff]  }
 0x199   : > { %3123 = vmatprep.subr.bf16.mxu1 %v13302_v48  ;;  %v13326_v48 = vld [vmem:[%s15654_s0 + $0x90] sm:$0xff]  }
 0x19a   : > { %2078 = vmatmul.mubr.bf16.gmra.mrb[8].mxu1 %v13253_v49  ;;  %v13327_v49 = vld [vmem:[%s15654_s0 + $0xf4] sm:$0xff]  }
 0x19b   : > { %6598 = vmatmul.mubr.bf16.gmra.mrb[72].mxu0 %v13254_v50  ;;  %2087 = vmatprep.mubr.bf16.mxu1 %v15658_v16  ;;  %v13331_v50 = vld [vmem:[%s15654_s0 + $0xa0] sm:$0xff]  }
 0x19c   : > { %6607 = vmatprep.mubr.bf16.mxu0 %v15658_v16  ;;  %3124 = vmatpush1.bf16.msra.mxu1 %v13300_v51  ;;  %v13388_v51 = vld [vmem:[%s13992_s30 + $0x3e0] ss:$8 sps:$4 sm:$0xff]  }
 0x19d   : > { %3125 = vmatprep.subr.bf16.mxu1 %v13316_v57  ;;  %v13339_v57 = vld [vmem:[%s15654_s0 + $0x10c] sm:$0xff]  }
 0x1a0   : > { %3126 = vmatpush1.bf16.msra.mxu1 %v13314_v56  ;;  %v13338_v56 = vld [vmem:[%s15654_s0 + $0xb0] sm:$0xff]  }
 0x1a1   : > { %3127 = vmatprep.subr.bf16.mxu1 %v13330_v3  ;;  %v13353_v3 = vld [vmem:[%s15654_s0 + $0x134] sm:$0xff]  }
 0x1a2   : > { %2088 = vmatmul.mubr.bf16.gmra.mrb[12].mxu1 %v13255_v52  ;;  %v13390_v52 = vld [vmem:[%s13992_s30 + $0x3e4] ss:$8 sps:$4 sm:$0xff]  }
 0x1a3   : > { %6608 = vmatmul.mubr.bf16.gmra.mrb[76].mxu0 %v13256_v53  ;;  %2097 = vmatprep.mubr.bf16.mxu1 %v15658_v16  ;;  %v13335_v53 = vld [vmem:[%s15654_s0 + $0xfc] sm:$0xff]  }
 0x1a4   : > { %6617 = vmatprep.mubr.bf16.mxu0 %v15658_v16  ;;  %3128 = vmatpush1.bf16.msra.mxu1 %v13328_v2  ;;  %v13352_v2 = vld [vmem:[%s15654_s0 + $0xd8] sm:$0xff]  }
 0x1a5   : > { %3129 = vmatprep.subr.bf16.mxu1 %v13344_v13  ;;  %v13364_v13 = vld [vmem:[%s15654_s0 + $0xf8] sm:$0xff]  }
 0x1a8   : > { %3130 = vmatpush1.bf16.msra.mxu1 %v13342_v12  ;;  %v13363_v12 = vld [vmem:[%s15654_s0 + $0x10] sm:$0xff]  }
 0x1a9   : > { %4205 = vmatprep.subr.bf16.mxu1 %v13358_v25  ;;  %v13373_v25 = vld [vmem:[%s15654_s0 + $0x118] sm:$0xff]  }
 0x1aa   : > { %2098 = vmatmul.mubr.bf16.gmra.mrb[16].mxu1 %v13257_v54  ;;  %v13336_v54 = vld [vmem:[%s15654_s0 + $0xa8] sm:$0xff]  }
 0x1ab   : > { %6618 = vmatmul.mubr.bf16.gmra.mrb[80].mxu0 %v13261_v55  ;;  %2107 = vmatprep.mubr.bf16.mxu1 %v15658_v16  ;;  %v13337_v55 = vld [vmem:[%s15654_s0 + $0x104] sm:$0xff]  }
 0x1ac   : > { %6627 = vmatprep.mubr.bf16.mxu0 %v15658_v16 }
 0x1b2   : > { %2108 = vmatmul.mubr.bf16.gmra.mrb[20].mxu1 %v13265_v58  ;;  %v13340_v58 = vld [vmem:[%s15654_s0 + $0xb8] sm:$0xff]  }
 0x1b3   : > { %6628 = vmatmul.mubr.bf16.gmra.mrb[84].mxu0 %v13266_v59  ;;  %2117 = vmatprep.mubr.bf16.mxu1 %v15658_v16  ;;  %v13341_v59 = vld [vmem:[%s15654_s0 + $0x11c] sm:$0xff]  }
 0x1b4   : > { %6637 = vmatprep.mubr.bf16.mxu0 %v15658_v16 }
 0x1ba   : > { %2118 = vmatmul.mubr.bf16.gmra.mrb[24].mxu1 %v13267_v60  ;;  %v13345_v60 = vld [vmem:[%s15654_s0 + $0xc8] sm:$0xff]  }
 0x1bb   : > { %6638 = vmatmul.mubr.bf16.gmra.mrb[88].mxu0 %v13268_v61  ;;  %2127 = vmatprep.mubr.bf16.mxu1 %v15658_v16  ;;  %v13402_v61 = vld [vmem:[%s13992_s30 + $0x3f0] ss:$8 sps:$4 sm:$0xff]  }
 0x1bc   : > { %6647 = vmatprep.mubr.bf16.mxu0 %v15658_v16 }
 0x1c2   : > { %2128 = vmatmul.mubr.bf16.gmra.mrb[28].mxu1 %v13269_v62  ;;  %v13404_v62 = vld [vmem:[%s13992_s30 + $0x3f4] ss:$8 sps:$4 sm:$0xff]  }
 0x1c3   : > { %6648 = vmatmul.mubr.bf16.gmra.mrb[92].mxu0 %v13270_v63  ;;  %2137 = vmatprep.mubr.bf16.mxu1 %v15658_v16  ;;  %v13349_v63 = vld [vmem:[%s15654_s0 + $0x124] sm:$0xff]  }
 0x1c4   : > { %6657 = vmatprep.mubr.bf16.mxu0 %v15658_v16 }
 0x1ca   : > { %2138 = vmatmul.mubr.bf16.gmra.mrb[32].mxu1 %v13271_v0  ;;  %v13350_v0 = vld [vmem:[%s15654_s0 + $0xd0] sm:$0xff]  }
 0x1cb   : > { %6658 = vmatmul.mubr.bf16.gmra.mrb[96].mxu0 %v13275_v1  ;;  %2147 = vmatprep.mubr.bf16.mxu1 %v15658_v16  ;;  %v13351_v1 = vld [vmem:[%s15654_s0 + $0x12c] sm:$0xff]  }
 0x1cc   : > { %6667 = vmatprep.mubr.bf16.mxu0 %v15658_v16 }
 0x1d2   : > { %2148 = vmatmul.mubr.bf16.gmra.mrb[36].mxu1 %v13279_v4  ;;  %v13354_v4 = vld [vmem:[%s15654_s0 + $0xe0] sm:$0xff]  }
 0x1d3   : > { %6668 = vmatmul.mubr.bf16.gmra.mrb[100].mxu0 %v13280_v5  ;;  %2157 = vmatprep.mubr.bf16.mxu1 %v15658_v16  ;;  %v13355_v5 = vld [vmem:[%s15654_s0 + $0x8] sm:$0xff]  }
 0x1d4   : > { %6677 = vmatprep.mubr.bf16.mxu0 %v15658_v16 }
 0x1da   : > { %2158 = vmatmul.mubr.bf16.gmra.mrb[40].mxu1 %v13281_v6  ;;  %v13359_v6 = vld [vmem:[%s15654_s0 + $0xf0] sm:$0xff]  }
 0x1db   : > { %6678 = vmatmul.mubr.bf16.gmra.mrb[104].mxu0 %v13282_v7  ;;  %2167 = vmatprep.mubr.bf16.mxu1 %v15658_v16  ;;  %v13356_v7 = vld [vmem:[%s13992_s30 + $0x180] ss:$8 sps:$4 sm:$0xff]  }
 0x1dc   : > { %6687 = vmatprep.mubr.bf16.mxu0 %v15658_v16 }
 0x1e2   : > { %2168 = vmatmul.mubr.bf16.gmra.mrb[44].mxu1 %v13283_v8  ;;  %v13372_v8 = vld [vmem:[%s13992_s30 + $0x194] ss:$8 sps:$4 sm:$0xff]  }
 0x1e3   : > { %6688 = vmatmul.mubr.bf16.gmra.mrb[108].mxu0 %v13284_v9  ;;  %2177 = vmatprep.mubr.bf16.mxu1 %v15658_v16  ;;  %v13370_v9 = vld [vmem:[%s13992_s30 + $0x190] ss:$8 sps:$4 sm:$0xff]  }
 0x1e4   : > { %6697 = vmatprep.mubr.bf16.mxu0 %v15658_v16 }
 0x1ea   : > { %2178 = vmatmul.mubr.bf16.gmra.mrb[48].mxu1 %v13285_v10  ;;  %v13418_v10 = vld [vmem:[%s13992_s30 + $0x404] ss:$8 sps:$4 sm:$0xff]  }
 0x1eb   : > { %6698 = vmatmul.mubr.bf16.gmra.mrb[112].mxu0 %v13289_v11  ;;  %2187 = vmatprep.mubr.bf16.mxu1 %v15658_v16  ;;  %v13386_v11 = vld [vmem:[%s13992_s30 + $0x1a4] ss:$8 sps:$4 sm:$0xff]  }
 0x1ec   : > { %6707 = vmatprep.mubr.bf16.mxu0 %v15658_v16 }
 0x1f2   : > { %2188 = vmatmul.mubr.bf16.gmra.mrb[52].mxu1 %v13293_v14  ;;  %v13384_v14 = vld [vmem:[%s13992_s30 + $0x1a0] ss:$8 sps:$4 sm:$0xff]  }
 0x1f3   : > { %6708 = vmatmul.mubr.bf16.gmra.mrb[116].mxu0 %v13294_v15  ;;  %2197 = vmatprep.mubr.bf16.mxu1 %v15658_v16  ;;  %v13400_v15 = vld [vmem:[%s13992_s30 + $0x1b4] ss:$8 sps:$4 sm:$0xff]  }
 0x1f4   : > { %6717 = vmatprep.mubr.bf16.mxu0 %v15658_v16 }
 0x1fa   : > { %2198 = vmatmul.mubr.bf16.gmra.mrb[56].mxu1 %v13295_v17  ;;  %v13398_v17 = vld [vmem:[%s13992_s30 + $0x1b0] ss:$8 sps:$4 sm:$0xff]  }
 0x1fb   : > { %6718 = vmatmul.mubr.bf16.gmra.mrb[120].mxu0 %v13296_v18  ;;  %2207 = vmatprep.mubr.bf16.mxu1 %v15658_v16  ;;  %v13414_v18 = vld [vmem:[%s13992_s30 + $0x1c4] ss:$8 sps:$4 sm:$0xff]  }
 0x1fc   : > { %6727 = vmatprep.mubr.bf16.mxu0 %v15658_v16 }
 0x202   : > { %2208 = vmatmul.mubr.bf16.gmra.mrb[60].mxu1 %v13297_v19  ;;  %v13365_v19 = vld [vmem:[%s15654_s0 + $0x18] sm:$0xff]  }
 0x203   : > { %6728 = vmatmul.mubr.bf16.gmra.mrb[124].mxu0 %v13298_v20  ;;  %2217 = vmatprep.mubr.bf16.mxu1 %v15658_v16  ;;  %v13366_v20 = vld [vmem:[%s15654_s0 + $0x100] sm:$0xff]  }
 0x204   : > { %7507 = vmatprep.mubr.bf16.mxu0 %v15658_v16 }
 0x20a   : > { %2218 = vmatmul.mubr.bf16.gmra.mrb[64].mxu1 %v13299_v21  ;;  %v13412_v21 = vld [vmem:[%s13992_s30 + $0x1c0] ss:$8 sps:$4 sm:$0xff]  }
 0x20b   : > { %7508 = vmatmul.mubr.bf16.vlgmr.msra.gmra.mrb[0].mxu0 %v13303_v22  ;;  %2227 = vmatprep.mubr.bf16.mxu1 %v15658_v16  ;;  %v13367_v22 = vld [vmem:[%s15654_s0 + $0x20] sm:$0xff]  }
 0x20c   : > { %8566 = vmatpush1.bf16.msra.mxu0 %v13304_v23  ;;  %7517 = vmatprep.mubr.bf16.mxu0 %v15658_v16  ;;  %v13368_v23 = vld [vmem:[%s15654_s0 + $0x108] sm:$0xff]  }
 0x20d   : > { %8567 = vmatprep.subr.bf16.mxu0 %v13320_v24  ;;  %v13369_v24 = vld [vmem:[%s15654_s0 + $0x30] sm:$0xff]  }
 0x210   : > { %8568 = vmatpush1.bf16.msra.mxu0 %v13318_v26  ;;  %v13426_v26 = vld [vmem:[%s13992_s30 + $0x1d0] ss:$8 sps:$4 sm:$0xff]  }
 0x211   : > { %8569 = vmatprep.subr.bf16.mxu0 %v13334_v27  ;;  %v13428_v27 = vld [vmem:[%s13992_s30 + $0x1d4] ss:$8 sps:$4 sm:$0xff]  }
 0x212   : > { %2228 = vmatmul.mubr.bf16.gmra.mrb[68].mxu1 %v13307_v28  ;;  %v13377_v28 = vld [vmem:[%s15654_s0 + $0x38] sm:$0xff]  }
 0x213   : > { %7518 = vmatmul.mubr.bf16.gmra.mrb[4].mxu0 %v13308_v29  ;;  %2237 = vmatprep.mubr.bf16.mxu1 %v15658_v16  ;;  %v13378_v29 = vld [vmem:[%s15654_s0 + $0x120] sm:$0xff]  }
 0x214   : > { %7527 = vmatprep.mubr.bf16.mxu0 %v15658_v16  ;;  %8570 = vmatpush1.bf16.msra.mxu0 %v13332_v30  ;;  %v13379_v30 = vld [vmem:[%s15654_s0 + $0x40] sm:$0xff]  }
 0x215   : > { %8571 = vmatprep.subr.bf16.mxu0 %v13348_v31  ;;  %v13380_v31 = vld [vmem:[%s15654_s0 + $0x128] sm:$0xff]  }
 0x218   : > { %8572 = vmatpush1.bf16.msra.mxu0 %v13346_v32  ;;  %v13381_v32 = vld [vmem:[%s15654_s0 + $0x48] sm:$0xff]  }
 0x219   : > { %8573 = vmatprep.subr.bf16.mxu0 %v13362_v33  ;;  %v13382_v33 = vld [vmem:[%s15654_s0 + $0x130] sm:$0xff]  }
 0x21a   : > { %2238 = vmatmul.mubr.bf16.gmra.mrb[72].mxu1 %v13309_v34  ;;  %v13383_v34 = vld [vmem:[%s15654_s0 + $0x58] sm:$0xff]  }
 0x21b   : > { %7528 = vmatmul.mubr.bf16.gmra.mrb[8].mxu0 %v13310_v35  ;;  %2247 = vmatprep.mubr.bf16.mxu1 %v15658_v16  ;;  %v13387_v35 = vld [vmem:[%s15654_s0 + $0x140] sm:$0xff]  }
 0x21c   : > { %7537 = vmatprep.mubr.bf16.mxu0 %v15658_v16  ;;  %8574 = vmatpush1.bf16.msra.mxu0 %v13360_v36  ;;  %v13440_v36 = vld [vmem:[%s13992_s30 + $0x1e0] ss:$8 sps:$4 sm:$0xff]  }
 0x21d   : > { %8575 = vmatprep.subr.bf16.mxu0 %v13376_v42  ;;  %v13395_v42 = vld [vmem:[%s15654_s0 + $0x70] sm:$0xff]  }
 0x220   : > { %8576 = vmatpush1.bf16.msra.mxu0 %v13374_v41  ;;  %v13394_v41 = vld [vmem:[%s15654_s0 + $0x150] sm:$0xff]  }
 0x221   : > { %8577 = vmatprep.subr.bf16.mxu0 %v13390_v52  ;;  %v13408_v52 = vld [vmem:[%s15654_s0 + $0x178] sm:$0xff]  }
 0x222   : > { %2248 = vmatmul.mubr.bf16.gmra.mrb[76].mxu1 %v13311_v37  ;;  %v13442_v37 = vld [vmem:[%s13992_s30 + $0x1e4] ss:$8 sps:$4 sm:$0xff]  }
 0x223   : > { %7538 = vmatmul.mubr.bf16.gmra.mrb[12].mxu0 %v13312_v38  ;;  %2257 = vmatprep.mubr.bf16.mxu1 %v15658_v16  ;;  %v13391_v38 = vld [vmem:[%s15654_s0 + $0x60] sm:$0xff]  }
 0x224   : > { %7547 = vmatprep.mubr.bf16.mxu0 %v15658_v16  ;;  %8578 = vmatpush1.bf16.msra.mxu0 %v13388_v51  ;;  %v13407_v51 = vld [vmem:[%s15654_s0 + $0x90] sm:$0xff]  }
 0x225   : > { %8579 = vmatprep.subr.bf16.mxu0 %v13404_v62  ;;  %v13420_v62 = vld [vmem:[%s15654_s0 + $0x5c] sm:$0xff]  }
 0x228   : > { %8580 = vmatpush1.bf16.msra.mxu0 %v13402_v61  ;;  %v13419_v61 = vld [vmem:[%s15654_s0 + $0xb0] sm:$0xff]  }
 0x229   : > { %9655 = vmatprep.subr.bf16.mxu0 %v13418_v10  ;;  %v13480_v10 = vld [vmem:[%s13992_s30 + $0x450] ss:$8 sps:$4 sm:$0xff]  }
 0x22a   : > { %2258 = vmatmul.mubr.bf16.gmra.mrb[80].mxu1 %v13313_v39  ;;  %v13392_v39 = vld [vmem:[%s15654_s0 + $0x148] sm:$0xff]  }
 0x22b   : > { %7548 = vmatmul.mubr.bf16.gmra.mrb[16].mxu0 %v13317_v40  ;;  %2267 = vmatprep.mubr.bf16.mxu1 %v15658_v16  ;;  %v13393_v40 = vld [vmem:[%s15654_s0 + $0x68] sm:$0xff]  }
 0x22c   : > { %7557 = vmatprep.mubr.bf16.mxu0 %v15658_v16 }
 0x232   : > { %2268 = vmatmul.mubr.bf16.gmra.mrb[84].mxu1 %v13321_v43  ;;  %v13396_v43 = vld [vmem:[%s15654_s0 + $0x158] sm:$0xff]  }
 0x233   : > { %7558 = vmatmul.mubr.bf16.gmra.mrb[20].mxu0 %v13322_v44  ;;  %2277 = vmatprep.mubr.bf16.mxu1 %v15658_v16  ;;  %v13397_v44 = vld [vmem:[%s15654_s0 + $0x80] sm:$0xff]  }
 0x234   : > { %7567 = vmatprep.mubr.bf16.mxu0 %v15658_v16 }
 0x23a   : > { %2278 = vmatmul.mubr.bf16.gmra.mrb[88].mxu1 %v13323_v45  ;;  %v13401_v45 = vld [vmem:[%s15654_s0 + $0x168] sm:$0xff]  }
 0x23b   : > { %7568 = vmatmul.mubr.bf16.gmra.mrb[24].mxu0 %v13324_v46  ;;  %2287 = vmatprep.mubr.bf16.mxu1 %v15658_v16  ;;  %v13454_v46 = vld [vmem:[%s13992_s30 + $0x1f0] ss:$8 sps:$4 sm:$0xff]  }
 0x23c   : > { %7577 = vmatprep.mubr.bf16.mxu0 %v15658_v16 }
 0x242   : > { %2288 = vmatmul.mubr.bf16.gmra.mrb[92].mxu1 %v13325_v47  ;;  %v13456_v47 = vld [vmem:[%s13992_s30 + $0x1f4] ss:$8 sps:$4 sm:$0xff]  }
 0x243   : > { %7578 = vmatmul.mubr.bf16.gmra.mrb[28].mxu0 %v13326_v48  ;;  %2297 = vmatprep.mubr.bf16.mxu1 %v15658_v16  ;;  %v13405_v48 = vld [vmem:[%s15654_s0 + $0x88] sm:$0xff]  }
 0x244   : > { %7587 = vmatprep.mubr.bf16.mxu0 %v15658_v16 }
 0x24a   : > { %2298 = vmatmul.mubr.bf16.gmra.mrb[96].mxu1 %v13327_v49  ;;  %v13406_v49 = vld [vmem:[%s15654_s0 + $0x170] sm:$0xff]  }
 0x24b   : > { %7588 = vmatmul.mubr.bf16.gmra.mrb[32].mxu0 %v13331_v50  ;;  %2307 = vmatprep.mubr.bf16.mxu1 %v15658_v16  ;;  %v13575_v50 = vld [vmem:[%s13992_s30 + $0x204] ss:$8 sps:$4 sm:$0xff]  }
 0x24c   : > { %7597 = vmatprep.mubr.bf16.mxu0 %v15658_v16 }
 0x252   : > { %2308 = vmatmul.mubr.bf16.gmra.mrb[100].mxu1 %v13335_v53  ;;  %v13409_v53 = vld [vmem:[%s15654_s0 + $0x98] sm:$0xff]  }
 0x253   : > { %7598 = vmatmul.mubr.bf16.gmra.mrb[36].mxu0 %v13336_v54  ;;  %2317 = vmatprep.mubr.bf16.mxu1 %v15658_v16  ;;  %v13410_v54 = vld [vmem:[%s15654_s0 + $0x180] sm:$0xff]  }
 0x254   : > { %7607 = vmatprep.mubr.bf16.mxu0 %v15658_v16 }
 0x25a   : > { %2318 = vmatmul.mubr.bf16.gmra.mrb[104].mxu1 %v13337_v55  ;;  %v13411_v55 = vld [vmem:[%s15654_s0 + $0xa8] sm:$0xff]  }
 0x25b   : > { %7608 = vmatmul.mubr.bf16.gmra.mrb[40].mxu0 %v13338_v56  ;;  %2327 = vmatprep.mubr.bf16.mxu1 %v15658_v16  ;;  %v13415_v56 = vld [vmem:[%s15654_s0 + $0x54] sm:$0xff]  }
 0x25c   : > { %7617 = vmatprep.mubr.bf16.mxu0 %v15658_v16 }
 0x262   : > { %2328 = vmatmul.mubr.bf16.gmra.mrb[108].mxu1 %v13339_v57  ;;  %v13416_v57 = vld [vmem:[%s13992_s30 + $0x400] ss:$8 sps:$4 sm:$0xff]  }
 0x263   : > { %7618 = vmatmul.mubr.bf16.gmra.mrb[44].mxu0 %v13340_v58  ;;  %2337 = vmatprep.mubr.bf16.mxu1 %v15658_v16  ;;  %v13432_v58 = vld [vmem:[%s13992_s30 + $0x414] ss:$8 sps:$4 sm:$0xff]  }
 0x264   : > { %7627 = vmatprep.mubr.bf16.mxu0 %v15658_v16 }
 0x26a   : > { %2338 = vmatmul.mubr.bf16.gmra.mrb[112].mxu1 %v13341_v59  ;;  %v13430_v59 = vld [vmem:[%s13992_s30 + $0x410] ss:$8 sps:$4 sm:$0xff]  }
 0x26b   : > { %7628 = vmatmul.mubr.bf16.gmra.mrb[48].mxu0 %v13345_v60  ;;  %2347 = vmatprep.mubr.bf16.mxu1 %v15658_v16  ;;  %v13446_v60 = vld [vmem:[%s13992_s30 + $0x424] ss:$8 sps:$4 sm:$0xff]  }
 0x26c   : > { %7637 = vmatprep.mubr.bf16.mxu0 %v15658_v16 }
 0x272   : > { %2348 = vmatmul.mubr.bf16.gmra.mrb[116].mxu1 %v13349_v63  ;;  %v13444_v63 = vld [vmem:[%s13992_s30 + $0x420] ss:$8 sps:$4 sm:$0xff]  }
 0x273   : > { %7638 = vmatmul.mubr.bf16.gmra.mrb[52].mxu0 %v13350_v0  ;;  %2357 = vmatprep.mubr.bf16.mxu1 %v15658_v16  ;;  %v13460_v0 = vld [vmem:[%s13992_s30 + $0x434] ss:$8 sps:$4 sm:$0xff]  }
 0x274   : > { %7647 = vmatprep.mubr.bf16.mxu0 %v15658_v16 }
 0x27a   : > { %2358 = vmatmul.mubr.bf16.gmra.mrb[120].mxu1 %v13351_v1  ;;  %v13458_v1 = vld [vmem:[%s13992_s30 + $0x430] ss:$8 sps:$4 sm:$0xff]  }
 0x27b   : > { %7648 = vmatmul.mubr.bf16.gmra.mrb[56].mxu0 %v13352_v2  ;;  %2367 = vmatprep.mubr.bf16.mxu1 %v15658_v16  ;;  %v13471_v2 = vld [vmem:[%s13992_s30 + $0x444] ss:$8 sps:$4 sm:$0xff]  }
 0x27c   : > { %7657 = vmatprep.mubr.bf16.mxu0 %v15658_v16 }
 0x282   : > { %2368 = vmatmul.mubr.bf16.gmra.mrb[124].mxu1 %v13353_v3  ;;  %v13421_v3 = vld [vmem:[%s15654_s0 + $0xb8] sm:$0xff]  }
 0x283   : > { %7658 = vmatmul.mubr.bf16.gmra.mrb[60].mxu0 %v13354_v4  ;;  %3147 = vmatprep.mubr.bf16.mxu1 %v15658_v16  ;;  %v13422_v4 = vld [vmem:[%s15654_s0 + $0x64] sm:$0xff]  }
 0x284   : > { %7667 = vmatprep.mubr.bf16.mxu0 %v15658_v16 }
 0x28a   : > { %3148 = vmatmul.mubr.bf16.vlgmr.msra.gmra.mrb[0].mxu1 %v13355_v5  ;;  %v13469_v5 = vld [vmem:[%s13992_s30 + $0x440] ss:$8 sps:$4 sm:$0xff]  }
 0x28b   : > { %7668 = vmatmul.mubr.bf16.gmra.mrb[64].mxu0 %v13359_v6  ;;  %4206 = vmatpush1.bf16.msra.mxu1 %v13356_v7  ;;  %v13423_v6 = vld [vmem:[%s15654_s0 + $0xc0] sm:$0xff]   ;;  %v13424_v7 = vld [vmem:[%s15654_s0 + $0x6c] sm:$0xff]  }
 0x28c   : > { %3157 = vmatprep.mubr.bf16.mxu1 %v15658_v16  ;;  %7677 = vmatprep.mubr.bf16.mxu0 %v15658_v16 }
 0x28d   : > { %4207 = vmatprep.subr.bf16.mxu1 %v13372_v8  ;;  %v13425_v8 = vld [vmem:[%s15654_s0 + $0xd0] sm:$0xff]  }
 0x28f   : > { %4208 = vmatpush1.bf16.msra.mxu1 %v13370_v9  ;;  %v13429_v9 = vld [vmem:[%s15654_s0 + $0x7c] sm:$0xff]  }
 0x290   : > { %4209 = vmatprep.subr.bf16.mxu1 %v13386_v11  ;;  %v13482_v11 = vld [vmem:[%s13992_s30 + $0x454] ss:$8 sps:$4 sm:$0xff]  }
 0x292   : > { %3158 = vmatmul.mubr.bf16.gmra.mrb[4].mxu1 %v13363_v12  ;;  %v13433_v12 = vld [vmem:[%s15654_s0 + $0xd8] sm:$0xff]  }
 0x293   : > { %7678 = vmatmul.mubr.bf16.gmra.mrb[68].mxu0 %v13364_v13  ;;  %3167 = vmatprep.mubr.bf16.mxu1 %v15658_v16  ;;  %v13434_v13 = vld [vmem:[%s15654_s0 + $0x84] sm:$0xff]  }
 0x294   : > { %7687 = vmatprep.mubr.bf16.mxu0 %v15658_v16  ;;  %4210 = vmatpush1.bf16.msra.mxu1 %v13384_v14  ;;  %v13435_v14 = vld [vmem:[%s15654_s0 + $0xe0] sm:$0xff]  }
 0x295   : > { %4211 = vmatprep.subr.bf16.mxu1 %v13400_v15  ;;  %v13436_v15 = vld [vmem:[%s15654_s0 + $0x8c] sm:$0xff]  }
 0x298   : > { %4212 = vmatpush1.bf16.msra.mxu1 %v13398_v17  ;;  %v13437_v17 = vld [vmem:[%s15654_s0 + $0xe8] sm:$0xff]  }
 0x299   : > { %4213 = vmatprep.subr.bf16.mxu1 %v13414_v18  ;;  %v13438_v18 = vld [vmem:[%s15654_s0 + $0x94] sm:$0xff]  }
 0x29a   : > { %3168 = vmatmul.mubr.bf16.gmra.mrb[8].mxu1 %v13365_v19  ;;  %v13439_v19 = vld [vmem:[%s15654_s0 + $0xf8] sm:$0xff]  }
 0x29b   : > { %7688 = vmatmul.mubr.bf16.gmra.mrb[72].mxu0 %v13366_v20  ;;  %3177 = vmatprep.mubr.bf16.mxu1 %v15658_v16  ;;  %v13443_v20 = vld [vmem:[%s15654_s0 + $0xa4] sm:$0xff]  }
 0x29c   : > { %7697 = vmatprep.mubr.bf16.mxu0 %v15658_v16  ;;  %4214 = vmatpush1.bf16.msra.mxu1 %v13412_v21  ;;  %v13491_v21 = vld [vmem:[%s13992_s30 + $0x460] ss:$8 sps:$4 sm:$0xff]  }
 0x29d   : > { %4215 = vmatprep.subr.bf16.mxu1 %v13428_v27  ;;  %v13451_v27 = vld [vmem:[%s15654_s0 + $0x110] sm:$0xff]  }
 0x2a0   : > { %4216 = vmatpush1.bf16.msra.mxu1 %v13426_v26  ;;  %v13450_v26 = vld [vmem:[%s15654_s0 + $0xb4] sm:$0xff]  }
 0x2a1   : > { %4217 = vmatprep.subr.bf16.mxu1 %v13442_v37  ;;  %v13465_v37 = vld [vmem:[%s15654_s0 + $0x138] sm:$0xff]  }
 0x2a2   : > { %3178 = vmatmul.mubr.bf16.gmra.mrb[12].mxu1 %v13367_v22  ;;  %v13493_v22 = vld [vmem:[%s13992_s30 + $0x464] ss:$8 sps:$4 sm:$0xff]  }
 0x2a3   : > { %7698 = vmatmul.mubr.bf16.gmra.mrb[76].mxu0 %v13368_v23  ;;  %3187 = vmatprep.mubr.bf16.mxu1 %v15658_v16  ;;  %v13447_v23 = vld [vmem:[%s15654_s0 + $0x100] sm:$0xff]  }
 0x2a4   : > { %7707 = vmatprep.mubr.bf16.mxu0 %v15658_v16  ;;  %4218 = vmatpush1.bf16.msra.mxu1 %v13440_v36  ;;  %v13464_v36 = vld [vmem:[%s15654_s0 + $0xdc] sm:$0xff]  }
 0x2a5   : > { %4219 = vmatprep.subr.bf16.mxu1 %v13456_v47  ;;  %v13580_v47 = vld [vmem:[%s13992_s30 + $0x220] ss:$8 sps:$4 sm:$0xff]  }
 0x2a8   : > { %4220 = vmatpush1.bf16.msra.mxu1 %v13454_v46  ;;  %v13579_v46 = vld [vmem:[%s13992_s30 + $0x224] ss:$8 sps:$4 sm:$0xff]  }
 0x2a9   : > { %11988 = vmatprep.subr.bf16.mxu1 %v13575_v50  ;;  %v13475_v50 = vld [vmem:[%s15654_s0 + $0x104] sm:$0xff]  }
 0x2aa   : > { %3188 = vmatmul.mubr.bf16.gmra.mrb[16].mxu1 %v13369_v24  ;;  %v13448_v24 = vld [vmem:[%s15654_s0 + $0xac] sm:$0xff]  }
 0x2ab   : > { %7708 = vmatmul.mubr.bf16.gmra.mrb[80].mxu0 %v13373_v25  ;;  %3197 = vmatprep.mubr.bf16.mxu1 %v15658_v16  ;;  %v13449_v25 = vld [vmem:[%s15654_s0 + $0x108] sm:$0xff]  }
 0x2ac   : > { %7717 = vmatprep.mubr.bf16.mxu0 %v15658_v16 }
 0x2b2   : > { %3198 = vmatmul.mubr.bf16.gmra.mrb[20].mxu1 %v13377_v28  ;;  %v13452_v28 = vld [vmem:[%s15654_s0 + $0xbc] sm:$0xff]  }
 0x2b3   : > { %7718 = vmatmul.mubr.bf16.gmra.mrb[84].mxu0 %v13378_v29  ;;  %3207 = vmatprep.mubr.bf16.mxu1 %v15658_v16  ;;  %v13453_v29 = vld [vmem:[%s15654_s0 + $0x120] sm:$0xff]  }
 0x2b4   : > { %7727 = vmatprep.mubr.bf16.mxu0 %v15658_v16 }
 0x2ba   : > { %3208 = vmatmul.mubr.bf16.gmra.mrb[24].mxu1 %v13379_v30  ;;  %v13457_v30 = vld [vmem:[%s15654_s0 + $0xcc] sm:$0xff]  }
 0x2bb   : > { %7728 = vmatmul.mubr.bf16.gmra.mrb[88].mxu0 %v13380_v31  ;;  %3217 = vmatprep.mubr.bf16.mxu1 %v15658_v16  ;;  %v13502_v31 = vld [vmem:[%s13992_s30 + $0x470] ss:$8 sps:$4 sm:$0xff]  }
 0x2bc   : > { %7737 = vmatprep.mubr.bf16.mxu0 %v15658_v16 }
 0x2c2   : > { %3218 = vmatmul.mubr.bf16.gmra.mrb[28].mxu1 %v13381_v32  ;;  %v13504_v32 = vld [vmem:[%s13992_s30 + $0x474] ss:$8 sps:$4 sm:$0xff]  }
 0x2c3   : > { %7738 = vmatmul.mubr.bf16.gmra.mrb[92].mxu0 %v13382_v33  ;;  %3227 = vmatprep.mubr.bf16.mxu1 %v15658_v16  ;;  %v13461_v33 = vld [vmem:[%s15654_s0 + $0x128] sm:$0xff]  }
 0x2c4   : > { %7747 = vmatprep.mubr.bf16.mxu0 %v15658_v16 }
 0x2ca   : > { %3228 = vmatmul.mubr.bf16.gmra.mrb[32].mxu1 %v13383_v34  ;;  %v13462_v34 = vld [vmem:[%s15654_s0 + $0xd4] sm:$0xff]  }
 0x2cb   : > { %7748 = vmatmul.mubr.bf16.gmra.mrb[96].mxu0 %v13387_v35  ;;  %3237 = vmatprep.mubr.bf16.mxu1 %v15658_v16  ;;  %v13463_v35 = vld [vmem:[%s15654_s0 + $0x130] sm:$0xff]  }
 0x2cc   : > { %7757 = vmatprep.mubr.bf16.mxu0 %v15658_v16 }
 0x2d2   : > { %3238 = vmatmul.mubr.bf16.gmra.mrb[36].mxu1 %v13391_v38  ;;  %v13466_v38 = vld [vmem:[%s15654_s0 + $0xe4] sm:$0xff]  }
 0x2d3   : > { %7758 = vmatmul.mubr.bf16.gmra.mrb[100].mxu0 %v13392_v39  ;;  %3247 = vmatprep.mubr.bf16.mxu1 %v15658_v16  ;;  %v13467_v39 = vld [vmem:[%s15654_s0 + $0x28] sm:$0xff]  }
 0x2d4   : > { %7767 = vmatprep.mubr.bf16.mxu0 %v15658_v16 }
 0x2da   : > { %3248 = vmatmul.mubr.bf16.gmra.mrb[40].mxu1 %v13393_v40  ;;  %v13468_v40 = vld [vmem:[%s15654_s0 + $0xf4] sm:$0xff]  }
 0x2db   : > { %7768 = vmatmul.mubr.bf16.gmra.mrb[104].mxu0 %v13394_v41  ;;  %3257 = vmatprep.mubr.bf16.mxu1 %v15658_v16  ;;  %v13576_v41 = vld [vmem:[%s13992_s30 + $0x200] ss:$8 sps:$4 sm:$0xff]  }
 0x2dc   : > { %7777 = vmatprep.mubr.bf16.mxu0 %v15658_v16 }
 0x2e2   : > { %3258 = vmatmul.mubr.bf16.gmra.mrb[44].mxu1 %v13395_v42  ;;  %v13577_v42 = vld [vmem:[%s13992_s30 + $0x214] ss:$8 sps:$4 sm:$0xff]  }
 0x2e3   : > { %7778 = vmatmul.mubr.bf16.gmra.mrb[108].mxu0 %v13396_v43  ;;  %3267 = vmatprep.mubr.bf16.mxu1 %v15658_v16  ;;  %v13472_v43 = vld [vmem:[%s15654_s0 + $0x30] sm:$0xff]  }
 0x2e4   : > { %7787 = vmatprep.mubr.bf16.mxu0 %v15658_v16 }
 0x2ea   : > { %3268 = vmatmul.mubr.bf16.gmra.mrb[48].mxu1 %v13397_v44  ;;  %v13473_v44 = vld [vmem:[%s15654_s0 + $0xfc] sm:$0xff]  }
 0x2eb   : > { %7788 = vmatmul.mubr.bf16.gmra.mrb[112].mxu0 %v13401_v45  ;;  %3277 = vmatprep.mubr.bf16.mxu1 %v15658_v16  ;;  %v13578_v45 = vld [vmem:[%s13992_s30 + $0x210] ss:$8 sps:$4 sm:$0xff]  }
 0x2ec   : > { %7797 = vmatprep.mubr.bf16.mxu0 %v15658_v16 }
 0x2f2   : > { %3278 = vmatmul.mubr.bf16.gmra.mrb[52].mxu1 %v13405_v48  ;;  %v13581_v48 = vld [vmem:[%s13992_s30 + $0x234] ss:$8 sps:$4 sm:$0xff]  }
 0x2f3   : > { %7798 = vmatmul.mubr.bf16.gmra.mrb[116].mxu0 %v13406_v49  ;;  %3287 = vmatprep.mubr.bf16.mxu1 %v15658_v16  ;;  %v13474_v49 = vld [vmem:[%s15654_s0 + $0x38] sm:$0xff]  }
 0x2f4   : > { %7807 = vmatprep.mubr.bf16.mxu0 %v15658_v16 }
 0x2fa   : > { %3288 = vmatmul.mubr.bf16.gmra.mrb[56].mxu1 %v13407_v51  ;;  %v13582_v51 = vld [vmem:[%s13992_s30 + $0x230] ss:$8 sps:$4 sm:$0xff]  }
 0x2fb   : > { %7808 = vmatmul.mubr.bf16.gmra.mrb[120].mxu0 %v13408_v52  ;;  %3297 = vmatprep.mubr.bf16.mxu1 %v15658_v16  ;;  %v13583_v52 = vld [vmem:[%s13992_s30 + $0x244] ss:$8 sps:$4 sm:$0xff]  }
 0x2fc   : > { %7817 = vmatprep.mubr.bf16.mxu0 %v15658_v16 }
 0x302   : > { %3298 = vmatmul.mubr.bf16.gmra.mrb[60].mxu1 %v13409_v53  ;;  %v13584_v53 = vld [vmem:[%s13992_s30 + $0x240] ss:$8 sps:$4 sm:$0xff]  }
 0x303   : > { %7818 = vmatmul.mubr.bf16.gmra.mrb[124].mxu0 %v13410_v54  ;;  %3307 = vmatprep.mubr.bf16.mxu1 %v15658_v16  ;;  %v13585_v54 = vld [vmem:[%s13992_s30 + $0x254] ss:$8 sps:$4 sm:$0xff]  }
 0x304   : > { %8597 = vmatprep.mubr.bf16.mxu0 %v15658_v16 }
 0x30a   : > { %3308 = vmatmul.mubr.bf16.gmra.mrb[64].mxu1 %v13411_v55  ;;  %v13476_v55 = vld [vmem:[%s15654_s0 + $0x40] sm:$0xff]  }
 0x30b   : > { %8598 = vmatmul.mubr.bf16.vlgmr.msra.gmra.mrb[0].mxu0 %v13415_v56  ;;  %3317 = vmatprep.mubr.bf16.mxu1 %v15658_v16  ;;  %v13477_v56 = vld [vmem:[%s15654_s0 + $0x10c] sm:$0xff]  }
 0x30c   : > { %9656 = vmatpush1.bf16.msra.mxu0 %v13416_v57  ;;  %8607 = vmatprep.mubr.bf16.mxu0 %v15658_v16  ;;  %v13586_v57 = vld [vmem:[%s13992_s30 + $0x250] ss:$8 sps:$4 sm:$0xff]  }
 0x30d   : > { %9657 = vmatprep.subr.bf16.mxu0 %v13432_v58  ;;  %v13587_v58 = vld [vmem:[%s13992_s30 + $0x264] ss:$8 sps:$4 sm:$0xff]  }
 0x310   : > { %9658 = vmatpush1.bf16.msra.mxu0 %v13430_v59  ;;  %v13588_v59 = vld [vmem:[%s13992_s30 + $0x260] ss:$8 sps:$4 sm:$0xff]  }
 0x311   : > { %9659 = vmatprep.subr.bf16.mxu0 %v13446_v60  ;;  %v13589_v60 = vld [vmem:[%s13992_s30 + $0x274] ss:$8 sps:$4 sm:$0xff]  }
 0x312   : > { %3318 = vmatmul.mubr.bf16.gmra.mrb[68].mxu1 %v13419_v61  ;;  %v13478_v61 = vld [vmem:[%s15654_s0 + $0x50] sm:$0xff]  }
 0x313   : > { %8608 = vmatmul.mubr.bf16.gmra.mrb[4].mxu0 %v13420_v62  ;;  %3327 = vmatprep.mubr.bf16.mxu1 %v15658_v16  ;;  %v13479_v62 = vld [vmem:[%s15654_s0 + $0x11c] sm:$0xff]  }
 0x314   : > { %8617 = vmatprep.mubr.bf16.mxu0 %v15658_v16  ;;  %9660 = vmatpush1.bf16.msra.mxu0 %v13444_v63  ;;  %v13590_v63 = vld [vmem:[%s13992_s30 + $0x270] ss:$8 sps:$4 sm:$0xff]  }
 0x315   : > { %9661 = vmatprep.subr.bf16.mxu0 %v13460_v0  ;;  %v13483_v0 = vld [vmem:[%s15654_s0 + $0x58] sm:$0xff]  }
 0x318   : > { %9662 = vmatpush1.bf16.msra.mxu0 %v13458_v1  ;;  %v13484_v1 = vld [vmem:[%s15654_s0 + $0x124] sm:$0xff]  }
 0x319   : > { %9663 = vmatprep.subr.bf16.mxu0 %v13471_v2  ;;  %v13485_v2 = vld [vmem:[%s15654_s0 + $0x60] sm:$0xff]  }
 0x31a   : > { %3328 = vmatmul.mubr.bf16.gmra.mrb[72].mxu1 %v13421_v3  ;;  %v13486_v3 = vld [vmem:[%s15654_s0 + $0x12c] sm:$0xff]  }
 0x31b   : > { %8618 = vmatmul.mubr.bf16.gmra.mrb[8].mxu0 %v13422_v4  ;;  %3337 = vmatprep.mubr.bf16.mxu1 %v15658_v16  ;;  %v13487_v4 = vld [vmem:[%s15654_s0 + $0x68] sm:$0xff]  }
 0x31c   : > { %8627 = vmatprep.mubr.bf16.mxu0 %v15658_v16  ;;  %9664 = vmatpush1.bf16.msra.mxu0 %v13469_v5  ;;  %v13488_v5 = vld [vmem:[%s15654_s0 + $0x134] sm:$0xff]  }
 0x31d   : > { %9665 = vmatprep.subr.bf16.mxu0 %v13482_v11  ;;  %v13497_v11 = vld [vmem:[%s15654_s0 + $0x154] sm:$0xff]  }
 0x320   : > { %9666 = vmatpush1.bf16.msra.mxu0 %v13480_v10  ;;  %v13496_v10 = vld [vmem:[%s15654_s0 + $0x88] sm:$0xff]  }
 0x321   : > { %9667 = vmatprep.subr.bf16.mxu0 %v13493_v22  ;;  %v13510_v22 = vld [vmem:[%s15654_s0 + $0x184] sm:$0xff]  }
 0x322   : > { %3338 = vmatmul.mubr.bf16.gmra.mrb[76].mxu1 %v13423_v6  ;;  %v13489_v6 = vld [vmem:[%s15654_s0 + $0x78] sm:$0xff]  }
 0x323   : > { %8628 = vmatmul.mubr.bf16.gmra.mrb[12].mxu0 %v13424_v7  ;;  %3347 = vmatprep.mubr.bf16.mxu1 %v15658_v16  ;;  %v13490_v7 = vld [vmem:[%s15654_s0 + $0x144] sm:$0xff]  }
 0x324   : > { %8637 = vmatprep.mubr.bf16.mxu0 %v15658_v16  ;;  %9668 = vmatpush1.bf16.msra.mxu0 %v13491_v21  ;;  %v13509_v21 = vld [vmem:[%s15654_s0 + $0xb8] sm:$0xff]  }
 0x325   : > { %9669 = vmatprep.subr.bf16.mxu0 %v13504_v32  ;;  %v13520_v32 = vld [vmem:[%s15654_s0 + $0x80] sm:$0xff]  }
 0x328   : > { %9670 = vmatpush1.bf16.msra.mxu0 %v13502_v31  ;;  %v13519_v31 = vld [vmem:[%s15654_s0 + $0xf0] sm:$0xff]  }
 0x32a   : > { %3348 = vmatmul.mubr.bf16.gmra.mrb[80].mxu1 %v13425_v8  ;;  %v13494_v8 = vld [vmem:[%s15654_s0 + $0x80] sm:$0xff]  }
 0x32b   : > { %8638 = vmatmul.mubr.bf16.gmra.mrb[16].mxu0 %v13429_v9  ;;  %3357 = vmatprep.mubr.bf16.mxu1 %v15658_v16  ;;  %v13495_v9 = vld [vmem:[%s15654_s0 + $0x14c] sm:$0xff]  }
 0x32c   : > { %8647 = vmatprep.mubr.bf16.mxu0 %v15658_v16 }
 0x332   : > { %3358 = vmatmul.mubr.bf16.gmra.mrb[84].mxu1 %v13433_v12  ;;  %v13498_v12 = vld [vmem:[%s15654_s0 + $0x90] sm:$0xff]  }
 0x333   : > { %8648 = vmatmul.mubr.bf16.gmra.mrb[20].mxu0 %v13434_v13  ;;  %3367 = vmatprep.mubr.bf16.mxu1 %v15658_v16  ;;  %v13499_v13 = vld [vmem:[%s15654_s0 + $0x15c] sm:$0xff]  }
 0x334   : > { %8657 = vmatprep.mubr.bf16.mxu0 %v15658_v16 }
 0x33a   : > { %3368 = vmatmul.mubr.bf16.gmra.mrb[88].mxu1 %v13435_v14  ;;  %v13500_v14 = vld [vmem:[%s15654_s0 + $0xa0] sm:$0xff]  }
 0x33b   : > { %8658 = vmatmul.mubr.bf16.gmra.mrb[24].mxu0 %v13436_v15  ;;  %3377 = vmatprep.mubr.bf16.mxu1 %v15658_v16  ;;  %v13501_v15 = vld [vmem:[%s15654_s0 + $0x16c] sm:$0xff]  }
 0x33c   : > { %8667 = vmatprep.mubr.bf16.mxu0 %v15658_v16 }
 0x342   : > { %3378 = vmatmul.mubr.bf16.gmra.mrb[92].mxu1 %v13437_v17  ;;  %v13505_v17 = vld [vmem:[%s15654_s0 + $0xa8] sm:$0xff]  }
 0x343   : > { %8668 = vmatmul.mubr.bf16.gmra.mrb[28].mxu0 %v13438_v18  ;;  %3387 = vmatprep.mubr.bf16.mxu1 %v15658_v16  ;;  %v13506_v18 = vld [vmem:[%s15654_s0 + $0x174] sm:$0xff]  }
 0x344   : > { %8677 = vmatprep.mubr.bf16.mxu0 %v15658_v16 }
 0x34a   : > { %3388 = vmatmul.mubr.bf16.gmra.mrb[96].mxu1 %v13439_v19  ;;  %v13507_v19 = vld [vmem:[%s15654_s0 + $0xb0] sm:$0xff]  }
 0x34b   : > { %8678 = vmatmul.mubr.bf16.gmra.mrb[32].mxu0 %v13443_v20  ;;  %3397 = vmatprep.mubr.bf16.mxu1 %v15658_v16  ;;  %v13508_v20 = vld [vmem:[%s15654_s0 + $0x17c] sm:$0xff]  }
 0x34c   : > { %8687 = vmatprep.mubr.bf16.mxu0 %v15658_v16 }
 0x352   : > { %3398 = vmatmul.mubr.bf16.gmra.mrb[100].mxu1 %v13447_v23  ;;  %v13511_v23 = vld [vmem:[%s15654_s0 + $0xc8] sm:$0xff]  }
 0x353   : > { %8688 = vmatmul.mubr.bf16.gmra.mrb[36].mxu0 %v13448_v24  ;;  %3407 = vmatprep.mubr.bf16.mxu1 %v15658_v16  ;;  %v13512_v24 = vld [vmem:[%s15654_s0 + $0x58] sm:$0xff]  }
 0x354   : > { %8697 = vmatprep.mubr.bf16.mxu0 %v15658_v16 }
 0x35a   : > { %3408 = vmatmul.mubr.bf16.gmra.mrb[104].mxu1 %v13449_v25  ;;  %v13513_v25 = vld [vmem:[%s15654_s0 + $0xd0] sm:$0xff]  }
 0x35b   : > { %8698 = vmatmul.mubr.bf16.gmra.mrb[40].mxu0 %v13450_v26  ;;  %3417 = vmatprep.mubr.bf16.mxu1 %v15658_v16  ;;  %v13514_v26 = vld [vmem:[%s15654_s0 + $0x60] sm:$0xff]  }
 0x35c   : > { %8707 = vmatprep.mubr.bf16.mxu0 %v15658_v16 }
 0x362   : > { %3418 = vmatmul.mubr.bf16.gmra.mrb[108].mxu1 %v13451_v27  ;;  %v13515_v27 = vld [vmem:[%s15654_s0 + $0xd8] sm:$0xff]  }
 0x363   : > { %8708 = vmatmul.mubr.bf16.gmra.mrb[44].mxu0 %v13452_v28  ;;  %3427 = vmatprep.mubr.bf16.mxu1 %v15658_v16  ;;  %v13516_v28 = vld [vmem:[%s15654_s0 + $0x68] sm:$0xff]  }
 0x364   : > { %8717 = vmatprep.mubr.bf16.mxu0 %v15658_v16 }
 0x36a   : > { %3428 = vmatmul.mubr.bf16.gmra.mrb[112].mxu1 %v13453_v29  ;;  %v13517_v29 = vld [vmem:[%s15654_s0 + $0xe0] sm:$0xff]  }
 0x36b   : > { %8718 = vmatmul.mubr.bf16.gmra.mrb[48].mxu0 %v13457_v30  ;;  %3437 = vmatprep.mubr.bf16.mxu1 %v15658_v16  ;;  %v13518_v30 = vld [vmem:[%s15654_s0 + $0x70] sm:$0xff]  }
 0x36c   : > { %8727 = vmatprep.mubr.bf16.mxu0 %v15658_v16 }
 0x372   : > { %3438 = vmatmul.mubr.bf16.gmra.mrb[116].mxu1 %v13461_v33  ;;  %v13521_v33 = vld [vmem:[%s15654_s0 + $0xf8] sm:$0xff]  }
 0x373   : > { %8728 = vmatmul.mubr.bf16.gmra.mrb[52].mxu0 %v13462_v34  ;;  %3447 = vmatprep.mubr.bf16.mxu1 %v15658_v16  ;;  %v13522_v34 = vld [vmem:[%s15654_s0 + $0x88] sm:$0xff]  }
 0x374   : > { %8737 = vmatprep.mubr.bf16.mxu0 %v15658_v16 }
 0x37a   : > { %3448 = vmatmul.mubr.bf16.gmra.mrb[120].mxu1 %v13463_v35  ;;  %v13523_v35 = vld [vmem:[%s15654_s0 + $0x100] sm:$0xff]  }
 0x37b   : > { %8738 = vmatmul.mubr.bf16.gmra.mrb[56].mxu0 %v13464_v36  ;;  %3457 = vmatprep.mubr.bf16.mxu1 %v15658_v16  ;;  %v13524_v36 = vld [vmem:[%s15654_s0 + $0x90] sm:$0xff]  }
 0x37c   : > { %8747 = vmatprep.mubr.bf16.mxu0 %v15658_v16 }
 0x382   : > { %3458 = vmatmul.mubr.bf16.gmra.mrb[124].mxu1 %v13465_v37  ;;  %v13525_v37 = vld [vmem:[%s15654_s0 + $0x108] sm:$0xff]  }
 0x383   : > { %8748 = vmatmul.mubr.bf16.gmra.mrb[60].mxu0 %v13466_v38  ;;  %4237 = vmatprep.mubr.bf16.mxu1 %v15658_v16  ;;  %v13526_v38 = vld [vmem:[%s15654_s0 + $0x98] sm:$0xff]  }
 0x384   : > { %8757 = vmatprep.mubr.bf16.mxu0 %v15658_v16 }
 0x38a   : > { %4238 = vmatmul.mubr.bf16.vlgmr.msra.gmra.mrb[0].mxu1 %v13467_v39  ;;  %v13527_v39 = vld [vmem:[%s15654_s0 + $0x118] sm:$0xff]  }
 0x38b   : > { %8758 = vmatmul.mubr.bf16.gmra.mrb[64].mxu0 %v13468_v40  ;;  %11996 = vmatpush1.bf16.msra.mxu1 %v13576_v41  ;;  %v13528_v40 = vld [vmem:[%s15654_s0 + $0xa8] sm:$0xff]   ;;  %v13529_v41 = vld [vmem:[%s15654_s0 + $0x120] sm:$0xff]  }
 0x38c   : > { %4247 = vmatprep.mubr.bf16.mxu1 %v15658_v16  ;;  %8767 = vmatprep.mubr.bf16.mxu0 %v15658_v16 }
 0x38d   : > { %11989 = vmatprep.subr.bf16.mxu1 %v13577_v42  ;;  %v13530_v42 = vld [vmem:[%s15654_s0 + $0xb0] sm:$0xff]  }
 0x38f   : > { %11997 = vmatpush1.bf16.msra.mxu1 %v13578_v45 }
 0x390   : > { %11990 = vmatprep.subr.bf16.mxu1 %v13579_v46 }
 0x392   : > { %4248 = vmatmul.mubr.bf16.gmra.mrb[4].mxu1 %v13472_v43  ;;  %v13531_v43 = vld [vmem:[%s15654_s0 + $0x128] sm:$0xff]  }
 0x393   : > { %8768 = vmatmul.mubr.bf16.gmra.mrb[68].mxu0 %v13473_v44  ;;  %4257 = vmatprep.mubr.bf16.mxu1 %v15658_v16  ;;  %v13532_v44 = vld [vmem:[%s15654_s0 + $0xb8] sm:$0xff]  }
 0x394   : > { %8777 = vmatprep.mubr.bf16.mxu0 %v15658_v16  ;;  %11998 = vmatpush1.bf16.msra.mxu1 %v13580_v47  ;;  %v13533_v47 = vld [vmem:[%s15654_s0 + $0x130] sm:$0xff]  }
 0x395   : > { %11991 = vmatprep.subr.bf16.mxu1 %v13581_v48  ;;  %v13534_v48 = vld [vmem:[%s15654_s0 + $0xc0] sm:$0xff]  }
 0x398   : > { %11999 = vmatpush1.bf16.msra.mxu1 %v13582_v51 }
 0x399   : > { %11992 = vmatprep.subr.bf16.mxu1 %v13583_v52 }
 0x39a   : > { %4258 = vmatmul.mubr.bf16.gmra.mrb[8].mxu1 %v13474_v49 }
 0x39b   : > { %8778 = vmatmul.mubr.bf16.gmra.mrb[72].mxu0 %v13475_v50  ;;  %4267 = vmatprep.mubr.bf16.mxu1 %v15658_v16 }
 0x39c   : > { %8787 = vmatprep.mubr.bf16.mxu0 %v15658_v16  ;;  %12000 = vmatpush1.bf16.msra.mxu1 %v13584_v53  ;;  %v13535_v53 = vld [vmem:[%s15654_s0 + $0x140] sm:$0xff]  }
 0x39d   : > { %11993 = vmatprep.subr.bf16.mxu1 %v13585_v54  ;;  %v13536_v54 = vld [vmem:[%s15654_s0 + $0xd0] sm:$0xff]  }
 0x3a0   : > { %12001 = vmatpush1.bf16.msra.mxu1 %v13586_v57 }
 0x3a1   : > { %11994 = vmatprep.subr.bf16.mxu1 %v13587_v58 }
 0x3a2   : > { %4268 = vmatmul.mubr.bf16.gmra.mrb[12].mxu1 %v13476_v55 }
 0x3a3   : > { %8788 = vmatmul.mubr.bf16.gmra.mrb[76].mxu0 %v13477_v56  ;;  %4277 = vmatprep.mubr.bf16.mxu1 %v15658_v16 }
 0x3a4   : > { %8797 = vmatprep.mubr.bf16.mxu0 %v15658_v16  ;;  %12002 = vmatpush1.bf16.msra.mxu1 %v13588_v59  ;;  %v13537_v59 = vld [vmem:[%s15654_s0 + $0x148] sm:$0xff]  }
 0x3a5   : > { %11995 = vmatprep.subr.bf16.mxu1 %v13589_v60  ;;  %v13538_v60 = vld [vmem:[%s15654_s0 + $0xd8] sm:$0xff]  }
 0x3a8   : > { %12003 = vmatpush1.bf16.msra.mxu1 %v13590_v63 }
 0x3aa   : > { %4278 = vmatmul.mubr.bf16.gmra.mrb[16].mxu1 %v13478_v61 }
 0x3ab   : > { %8798 = vmatmul.mubr.bf16.gmra.mrb[80].mxu0 %v13479_v62  ;;  %4287 = vmatprep.mubr.bf16.mxu1 %v15658_v16 }
 0x3ac   : > { %8807 = vmatprep.mubr.bf16.mxu0 %v15658_v16 }
 0x3b2   : > { %4288 = vmatmul.mubr.bf16.gmra.mrb[20].mxu1 %v13483_v0 }
 0x3b3   : > { %8808 = vmatmul.mubr.bf16.gmra.mrb[84].mxu0 %v13484_v1  ;;  %4297 = vmatprep.mubr.bf16.mxu1 %v15658_v16  ;;  %v13539_v1 = vld [vmem:[%s15654_s0 + $0x150] sm:$0xff]  }
 0x3b4   : > { %8817 = vmatprep.mubr.bf16.mxu0 %v15658_v16 }
 0x3ba   : > { %4298 = vmatmul.mubr.bf16.gmra.mrb[24].mxu1 %v13485_v2  ;;  %v13540_v2 = vld [vmem:[%s15654_s0 + $0xe0] sm:$0xff]  }
 0x3bb   : > { %8818 = vmatmul.mubr.bf16.gmra.mrb[88].mxu0 %v13486_v3  ;;  %4307 = vmatprep.mubr.bf16.mxu1 %v15658_v16 }
 0x3bc   : > { %8827 = vmatprep.mubr.bf16.mxu0 %v15658_v16 }
 0x3c2   : > { %4308 = vmatmul.mubr.bf16.gmra.mrb[28].mxu1 %v13487_v4 }
 0x3c3   : > { %8828 = vmatmul.mubr.bf16.gmra.mrb[92].mxu0 %v13488_v5  ;;  %4317 = vmatprep.mubr.bf16.mxu1 %v15658_v16 }
 0x3c4   : > { %8837 = vmatprep.mubr.bf16.mxu0 %v15658_v16 }
 0x3ca   : > { %4318 = vmatmul.mubr.bf16.gmra.mrb[32].mxu1 %v13489_v6 }
 0x3cb   : > { %8838 = vmatmul.mubr.bf16.gmra.mrb[96].mxu0 %v13490_v7  ;;  %4327 = vmatprep.mubr.bf16.mxu1 %v15658_v16  ;;  %v13541_v7 = vld [vmem:[%s15654_s0 + $0x158] sm:$0xff]  }
 0x3cc   : > { %8847 = vmatprep.mubr.bf16.mxu0 %v15658_v16 }
 0x3d2   : > { %4328 = vmatmul.mubr.bf16.gmra.mrb[36].mxu1 %v13494_v8  ;;  %v13542_v8 = vld [vmem:[%s15654_s0 + $0xe8] sm:$0xff]  }
 0x3d3   : > { %8848 = vmatmul.mubr.bf16.gmra.mrb[100].mxu0 %v13495_v9  ;;  %4337 = vmatprep.mubr.bf16.mxu1 %v15658_v16 }
 0x3d4   : > { %8857 = vmatprep.mubr.bf16.mxu0 %v15658_v16 }
 0x3da   : > { %4338 = vmatmul.mubr.bf16.gmra.mrb[40].mxu1 %v13496_v10 }
 0x3db   : > { %8858 = vmatmul.mubr.bf16.gmra.mrb[104].mxu0 %v13497_v11  ;;  %4347 = vmatprep.mubr.bf16.mxu1 %v15658_v16 }
 0x3dc   : > { %8867 = vmatprep.mubr.bf16.mxu0 %v15658_v16 }
 0x3e2   : > { %4348 = vmatmul.mubr.bf16.gmra.mrb[44].mxu1 %v13498_v12 }
 0x3e3   : > { %8868 = vmatmul.mubr.bf16.gmra.mrb[108].mxu0 %v13499_v13  ;;  %4357 = vmatprep.mubr.bf16.mxu1 %v15658_v16  ;;  %v13543_v13 = vld [vmem:[%s15654_s0 + $0xcc] sm:$0xff]  }
 0x3e4   : > { %8877 = vmatprep.mubr.bf16.mxu0 %v15658_v16 }
 0x3ea   : > { %4358 = vmatmul.mubr.bf16.gmra.mrb[48].mxu1 %v13500_v14  ;;  %v13544_v14 = vld [vmem:[%s15654_s0 + $0xf8] sm:$0xff]  }
 0x3eb   : > { %8878 = vmatmul.mubr.bf16.gmra.mrb[112].mxu0 %v13501_v15  ;;  %4367 = vmatprep.mubr.bf16.mxu1 %v15658_v16 }
 0x3ec   : > { %8887 = vmatprep.mubr.bf16.mxu0 %v15658_v16 }
 0x3f2   : > { %4368 = vmatmul.mubr.bf16.gmra.mrb[52].mxu1 %v13505_v17 }
 0x3f3   : > { %8888 = vmatmul.mubr.bf16.gmra.mrb[116].mxu0 %v13506_v18  ;;  %4377 = vmatprep.mubr.bf16.mxu1 %v15658_v16 }
 0x3f4   : > { %8897 = vmatprep.mubr.bf16.mxu0 %v15658_v16 }
 0x3fa   : > { %4378 = vmatmul.mubr.bf16.gmra.mrb[56].mxu1 %v13507_v19 }
 0x3fb   : > { %8898 = vmatmul.mubr.bf16.gmra.mrb[120].mxu0 %v13508_v20  ;;  %4387 = vmatprep.mubr.bf16.mxu1 %v15658_v16  ;;  %v13545_v20 = vld [vmem:[%s15654_s0 + $0xd4] sm:$0xff]  }
 0x3fc   : > { %8907 = vmatprep.mubr.bf16.mxu0 %v15658_v16 }
 0x402   : > { %4388 = vmatmul.mubr.bf16.gmra.mrb[60].mxu1 %v13509_v21  ;;  %v13546_v21 = vld [vmem:[%s15654_s0 + $0x100] sm:$0xff]  }
 0x403   : > { %8908 = vmatmul.mubr.bf16.gmra.mrb[124].mxu0 %v13510_v22  ;;  %4397 = vmatprep.mubr.bf16.mxu1 %v15658_v16 }
 0x404   : > { %9687 = vmatprep.mubr.bf16.mxu0 %v15658_v16 }
 0x40a   : > { %4398 = vmatmul.mubr.bf16.gmra.mrb[64].mxu1 %v13511_v23 }
 0x40b   : > { %9688 = vmatmul.mubr.bf16.vlgmr.msra.gmra.mrb[0].mxu0 %v13512_v24  ;;  %4407 = vmatprep.mubr.bf16.mxu1 %v15658_v16 }
 0x40c   : > { %9697 = vmatprep.mubr.bf16.mxu0 %v15658_v16 }
 0x412   : > { %4408 = vmatmul.mubr.bf16.gmra.mrb[68].mxu1 %v13513_v25 }
 0x413   : > { %9698 = vmatmul.mubr.bf16.gmra.mrb[4].mxu0 %v13514_v26  ;;  %4417 = vmatprep.mubr.bf16.mxu1 %v15658_v16  ;;  %v13547_v26 = vld [vmem:[%s15654_s0 + $0xdc] sm:$0xff]  }
 0x414   : > { %9707 = vmatprep.mubr.bf16.mxu0 %v15658_v16 }
 0x41a   : > { %4418 = vmatmul.mubr.bf16.gmra.mrb[72].mxu1 %v13515_v27  ;;  %v13548_v27 = vld [vmem:[%s15654_s0 + $0x108] sm:$0xff]  }
 0x41b   : > { %9708 = vmatmul.mubr.bf16.gmra.mrb[8].mxu0 %v13516_v28  ;;  %4427 = vmatprep.mubr.bf16.mxu1 %v15658_v16 }
 0x41c   : > { %9717 = vmatprep.mubr.bf16.mxu0 %v15658_v16 }
 0x422   : > { %4428 = vmatmul.mubr.bf16.gmra.mrb[76].mxu1 %v13517_v29 }
 0x423   : > { %9718 = vmatmul.mubr.bf16.gmra.mrb[12].mxu0 %v13518_v30  ;;  %4437 = vmatprep.mubr.bf16.mxu1 %v15658_v16 }
 0x424   : > { %9727 = vmatprep.mubr.bf16.mxu0 %v15658_v16 }
 0x42a   : > { %4438 = vmatmul.mubr.bf16.gmra.mrb[80].mxu1 %v13519_v31 }
 0x42b   : > { %9728 = vmatmul.mubr.bf16.gmra.mrb[16].mxu0 %v13520_v32  ;;  %4447 = vmatprep.mubr.bf16.mxu1 %v15658_v16  ;;  %v13549_v32 = vld [vmem:[%s15654_s0 + $0xe4] sm:$0xff]  }
 0x42c   : > { %9737 = vmatprep.mubr.bf16.mxu0 %v15658_v16 }
 0x432   : > { %4448 = vmatmul.mubr.bf16.gmra.mrb[84].mxu1 %v13521_v33  ;;  %v13550_v33 = vld [vmem:[%s15654_s0 + $0x110] sm:$0xff]  }
 0x433   : > { %9738 = vmatmul.mubr.bf16.gmra.mrb[20].mxu0 %v13522_v34  ;;  %4457 = vmatprep.mubr.bf16.mxu1 %v15658_v16 }
 0x434   : > { %9747 = vmatprep.mubr.bf16.mxu0 %v15658_v16 }
 0x43a   : > { %4458 = vmatmul.mubr.bf16.gmra.mrb[88].mxu1 %v13523_v35 }
 0x43b   : > { %9748 = vmatmul.mubr.bf16.gmra.mrb[24].mxu0 %v13524_v36  ;;  %4467 = vmatprep.mubr.bf16.mxu1 %v15658_v16 }
 0x43c   : > { %9757 = vmatprep.mubr.bf16.mxu0 %v15658_v16 }
 0x442   : > { %4468 = vmatmul.mubr.bf16.gmra.mrb[92].mxu1 %v13525_v37 }
 0x443   : > { %9758 = vmatmul.mubr.bf16.gmra.mrb[28].mxu0 %v13526_v38  ;;  %4477 = vmatprep.mubr.bf16.mxu1 %v15658_v16  ;;  %v13551_v38 = vld [vmem:[%s15654_s0 + $0xf4] sm:$0xff]  }
 0x444   : > { %9767 = vmatprep.mubr.bf16.mxu0 %v15658_v16 }
 0x44a   : > { %4478 = vmatmul.mubr.bf16.gmra.mrb[96].mxu1 %v13527_v39  ;;  %v13552_v39 = vld [vmem:[%s15654_s0 + $0x120] sm:$0xff]  }
 0x44b   : > { %9768 = vmatmul.mubr.bf16.gmra.mrb[32].mxu0 %v13528_v40  ;;  %4487 = vmatprep.mubr.bf16.mxu1 %v15658_v16 }
 0x44c   : > { %9777 = vmatprep.mubr.bf16.mxu0 %v15658_v16 }
 0x452   : > { %4488 = vmatmul.mubr.bf16.gmra.mrb[100].mxu1 %v13529_v41 }
 0x453   : > { %9778 = vmatmul.mubr.bf16.gmra.mrb[36].mxu0 %v13530_v42  ;;  %4497 = vmatprep.mubr.bf16.mxu1 %v15658_v16 }
 0x454   : > { %9787 = vmatprep.mubr.bf16.mxu0 %v15658_v16 }
 0x45a   : > { %4498 = vmatmul.mubr.bf16.gmra.mrb[104].mxu1 %v13531_v43 }
 0x45b   : > { %9788 = vmatmul.mubr.bf16.gmra.mrb[40].mxu0 %v13532_v44  ;;  %4507 = vmatprep.mubr.bf16.mxu1 %v15658_v16  ;;  %v13553_v44 = vld [vmem:[%s15654_s0 + $0xfc] sm:$0xff]  }
 0x45c   : > { %9797 = vmatprep.mubr.bf16.mxu0 %v15658_v16 }
 0x45d   : > { %v15138_v45 = vpop.f32.mrb[0].mxu1 }
 0x45e   : > { %v15140_v46 = vpop.f32.mrb[1].mxu1 }
 0x45f   : > { %v15148_v49 = vpop.f32.mrb[2].mxu1 }
 0x460   : > { %v15150_v50 = vpop.f32.mrb[3].mxu1 }
 0x462   : > { %4508 = vmatmul.mubr.bf16.gmra.mrb[108].mxu1 %v13533_v47  ;;  %v13554_v47 = vld [vmem:[%s15654_s0 + $0x128] sm:$0xff]  }
 0x463   : > { %9798 = vmatmul.mubr.bf16.gmra.mrb[44].mxu0 %v13534_v48  ;;  %4517 = vmatprep.mubr.bf16.mxu1 %v15658_v16 }
 0x464   : > { %9807 = vmatprep.mubr.bf16.mxu0 %v15658_v16 }
 0x465   : > { %v15154_v51 = vpop.f32.mrb[4].mxu1 }
 0x466   : > { %v15156_v52 = vpop.f32.mrb[5].mxu1 }
 0x467   : > { %v15164_v55 = vpop.f32.mrb[6].mxu1 }
 0x468   : > { %v15166_v56 = vpop.f32.mrb[7].mxu1 }
 0x46a   : > { %4518 = vmatmul.mubr.bf16.gmra.mrb[112].mxu1 %v13535_v53 }
 0x46b   : > { %9808 = vmatmul.mubr.bf16.gmra.mrb[48].mxu0 %v13536_v54  ;;  %4527 = vmatprep.mubr.bf16.mxu1 %v15658_v16 }
 0x46c   : > { %9817 = vmatprep.mubr.bf16.mxu0 %v15658_v16 }
 0x46d   : > { %v15170_v57 = vpop.f32.mrb[8].mxu1 }
 0x46e   : > { %v15172_v58 = vpop.f32.mrb[9].mxu1 }
 0x46f   : > { %v15180_v61 = vpop.f32.mrb[10].mxu1 }
 0x470   : > { %v15182_v62 = vpop.f32.mrb[11].mxu1 }
 0x472   : > { %4528 = vmatmul.mubr.bf16.gmra.mrb[116].mxu1 %v13537_v59 }
 0x473   : > { %9818 = vmatmul.mubr.bf16.gmra.mrb[52].mxu0 %v13538_v60  ;;  %4537 = vmatprep.mubr.bf16.mxu1 %v15658_v16  ;;  %v13555_v60 = vld [vmem:[%s15654_s0 + $0x104] sm:$0xff]  }
 0x474   : > { %9827 = vmatprep.mubr.bf16.mxu0 %v15658_v16 }
 0x475   : > { %v15186_v63 = vpop.f32.mrb[12].mxu1 }
 0x476   : > { %v15188_v0 = vpop.f32.mrb[13].mxu1 }
 0x477   : > { %v15196_v3 = vpop.f32.mrb[14].mxu1 }
 0x478   : > { %v15198_v4 = vpop.f32.mrb[15].mxu1 }
 0x47a   : > { %4538 = vmatmul.mubr.bf16.gmra.mrb[120].mxu1 %v13539_v1  ;;  %v13556_v1 = vld [vmem:[%s15654_s0 + $0x130] sm:$0xff]  }
 0x47b   : > { %9828 = vmatmul.mubr.bf16.gmra.mrb[56].mxu0 %v13540_v2  ;;  %4547 = vmatprep.mubr.bf16.mxu1 %v15658_v16 }
 0x47c   : > { %9837 = vmatprep.mubr.bf16.mxu0 %v15658_v16 }
 0x47d   : > { %v15202_v5 = vpop.f32.mrb[16].mxu1 }
 0x47e   : > { %v15204_v6 = vpop.f32.mrb[17].mxu1 }
 0x47f   : > { %v15212_v9 = vpop.f32.mrb[18].mxu1 }
 0x480   : > { %v15214_v10 = vpop.f32.mrb[19].mxu1 }
 0x482   : > { %4548 = vmatmul.mubr.bf16.gmra.mrb[124].mxu1 %v13541_v7 }
 0x483   : > { %9838 = vmatmul.mubr.bf16.gmra.mrb[60].mxu0 %v13542_v8  ;;  %5487 = vmatprep.mubr.bf16.mxu1 %v15658_v16 }
 0x484   : > { %9847 = vmatprep.mubr.bf16.mxu0 %v15658_v16 }
 0x485   : > { %v15218_v11 = vpop.f32.mrb[20].mxu1 }
 0x486   : > { %v15220_v12 = vpop.f32.mrb[21].mxu1 }
 0x487   : > { %v15228_v15 = vpop.f32.mrb[22].mxu1 }
 0x488   : > { %v15230_v17 = vpop.f32.mrb[23].mxu1 }
 0x48a   : > { %5488 = vmatmul.mubr.bf16.vlgmr.msra.gmra.mrb[64].mxu1 %v13543_v13 }
 0x48b   : > { %9848 = vmatmul.mubr.bf16.gmra.mrb[64].mxu0 %v13544_v14  ;;  %5497 = vmatprep.mubr.bf16.mxu1 %v15658_v16  ;;  %v13557_v14 = vld [vmem:[%s15654_s0 + $0x10c] sm:$0xff]  }
 0x48c   : > { %9857 = vmatprep.mubr.bf16.mxu0 %v15658_v16 }
 0x48d   : > { %v15234_v18 = vpop.f32.mrb[24].mxu1 }
 0x48e   : > { %v15236_v19 = vpop.f32.mrb[25].mxu1 }
 0x48f   : > { %v15244_v22 = vpop.f32.mrb[26].mxu1 }
 0x490   : > { %v15246_v23 = vpop.f32.mrb[27].mxu1 }
 0x492   : > { %5498 = vmatmul.mubr.bf16.gmra.mrb[68].mxu1 %v13545_v20  ;;  %v13558_v20 = vld [vmem:[%s15654_s0 + $0x138] sm:$0xff]  }
 0x493   : > { %9858 = vmatmul.mubr.bf16.gmra.mrb[68].mxu0 %v13546_v21  ;;  %5507 = vmatprep.mubr.bf16.mxu1 %v15658_v16 }
 0x494   : > { %9867 = vmatprep.mubr.bf16.mxu0 %v15658_v16 }
 0x495   : > { %v15250_v24 = vpop.f32.mrb[28].mxu1 }
 0x496   : > { %v15252_v25 = vpop.f32.mrb[29].mxu1 }
 0x497   : > { %v15260_v28 = vpop.f32.mrb[30].mxu1 }
 0x498   : > { %v15262_v29 = vpop.f32.mrb[31].mxu1 }
 0x49a   : > { %5508 = vmatmul.mubr.bf16.gmra.mrb[72].mxu1 %v13547_v26 }
 0x49b   : > { %9868 = vmatmul.mubr.bf16.gmra.mrb[72].mxu0 %v13548_v27  ;;  %5517 = vmatprep.mubr.bf16.mxu1 %v15658_v16 }
 0x49c   : > { %9877 = vmatprep.mubr.bf16.mxu0 %v15658_v16 }
 0x49d   : > { %v15266_v30 = vpop.f32.mrb[32].mxu1 }
 0x49e   : > { %v15268_v31 = vpop.f32.mrb[33].mxu1 }
 0x49f   : > { %v15276_v34 = vpop.f32.mrb[34].mxu1 }
 0x4a0   : > { %v15278_v35 = vpop.f32.mrb[35].mxu1 }
 0x4a2   : > { %5518 = vmatmul.mubr.bf16.gmra.mrb[76].mxu1 %v13549_v32 }
 0x4a3   : > { %9878 = vmatmul.mubr.bf16.gmra.mrb[76].mxu0 %v13550_v33  ;;  %5527 = vmatprep.mubr.bf16.mxu1 %v15658_v16  ;;  %v13559_v33 = vld [vmem:[%s15654_s0 + $0x11c] sm:$0xff]  }
 0x4a4   : > { %9887 = vmatprep.mubr.bf16.mxu0 %v15658_v16 }
 0x4a5   : > { %v15282_v36 = vpop.f32.mrb[36].mxu1 }
 0x4a6   : > { %v15284_v37 = vpop.f32.mrb[37].mxu1 }
 0x4a7   : > { %v15292_v40 = vpop.f32.mrb[38].mxu1 }
 0x4a8   : > { %v15294_v41 = vpop.f32.mrb[39].mxu1 }
 0x4aa   : > { %5528 = vmatmul.mubr.bf16.gmra.mrb[80].mxu1 %v13551_v38  ;;  %v13560_v38 = vld [vmem:[%s15654_s0 + $0x148] sm:$0xff]  }
 0x4ab   : > { %9888 = vmatmul.mubr.bf16.gmra.mrb[80].mxu0 %v13552_v39  ;;  %5537 = vmatprep.mubr.bf16.mxu1 %v15658_v16 }
 0x4ac   : > { %9897 = vmatprep.mubr.bf16.mxu0 %v15658_v16 }
 0x4ad   : > { %v15298_v42 = vpop.f32.mrb[40].mxu1 }
 0x4ae   : > { %v15300_v43 = vpop.f32.mrb[41].mxu1 }
 0x4af   : > { %v15308_v48 = vpop.f32.mrb[42].mxu1 }
 0x4b0   : > { %v15310_v53 = vpop.f32.mrb[43].mxu1 }
 0x4b2   : > { %5538 = vmatmul.mubr.bf16.gmra.mrb[84].mxu1 %v13553_v44 }
 0x4b3   : > { %9898 = vmatmul.mubr.bf16.gmra.mrb[84].mxu0 %v13554_v47  ;;  %5547 = vmatprep.mubr.bf16.mxu1 %v15658_v16 }
 0x4b4   : > { %9907 = vmatprep.mubr.bf16.mxu0 %v15658_v16 }
 0x4b5   : > { %v15314_v54 = vpop.f32.mrb[44].mxu1 }
 0x4b6   : > { %v15316_v59 = vpop.f32.mrb[45].mxu1 }
 0x4b7   : > { %v15324_v2 = vpop.f32.mrb[46].mxu1 }
 0x4b8   : > { %v15326_v7 = vpop.f32.mrb[47].mxu1 }
 0x4b9   : > { %15660 = vst [vmem:[#allocation4_spill] sm:$0xff] %v15326_v7 }
 0x4ba   : > { %5548 = vmatmul.mubr.bf16.gmra.mrb[88].mxu1 %v13555_v60 }
 0x4bb   : > { %9908 = vmatmul.mubr.bf16.gmra.mrb[88].mxu0 %v13556_v1  ;;  %5557 = vmatprep.mubr.bf16.mxu1 %v15658_v16  ;;  %v13561_v1 = vld [vmem:[%s15654_s0 + $0x124] sm:$0xff]  }
 0x4bc   : > { %9917 = vmatprep.mubr.bf16.mxu0 %v15658_v16 }
 0x4bd   : > { %v15330_v8 = vpop.f32.mrb[48].mxu1 }
 0x4be   : > { %15661 = vst [vmem:[#allocation5_spill] sm:$0xff] %v15330_v8  ;;  %v15332_v13 = vpop.f32.mrb[49].mxu1 }
 0x4bf   : > { %15662 = vst [vmem:[#allocation6_spill] sm:$0xff] %v15332_v13  ;;  %v15340_v21 = vpop.f32.mrb[50].mxu1 }
 0x4c0   : > { %15663 = vst [vmem:[#allocation7_spill] sm:$0xff] %v15340_v21  ;;  %v15342_v26 = vpop.f32.mrb[51].mxu1 }
 0x4c1   : > { %15664 = vst [vmem:[#allocation8_spill] sm:$0xff] %v15342_v26 }
 0x4c2   : > { %5558 = vmatmul.mubr.bf16.gmra.mrb[92].mxu1 %v13557_v14  ;;  %v13562_v14 = vld [vmem:[%s15654_s0 + $0x150] sm:$0xff]  }
 0x4c3   : > { %9918 = vmatmul.mubr.bf16.gmra.mrb[92].mxu0 %v13558_v20  ;;  %5567 = vmatprep.mubr.bf16.mxu1 %v15658_v16 }
 0x4c4   : > { %9927 = vmatprep.mubr.bf16.mxu0 %v15658_v16 }
 0x4c5   : > { %v15346_v27 = vpop.f32.mrb[52].mxu1 }
 0x4c6   : > { %15665 = vst [vmem:[#allocation9_spill] sm:$0xff] %v15346_v27  ;;  %v15348_v32 = vpop.f32.mrb[53].mxu1 }
 0x4c7   : > { %15666 = vst [vmem:[#allocation10_spill] sm:$0xff] %v15348_v32  ;;  %v15356_v39 = vpop.f32.mrb[54].mxu1 }
 0x4c8   : > { %15667 = vst [vmem:[#allocation11_spill] sm:$0xff] %v15356_v39  ;;  %v15358_v44 = vpop.f32.mrb[55].mxu1 }
 0x4c9   : > { %15668 = vst [vmem:[#allocation12_spill] sm:$0xff] %v15358_v44 }
 0x4ca   : > { %5568 = vmatmul.mubr.bf16.gmra.mrb[96].mxu1 %v13559_v33 }
 0x4cb   : > { %9928 = vmatmul.mubr.bf16.gmra.mrb[96].mxu0 %v13560_v38  ;;  %5577 = vmatprep.mubr.bf16.mxu1 %v15658_v16  ;;  %v10522_v38 = vlaneseq }
 0x4cc   : > { %9937 = vmatprep.mubr.bf16.mxu0 %v15658_v16 }
 0x4cd   : > { %v15363_v47 = vpop.f32.mrb[56].mxu1 }
 0x4ce   : > { %15669 = vst [vmem:[#allocation13_spill] sm:$0xff] %v15363_v47  ;;  %v15365_v60 = vpop.f32.mrb[57].mxu1 }
 0x4cf   : > { %15670 = vst [vmem:[#allocation14_spill] sm:$0xff] %v15365_v60  ;;  %v15373_v20 = vpop.f32.mrb[58].mxu1  ;;  %v10523_v60 = vshrl.u32 %v10522_v38, 7 }
 0x4d0   : > { %15671 = vst [vmem:[#allocation15_spill] sm:$0xff] %v15373_v20  ;;  %v15375_v33 = vpop.f32.mrb[59].mxu1  ;;  %v13563_v20 = vld [vmem:[%s15654_s0 + $0x12c] sm:$0xff]  }
 0x4d1   : > { %15672 = vst [vmem:[#allocation16_spill] sm:$0xff] %v15375_v33  ;;  %v10524_v38 = vsub.s32 0, %v10523_v60  ;;  %v10528_v33 = vsub.s32 1, %v10523_v60  ;;  %v13566_v60 = vld [vmem:[%s15654_s0 + $0x160] sm:$0xff]  }
 0x4d2   : > { %5578 = vmatmul.mubr.bf16.gmra.mrb[100].mxu1 %v13561_v1  ;;  %v13564_v1 = vld [vmem:[%s15654_s0 + $0x158] sm:$0xff]  }
 0x4d3   : > { %9938 = vmatmul.mubr.bf16.gmra.mrb[100].mxu0 %v13562_v14  ;;  %5587 = vmatprep.mubr.bf16.mxu1 %v15658_v16 }
 0x4d4   : > { %9947 = vmatprep.mubr.bf16.mxu0 %v15658_v16 }
 0x4d5   : > { %v15381_v47 = vpop.f32.mrb[60].mxu1 }
 0x4d6   : > { %15673 = vst [vmem:[#allocation17_spill] sm:$0xff] %v15381_v47  ;;  %v15383_v44 = vpop.f32.mrb[61].mxu1  ;;  %v10520_v47 = vld [vmem:[%s826_s19] sm:$0x3]  ;;  %s11040_s19 = sshll.u32 %s15702_s5, 3 }
 0x4d7   : > { %15674 = vst [vmem:[#allocation18_spill] sm:$0xff] %v15383_v44  ;;  %v15395_v14 = vpop.f32.mrb[62].mxu1  ;;  %v15677_v44 = vmov 0   ;;  %v15401_v39 = vrot.slane %v10520_v47, %v10524_v38  ;;  %v15403_v27 = vrot.slane %v10520_v47, %v10528_v33  ;;  %s836_s23 = scalar_lea.vmem %s15657_s3, %s11040_s19 }
 0x4d8   : > { %15675 = vst [vmem:[#allocation19_spill] sm:$0xff] %v15395_v14  ;;  %v15397_v16 = vpop.f32.mrb[63].mxu1 }
 0x4d9   : > { %15676 = vst [vmem:[#allocation20_spill] sm:$0xff] %v15397_v16  ;;  %v13565_v16 = vld [vmem:[%s15654_s0 + $0x134] sm:$0xff]  }
 0x4da   : > { %5588 = vmatmul.mubr.bf16.gmra.mrb[104].mxu1 %v13563_v20 }
 0x4db   : > { %9948 = vmatmul.mubr.bf16.gmra.mrb[104].mxu0 %v13564_v1  ;;  %5597 = vmatprep.mubr.bf16.mxu1 %v15677_v44 }
 0x4dc   : > { %9957 = vmatprep.mubr.bf16.mxu0 %v15677_v44 }
 0x4de   : > { %v9689_v32 = vpop.f32.mrb[0].mxu0 }
 0x4df   : > { %v12004_v26 = vadd.f32 %v9689_v32, %v15138_v45  ;;  %v9691_v21 = vpop.f32.mrb[1].mxu0 }
 0x4e0   : > { %v12005_v20 = vadd.f32 %v9691_v21, %v15140_v46  ;;  %v9693_v1 = vpop.f32.mrb[2].mxu0 }
 0x4e1   : > { %v10532_v38 = vadd.f32 %v12004_v26, %v15401_v39  ;;  %v12006_v14 = vadd.f32 %v9693_v1, %v15148_v49  ;;  %v9695_v47 = vpop.f32.mrb[3].mxu0 }
 0x4e2   : > { %v10533_v33 = vadd.f32 %v12005_v20, %v15403_v27  ;;  %v12007_v45 = vadd.f32 %v9695_v47, %v15150_v50  ;;  %5598 = vmatmul.mubr.bf16.gmra.mrb[108].mxu1 %v13565_v16  ;;  %v13567_v16 = vld [vmem:[%s15654_s0 + $0x144] sm:$0xff]   ;;  %v13568_v50 = vld [vmem:[%s15654_s0 + $0x170] sm:$0xff]  }
 0x4e3   : > { %v10534_v32 = vadd.f32 %v12006_v14, %v15401_v39  ;;  %9958 = vmatmul.mubr.bf16.gmra.mrb[108].mxu0 %v13566_v60  ;;  %5607 = vmatprep.mubr.bf16.mxu1 %v15677_v44  ;;  %v10660_v46 = vmax.f32 %v10532_v38, 0.0 }
 0x4e4   : > { %v10535_v13 = vadd.f32 %v12007_v45, %v15403_v27  ;;  %9967 = vmatprep.mubr.bf16.mxu0 %v15677_v44  ;;  %v10661_v26 = vmax.f32 %v10533_v33, 0.0 }
 0x4e5   : > { %v10662_v21 = vmax.f32 %v10534_v32, 0.0 }
 0x4e6   : > { %v10663_v8 = vmax.f32 %v10535_v13, 0.0  ;;  %v9699_v49 = vpop.f32.mrb[4].mxu0 }
 0x4e7   : > { %v10788_v1 = vadd.f32 %v10662_v21, %v10660_v46  ;;  %v12008_v20 = vadd.f32 %v9699_v49, %v15154_v51  ;;  %v9701_v7 = vpop.f32.mrb[5].mxu0 }
 0x4e8   : > { %v10851_v14 = vadd.f32 %v10663_v8, %v10661_v26  ;;  %v12009_v60 = vadd.f32 %v9701_v7, %v15156_v52  ;;  %v9703_v38 = vpop.f32.mrb[6].mxu0 }
 0x4e9   : > { %v10536_v47 = vadd.f32 %v12008_v20, %v15401_v39  ;;  %v12010_v13 = vadd.f32 %v9703_v38, %v15164_v55  ;;  %v9705_v33 = vpop.f32.mrb[7].mxu0 }
 0x4ea   : > { %v10537_v51 = vadd.f32 %v12009_v60, %v15403_v27  ;;  %v12011_v45 = vadd.f32 %v9705_v33, %v15166_v56  ;;  %5608 = vmatmul.mubr.bf16.gmra.mrb[112].mxu1 %v13567_v16  ;;  %v13569_v16 = vld [vmem:[%s15654_s0 + $0x14c] sm:$0xff]  }
 0x4eb   : > { %v10664_v32 = vmax.f32 %v10536_v47, 0.0  ;;  %v10538_v46 = vadd.f32 %v12010_v13, %v15401_v39  ;;  %9968 = vmatmul.mubr.bf16.gmra.mrb[112].mxu0 %v13568_v50  ;;  %5617 = vmatprep.mubr.bf16.mxu1 %v15677_v44  ;;  %v13570_v50 = vld [vmem:[%s15654_s0 + $0x178] sm:$0xff]  }
 0x4ec   : > { %v10665_v21 = vmax.f32 %v10537_v51, 0.0  ;;  %v10539_v8 = vadd.f32 %v12011_v45, %v15403_v27  ;;  %9977 = vmatprep.mubr.bf16.mxu0 %v15677_v44 }
 0x4ed   : > { %v10789_v52 = vadd.f32 %v10788_v1, %v10664_v32  ;;  %v10666_v7 = vmax.f32 %v10538_v46, 0.0 }
 0x4ee   : > { %v10852_v55 = vadd.f32 %v10851_v14, %v10665_v21  ;;  %v10667_v26 = vmax.f32 %v10539_v8, 0.0  ;;  %v9709_v49 = vpop.f32.mrb[8].mxu0 }
 0x4ef   : > { %v10790_v20 = vadd.f32 %v10789_v52, %v10666_v7  ;;  %v12012_v56 = vadd.f32 %v9709_v49, %v15170_v57  ;;  %v9711_v60 = vpop.f32.mrb[9].mxu0  ;;  %v13571_v49 = vld [vmem:[%s15654_s0 + $0x154] sm:$0xff]  }
 0x4f0   : > { %v10853_v38 = vadd.f32 %v10852_v55, %v10667_v26  ;;  %v12013_v47 = vadd.f32 %v9711_v60, %v15172_v58  ;;  %v9713_v1 = vpop.f32.mrb[10].mxu0 }
 0x4f1   : > { %v10540_v14 = vadd.f32 %v12012_v56, %v15401_v39  ;;  %v12014_v13 = vadd.f32 %v9713_v1, %v15180_v61  ;;  %v9715_v33 = vpop.f32.mrb[11].mxu0  ;;  %v13572_v56 = vld [vmem:[%s15654_s0 + $0x180] sm:$0xff]  }
 0x4f2   : > { %v10541_v57 = vadd.f32 %v12013_v47, %v15403_v27  ;;  %v12015_v51 = vadd.f32 %v9715_v33, %v15182_v62  ;;  %5618 = vmatmul.mubr.bf16.gmra.mrb[116].mxu1 %v13569_v16 }
 0x4f3   : > { %v10668_v45 = vmax.f32 %v10540_v14, 0.0  ;;  %v10542_v32 = vadd.f32 %v12014_v13, %v15401_v39  ;;  %9978 = vmatmul.mubr.bf16.gmra.mrb[116].mxu0 %v13570_v50  ;;  %5627 = vmatprep.mubr.bf16.mxu1 %v15677_v44 }
 0x4f4   : > { %v10669_v46 = vmax.f32 %v10541_v57, 0.0  ;;  %v10543_v21 = vadd.f32 %v12015_v51, %v15403_v27  ;;  %9987 = vmatprep.mubr.bf16.mxu0 %v15677_v44 }
 0x4f5   : > { %v10791_v58 = vadd.f32 %v10790_v20, %v10668_v45  ;;  %v10670_v8 = vmax.f32 %v10542_v32, 0.0 }
 0x4f6   : > { %v10854_v61 = vadd.f32 %v10853_v38, %v10669_v46  ;;  %v10671_v52 = vmax.f32 %v10543_v21, 0.0  ;;  %v9719_v7 = vpop.f32.mrb[12].mxu0 }
 0x4f7   : > { %v10792_v55 = vadd.f32 %v10791_v58, %v10670_v8  ;;  %v12016_v62 = vadd.f32 %v9719_v7, %v15186_v63  ;;  %v9721_v26 = vpop.f32.mrb[13].mxu0  ;;  %v13573_v58 = vld [vmem:[%s15654_s0 + $0x15c] sm:$0xff]   ;;  %v13574_v8 = vld [vmem:[%s15654_s0 + $0x188] sm:$0xff]  }
 0x4f8   : > { %v10855_v60 = vadd.f32 %v10854_v61, %v10671_v52  ;;  %v12017_v16 = vadd.f32 %v9721_v26, %v15188_v0  ;;  %v9723_v20 = vpop.f32.mrb[14].mxu0 }
 0x4f9   : > { %v10544_v50 = vadd.f32 %v12016_v62, %v15401_v39  ;;  %v12018_v38 = vadd.f32 %v9723_v20, %v15196_v3  ;;  %v9725_v47 = vpop.f32.mrb[15].mxu0 }
 0x4fa   : > { %v10545_v63 = vadd.f32 %v12017_v16, %v15403_v27  ;;  %v12019_v1 = vadd.f32 %v9725_v47, %v15198_v4  ;;  %5628 = vmatmul.mubr.bf16.gmra.mrb[120].mxu1 %v13571_v49 }
 0x4fb   : > { %v10672_v14 = vmax.f32 %v10544_v50, 0.0  ;;  %v10546_v13 = vadd.f32 %v12018_v38, %v15401_v39  ;;  %9988 = vmatmul.mubr.bf16.gmra.mrb[120].mxu0 %v13572_v56  ;;  %5637 = vmatprep.mubr.bf16.mxu1 %v15677_v44 }
 0x4fc   : > { %v10673_v33 = vmax.f32 %v10545_v63, 0.0  ;;  %v10547_v57 = vadd.f32 %v12019_v1, %v15403_v27  ;;  %9997 = vmatprep.mubr.bf16.mxu0 %v15677_v44 }
 0x4fd   : > { %v10793_v0 = vadd.f32 %v10792_v55, %v10672_v14  ;;  %v10674_v51 = vmax.f32 %v10546_v13, 0.0 }
 0x4fe   : > { %v10856_v3 = vadd.f32 %v10855_v60, %v10673_v33  ;;  %v10675_v45 = vmax.f32 %v10547_v57, 0.0  ;;  %v9729_v32 = vpop.f32.mrb[16].mxu0 }
 0x4ff   : > { %v10794_v46 = vadd.f32 %v10793_v0, %v10674_v51  ;;  %v12020_v4 = vadd.f32 %v9729_v32, %v15202_v5  ;;  %v9731_v21 = vpop.f32.mrb[17].mxu0 }
 0x500   : > { %v10857_v61 = vadd.f32 %v10856_v3, %v10675_v45  ;;  %v12021_v44 = vadd.f32 %v9731_v21, %v15204_v6  ;;  %v9733_v52 = vpop.f32.mrb[18].mxu0 }
 0x501   : > { %v10548_v7 = vadd.f32 %v12020_v4, %v15401_v39  ;;  %v12022_v55 = vadd.f32 %v9733_v52, %v15212_v9  ;;  %v9735_v62 = vpop.f32.mrb[19].mxu0 }
 0x502   : > { %v10549_v5 = vadd.f32 %v12021_v44, %v15403_v27  ;;  %v12023_v26 = vadd.f32 %v9735_v62, %v15214_v10  ;;  %5638 = vmatmul.mubr.bf16.gmra.mrb[124].mxu1 %v13573_v58 }
 0x503   : > { %v10676_v49 = vmax.f32 %v10548_v7, 0.0  ;;  %v10550_v56 = vadd.f32 %v12022_v55, %v15401_v39  ;;  %9998 = vmatmul.mubr.bf16.gmra.mrb[124].mxu0 %v13574_v8 }
 0x504   : > { %v10677_v60 = vmax.f32 %v10549_v5, 0.0  ;;  %v10551_v16 = vadd.f32 %v12023_v26, %v15403_v27 }
 0x505   : > { %v10795_v20 = vadd.f32 %v10794_v46, %v10676_v49  ;;  %v10678_v6 = vmax.f32 %v10550_v56, 0.0 }
 0x506   : > { %v10858_v50 = vadd.f32 %v10857_v61, %v10677_v60  ;;  %v10679_v38 = vmax.f32 %v10551_v16, 0.0  ;;  %v9739_v47 = vpop.f32.mrb[20].mxu0 }
 0x507   : > { %v10796_v63 = vadd.f32 %v10795_v20, %v10678_v6  ;;  %v12024_v9 = vadd.f32 %v9739_v47, %v15218_v11  ;;  %v9741_v1 = vpop.f32.mrb[21].mxu0 }
 0x508   : > { %v10859_v14 = vadd.f32 %v10858_v50, %v10679_v38  ;;  %v12025_v10 = vadd.f32 %v9741_v1, %v15220_v12  ;;  %v9743_v13 = vpop.f32.mrb[22].mxu0 }
 0x509   : > { %v10552_v33 = vadd.f32 %v12024_v9, %v15401_v39  ;;  %v12026_v57 = vadd.f32 %v9743_v13, %v15228_v15  ;;  %v9745_v0 = vpop.f32.mrb[23].mxu0 }
 0x50a   : > { %v10553_v51 = vadd.f32 %v12025_v10, %v15403_v27  ;;  %v12027_v3 = vadd.f32 %v9745_v0, %v15230_v17 }
 0x50b   : > { %v10680_v45 = vmax.f32 %v10552_v33, 0.0  ;;  %v10554_v32 = vadd.f32 %v12026_v57, %v15401_v39 }
 0x50c   : > { %v10681_v46 = vmax.f32 %v10553_v51, 0.0  ;;  %v10555_v11 = vadd.f32 %v12027_v3, %v15403_v27 }
 0x50d   : > { %v10797_v4 = vadd.f32 %v10796_v63, %v10680_v45  ;;  %v10682_v21 = vmax.f32 %v10554_v32, 0.0 }
 0x50e   : > { %v10860_v58 = vadd.f32 %v10859_v14, %v10681_v46  ;;  %v10683_v12 = vmax.f32 %v10555_v11, 0.0  ;;  %v9749_v8 = vpop.f32.mrb[24].mxu0 }
 0x50f   : > { %v10798_v61 = vadd.f32 %v10797_v4, %v10682_v21  ;;  %v12028_v44 = vadd.f32 %v9749_v8, %v15234_v18  ;;  %v9751_v15 = vpop.f32.mrb[25].mxu0 }
 0x510   : > { %v10861_v52 = vadd.f32 %v10860_v58, %v10683_v12  ;;  %v12029_v7 = vadd.f32 %v9751_v15, %v15236_v19  ;;  %v9753_v55 = vpop.f32.mrb[26].mxu0 }
 0x511   : > { %v10556_v17 = vadd.f32 %v12028_v44, %v15401_v39  ;;  %v12030_v62 = vadd.f32 %v9753_v55, %v15244_v22  ;;  %v9755_v5 = vpop.f32.mrb[27].mxu0 }
 0x512   : > { %v10557_v26 = vadd.f32 %v12029_v7, %v15403_v27  ;;  %v12031_v49 = vadd.f32 %v9755_v5, %v15246_v23 }
 0x513   : > { %v10684_v56 = vmax.f32 %v10556_v17, 0.0  ;;  %v10558_v60 = vadd.f32 %v12030_v62, %v15401_v39 }
 0x514   : > { %v10685_v16 = vmax.f32 %v10557_v26, 0.0  ;;  %v10559_v18 = vadd.f32 %v12031_v49, %v15403_v27 }
 0x515   : > { %v10799_v20 = vadd.f32 %v10798_v61, %v10684_v56  ;;  %v10686_v6 = vmax.f32 %v10558_v60, 0.0 }
 0x516   : > { %v10862_v50 = vadd.f32 %v10861_v52, %v10685_v16  ;;  %v10687_v19 = vmax.f32 %v10559_v18, 0.0  ;;  %v9759_v38 = vpop.f32.mrb[28].mxu0 }
 0x517   : > { %v10800_v47 = vadd.f32 %v10799_v20, %v10686_v6  ;;  %v12032_v63 = vadd.f32 %v9759_v38, %v15250_v24  ;;  %v9761_v22 = vpop.f32.mrb[29].mxu0 }
 0x518   : > { %v10863_v9 = vadd.f32 %v10862_v50, %v10687_v19  ;;  %v12033_v1 = vadd.f32 %v9761_v22, %v15252_v25  ;;  %v9763_v14 = vpop.f32.mrb[30].mxu0 }
 0x519   : > { %v10560_v23 = vadd.f32 %v12032_v63, %v15401_v39  ;;  %v12034_v10 = vadd.f32 %v9763_v14, %v15260_v28  ;;  %v9765_v13 = vpop.f32.mrb[31].mxu0 }
 0x51a   : > { %v10561_v33 = vadd.f32 %v12033_v1, %v15403_v27  ;;  %v12035_v57 = vadd.f32 %v9765_v13, %v15262_v29 }
 0x51b   : > { %v10688_v0 = vmax.f32 %v10560_v23, 0.0  ;;  %v10562_v51 = vadd.f32 %v12034_v10, %v15401_v39 }
 0x51c   : > { %v10689_v3 = vmax.f32 %v10561_v33, 0.0  ;;  %v10563_v24 = vadd.f32 %v12035_v57, %v15403_v27 }
 0x51d   : > { %v10801_v45 = vadd.f32 %v10800_v47, %v10688_v0  ;;  %v10690_v32 = vmax.f32 %v10562_v51, 0.0 }
 0x51e   : > { %v10864_v46 = vadd.f32 %v10863_v9, %v10689_v3  ;;  %v10691_v25 = vmax.f32 %v10563_v24, 0.0  ;;  %v9769_v11 = vpop.f32.mrb[32].mxu0 }
 0x51f   : > { %v10802_v4 = vadd.f32 %v10801_v45, %v10690_v32  ;;  %v12036_v21 = vadd.f32 %v9769_v11, %v15266_v30  ;;  %v9771_v28 = vpop.f32.mrb[33].mxu0 }
 0x520   : > { %v10865_v58 = vadd.f32 %v10864_v46, %v10691_v25  ;;  %v12037_v12 = vadd.f32 %v9771_v28, %v15268_v31  ;;  %v9773_v8 = vpop.f32.mrb[34].mxu0 }
 0x521   : > { %v10564_v29 = vadd.f32 %v12036_v21, %v15401_v39  ;;  %v12038_v61 = vadd.f32 %v9773_v8, %v15276_v34  ;;  %v9775_v44 = vpop.f32.mrb[35].mxu0 }
 0x522   : > { %v10565_v15 = vadd.f32 %v12037_v12, %v15403_v27  ;;  %v12039_v52 = vadd.f32 %v9775_v44, %v15278_v35 }
 0x523   : > { %v10692_v7 = vmax.f32 %v10564_v29, 0.0  ;;  %v10566_v55 = vadd.f32 %v12038_v61, %v15401_v39 }
 0x524   : > { %v10693_v17 = vmax.f32 %v10565_v15, 0.0  ;;  %v10567_v30 = vadd.f32 %v12039_v52, %v15403_v27 }
 0x525   : > { %v10803_v62 = vadd.f32 %v10802_v4, %v10692_v7  ;;  %v10694_v5 = vmax.f32 %v10566_v55, 0.0  ;;  %v15678_v7 = vld [vmem:[#allocation4_spill] sm:$0xff] }
 0x526   : > { %v10866_v26 = vadd.f32 %v10865_v58, %v10693_v17  ;;  %v10695_v31 = vmax.f32 %v10567_v30, 0.0  ;;  %v9779_v49 = vpop.f32.mrb[36].mxu0 }
 0x527   : > { %v10804_v56 = vadd.f32 %v10803_v62, %v10694_v5  ;;  %v12040_v60 = vadd.f32 %v9779_v49, %v15282_v36  ;;  %v9781_v34 = vpop.f32.mrb[37].mxu0 }
 0x528   : > { %v10867_v16 = vadd.f32 %v10866_v26, %v10695_v31  ;;  %v12041_v18 = vadd.f32 %v9781_v34, %v15284_v37  ;;  %v9783_v20 = vpop.f32.mrb[38].mxu0 }
 0x529   : > { %v10568_v35 = vadd.f32 %v12040_v60, %v15401_v39  ;;  %v12042_v6 = vadd.f32 %v9783_v20, %v15292_v40  ;;  %v9785_v50 = vpop.f32.mrb[39].mxu0  ;;  %v15679_v60 = vld [vmem:[#allocation5_spill] sm:$0xff] }
 0x52a   : > { %v10569_v19 = vadd.f32 %v12041_v18, %v15403_v27  ;;  %v12043_v38 = vadd.f32 %v9785_v50, %v15294_v41  ;;  %v15680_v18 = vld [vmem:[#allocation6_spill] sm:$0xff]  ;;  %v15681_v50 = vld [vmem:[#allocation7_spill] sm:$0xff] }
 0x52b   : > { %v10696_v47 = vmax.f32 %v10568_v35, 0.0  ;;  %v10570_v63 = vadd.f32 %v12042_v6, %v15401_v39 }
 0x52c   : > { %v10697_v22 = vmax.f32 %v10569_v19, 0.0  ;;  %v10571_v36 = vadd.f32 %v12043_v38, %v15403_v27 }
 0x52d   : > { %v10805_v9 = vadd.f32 %v10804_v56, %v10696_v47  ;;  %v10698_v1 = vmax.f32 %v10570_v63, 0.0  ;;  %v15682_v63 = vld [vmem:[#allocation8_spill] sm:$0xff] }
 0x52e   : > { %v10868_v14 = vadd.f32 %v10867_v16, %v10697_v22  ;;  %v10699_v37 = vmax.f32 %v10571_v36, 0.0  ;;  %v9789_v23 = vpop.f32.mrb[40].mxu0 }
 0x52f   : > { %v10806_v10 = vadd.f32 %v10805_v9, %v10698_v1  ;;  %v12044_v13 = vadd.f32 %v9789_v23, %v15298_v42  ;;  %v9791_v40 = vpop.f32.mrb[41].mxu0 }
 0x530   : > { %v10869_v33 = vadd.f32 %v10868_v14, %v10699_v37  ;;  %v12045_v57 = vadd.f32 %v9791_v40, %v15300_v43  ;;  %v9793_v0 = vpop.f32.mrb[42].mxu0 }
 0x531   : > { %v10572_v41 = vadd.f32 %v12044_v13, %v15401_v39  ;;  %v12046_v51 = vadd.f32 %v9793_v0, %v15308_v48  ;;  %v9795_v3 = vpop.f32.mrb[43].mxu0 }
 0x532   : > { %v10573_v24 = vadd.f32 %v12045_v57, %v15403_v27  ;;  %v12047_v45 = vadd.f32 %v9795_v3, %v15310_v53  ;;  %v15683_v57 = vld [vmem:[#allocation9_spill] sm:$0xff]  ;;  %v15684_v3 = vld [vmem:[#allocation10_spill] sm:$0xff] }
 0x533   : > { %v10700_v32 = vmax.f32 %v10572_v41, 0.0  ;;  %v10574_v46 = vadd.f32 %v12046_v51, %v15401_v39 }
 0x534   : > { %v10701_v25 = vmax.f32 %v10573_v24, 0.0  ;;  %v10575_v42 = vadd.f32 %v12047_v45, %v15403_v27 }
 0x535   : > { %v10807_v11 = vadd.f32 %v10806_v10, %v10700_v32  ;;  %v10702_v4 = vmax.f32 %v10574_v46, 0.0  ;;  %v15685_v46 = vld [vmem:[#allocation11_spill] sm:$0xff] }
 0x536   : > { %v10870_v21 = vadd.f32 %v10869_v33, %v10701_v25  ;;  %v10703_v43 = vmax.f32 %v10575_v42, 0.0  ;;  %v9799_v28 = vpop.f32.mrb[44].mxu0 }
 0x537   : > { %v10808_v58 = vadd.f32 %v10807_v11, %v10702_v4  ;;  %v12048_v12 = vadd.f32 %v9799_v28, %v15314_v54  ;;  %v9801_v48 = vpop.f32.mrb[45].mxu0  ;;  %v15686_v4 = vld [vmem:[#allocation12_spill] sm:$0xff] }
 0x538   : > { %v10871_v8 = vadd.f32 %v10870_v21, %v10703_v43  ;;  %v12049_v29 = vadd.f32 %v9801_v48, %v15316_v59  ;;  %v9803_v61 = vpop.f32.mrb[46].mxu0 }
 0x539   : > { %v10576_v53 = vadd.f32 %v12048_v12, %v15401_v39  ;;  %v12050_v44 = vadd.f32 %v9803_v61, %v15324_v2  ;;  %v9805_v15 = vpop.f32.mrb[47].mxu0 }
 0x53a   : > { %v10577_v52 = vadd.f32 %v12049_v29, %v15403_v27  ;;  %v12051_v55 = vadd.f32 %v9805_v15, %v15678_v7  ;;  %v15687_v15 = vld [vmem:[#allocation13_spill] sm:$0xff] }
 0x53b   : > { %v10704_v17 = vmax.f32 %v10576_v53, 0.0  ;;  %v10578_v30 = vadd.f32 %v12050_v44, %v15401_v39 }
 0x53c   : > { %v10705_v62 = vmax.f32 %v10577_v52, 0.0  ;;  %v10579_v54 = vadd.f32 %v12051_v55, %v15403_v27 }
 0x53d   : > { %v10809_v5 = vadd.f32 %v10808_v58, %v10704_v17  ;;  %v10706_v26 = vmax.f32 %v10578_v30, 0.0  ;;  %v15688_v17 = vld [vmem:[#allocation14_spill] sm:$0xff] }
 0x53e   : > { %v10872_v31 = vadd.f32 %v10871_v8, %v10705_v62  ;;  %v10707_v59 = vmax.f32 %v10579_v54, 0.0  ;;  %v9809_v49 = vpop.f32.mrb[48].mxu0 }
 0x53f   : > { %v10810_v56 = vadd.f32 %v10809_v5, %v10706_v26  ;;  %v12052_v34 = vadd.f32 %v9809_v49, %v15679_v60  ;;  %v9811_v2 = vpop.f32.mrb[49].mxu0  ;;  %v15689_v5 = vld [vmem:[#allocation15_spill] sm:$0xff]  ;;  %v15690_v49 = vld [vmem:[#allocation16_spill] sm:$0xff] }
 0x540   : > { %v10873_v16 = vadd.f32 %v10872_v31, %v10707_v59  ;;  %v12053_v20 = vadd.f32 %v9811_v2, %v15680_v18  ;;  %v9813_v35 = vpop.f32.mrb[50].mxu0 }
 0x541   : > { %v10580_v6 = vadd.f32 %v12052_v34, %v15401_v39  ;;  %v12054_v19 = vadd.f32 %v9813_v35, %v15681_v50  ;;  %v9815_v38 = vpop.f32.mrb[51].mxu0 }
 0x542   : > { %v10581_v47 = vadd.f32 %v12053_v20, %v15403_v27  ;;  %v12055_v22 = vadd.f32 %v9815_v38, %v15682_v63  ;;  %v15691_v38 = vld [vmem:[#allocation17_spill] sm:$0xff] }
 0x543   : > { %v10708_v36 = vmax.f32 %v10580_v6, 0.0  ;;  %v10582_v9 = vadd.f32 %v12054_v19, %v15401_v39 }
 0x544   : > { %v10709_v1 = vmax.f32 %v10581_v47, 0.0  ;;  %v10583_v14 = vadd.f32 %v12055_v22, %v15403_v27 }
 0x545   : > { %v10811_v37 = vadd.f32 %v10810_v56, %v10708_v36  ;;  %v10710_v23 = vmax.f32 %v10582_v9, 0.0  ;;  %v15692_v36 = vld [vmem:[#allocation18_spill] sm:$0xff] }
 0x546   : > { %v10874_v10 = vadd.f32 %v10873_v16, %v10709_v1  ;;  %v10711_v13 = vmax.f32 %v10583_v14, 0.0  ;;  %v9819_v40 = vpop.f32.mrb[52].mxu0 }
 0x547   : > { %v10812_v33 = vadd.f32 %v10811_v37, %v10710_v23  ;;  %v12056_v0 = vadd.f32 %v9819_v40, %v15683_v57  ;;  %v9821_v41 = vpop.f32.mrb[53].mxu0  ;;  %v15693_v37 = vld [vmem:[#allocation19_spill] sm:$0xff]  ;;  %v15694_v40 = vld [vmem:[#allocation20_spill] sm:$0xff] }
 0x548   : > { %v10875_v51 = vadd.f32 %v10874_v10, %v10711_v13  ;;  %v12057_v24 = vadd.f32 %v9821_v41, %v15684_v3  ;;  %v9823_v45 = vpop.f32.mrb[54].mxu0 }
 0x549   : > { %v10584_v32 = vadd.f32 %v12056_v0, %v15401_v39  ;;  %v12058_v25 = vadd.f32 %v9823_v45, %v15685_v46  ;;  %v9825_v42 = vpop.f32.mrb[55].mxu0 }
 0x54a   : > { %v10585_v11 = vadd.f32 %v12057_v24, %v15403_v27  ;;  %v12059_v21 = vadd.f32 %v9825_v42, %v15686_v4 }
 0x54b   : > { %v10712_v43 = vmax.f32 %v10584_v32, 0.0  ;;  %v10586_v28 = vadd.f32 %v12058_v25, %v15401_v39 }
 0x54c   : > { %v10713_v58 = vmax.f32 %v10585_v11, 0.0  ;;  %v10587_v12 = vadd.f32 %v12059_v21, %v15403_v27 }
 0x54d   : > { %v10813_v48 = vadd.f32 %v10812_v33, %v10712_v43  ;;  %v10714_v8 = vmax.f32 %v10586_v28, 0.0 }
 0x54e   : > { %v10876_v29 = vadd.f32 %v10875_v51, %v10713_v58  ;;  %v10715_v61 = vmax.f32 %v10587_v12, 0.0  ;;  %v9829_v53 = vpop.f32.mrb[56].mxu0 }
 0x54f   : > { %v10814_v44 = vadd.f32 %v10813_v48, %v10714_v8  ;;  %v12060_v52 = vadd.f32 %v9829_v53, %v15687_v15  ;;  %v9831_v7 = vpop.f32.mrb[57].mxu0 }
 0x550   : > { %v10877_v55 = vadd.f32 %v10876_v29, %v10715_v61  ;;  %v12061_v30 = vadd.f32 %v9831_v7, %v15688_v17  ;;  %v9833_v62 = vpop.f32.mrb[58].mxu0 }
 0x551   : > { %v10588_v54 = vadd.f32 %v12060_v52, %v15401_v39  ;;  %v12062_v26 = vadd.f32 %v9833_v62, %v15689_v5  ;;  %v9835_v31 = vpop.f32.mrb[59].mxu0 }
 0x552   : > { %v10589_v59 = vadd.f32 %v12061_v30, %v15403_v27  ;;  %v12063_v56 = vadd.f32 %v9835_v31, %v15690_v49 }
 0x553   : > { %v10716_v60 = vmax.f32 %v10588_v54, 0.0  ;;  %v10590_v34 = vadd.f32 %v12062_v26, %v15401_v39 }
 0x554   : > { %v10717_v2 = vmax.f32 %v10589_v59, 0.0  ;;  %v10591_v16 = vadd.f32 %v12063_v56, %v15403_v27 }
 0x555   : > { %v10815_v18 = vadd.f32 %v10814_v44, %v10716_v60  ;;  %v10718_v20 = vmax.f32 %v10590_v34, 0.0 }
 0x556   : > { %v10878_v35 = vadd.f32 %v10877_v55, %v10717_v2  ;;  %v10719_v6 = vmax.f32 %v10591_v16, 0.0  ;;  %v9839_v50 = vpop.f32.mrb[60].mxu0 }
 0x557   : > { %v10816_v19 = vadd.f32 %v10815_v18, %v10718_v20  ;;  %v12064_v47 = vadd.f32 %v9839_v50, %v15691_v38  ;;  %v9841_v63 = vpop.f32.mrb[61].mxu0 }
 0x558   : > { %v10879_v22 = vadd.f32 %v10878_v35, %v10719_v6  ;;  %v12065_v9 = vadd.f32 %v9841_v63, %v15692_v36  ;;  %v9843_v1 = vpop.f32.mrb[62].mxu0 }
 0x559   : > { %v10592_v14 = vadd.f32 %v12064_v47, %v15401_v39  ;;  %v12066_v23 = vadd.f32 %v9843_v1, %v15693_v37  ;;  %v9845_v10 = vpop.f32.mrb[63].mxu0 }
 0x55a   : > { %v10593_v13 = vadd.f32 %v12065_v9, %v15403_v27  ;;  %v12067_v33 = vadd.f32 %v9845_v10, %v15694_v40 }
 0x55b   : > { %v10720_v57 = vmax.f32 %v10592_v14, 0.0  ;;  %v10594_v0 = vadd.f32 %v12066_v23, %v15401_v39 }
 0x55c   : > { %v10721_v41 = vmax.f32 %v10593_v13, 0.0  ;;  %v10595_v51 = vadd.f32 %v12067_v33, %v15403_v27 }
 0x55d   : > { %v10817_v3 = vadd.f32 %v10816_v19, %v10720_v57  ;;  %v10722_v24 = vmax.f32 %v10594_v0, 0.0  ;;  %v5489_v46 = vpop.f32.mrb[64].mxu1 }
 0x55e   : > { %v10880_v45 = vadd.f32 %v10879_v22, %v10721_v41  ;;  %v10723_v32 = vmax.f32 %v10595_v51, 0.0  ;;  %v9849_v25 = vpop.f32.mrb[64].mxu0  ;;  %v5491_v4 = vpop.f32.mrb[65].mxu1 }
 0x55f   : > { %v10818_v42 = vadd.f32 %v10817_v3, %v10722_v24  ;;  %v12068_v11 = vadd.f32 %v9849_v25, %v5489_v46  ;;  %v9851_v21 = vpop.f32.mrb[65].mxu0  ;;  %v5493_v58 = vpop.f32.mrb[66].mxu1 }
 0x560   : > { %v10881_v43 = vadd.f32 %v10880_v45, %v10723_v32  ;;  %v12069_v28 = vadd.f32 %v9851_v21, %v5491_v4  ;;  %v9853_v12 = vpop.f32.mrb[66].mxu0  ;;  %v5495_v29 = vpop.f32.mrb[67].mxu1 }
 0x561   : > { %v10596_v48 = vadd.f32 %v12068_v11, %v15401_v39  ;;  %v12070_v8 = vadd.f32 %v9853_v12, %v5493_v58  ;;  %v9855_v61 = vpop.f32.mrb[67].mxu0 }
 0x562   : > { %v10597_v53 = vadd.f32 %v12069_v28, %v15403_v27  ;;  %v12071_v44 = vadd.f32 %v9855_v61, %v5495_v29 }
 0x563   : > { %v10724_v15 = vmax.f32 %v10596_v48, 0.0  ;;  %v10598_v52 = vadd.f32 %v12070_v8, %v15401_v39 }
 0x564   : > { %v10725_v7 = vmax.f32 %v10597_v53, 0.0  ;;  %v10599_v55 = vadd.f32 %v12071_v44, %v15403_v27 }
 0x565   : > { %v10819_v17 = vadd.f32 %v10818_v42, %v10724_v15  ;;  %v10726_v30 = vmax.f32 %v10598_v52, 0.0  ;;  %v5499_v5 = vpop.f32.mrb[68].mxu1 }
 0x566   : > { %v10882_v62 = vadd.f32 %v10881_v43, %v10725_v7  ;;  %v10727_v54 = vmax.f32 %v10599_v55, 0.0  ;;  %v9859_v26 = vpop.f32.mrb[68].mxu0  ;;  %v5501_v49 = vpop.f32.mrb[69].mxu1 }
 0x567   : > { %v10820_v31 = vadd.f32 %v10819_v17, %v10726_v30  ;;  %v12072_v59 = vadd.f32 %v9859_v26, %v5499_v5  ;;  %v9861_v56 = vpop.f32.mrb[69].mxu0  ;;  %v5503_v2 = vpop.f32.mrb[70].mxu1 }
 0x568   : > { %v10883_v60 = vadd.f32 %v10882_v62, %v10727_v54  ;;  %v12073_v34 = vadd.f32 %v9861_v56, %v5501_v49  ;;  %v9863_v16 = vpop.f32.mrb[70].mxu0  ;;  %v5505_v35 = vpop.f32.mrb[71].mxu1 }
 0x569   : > { %v10600_v18 = vadd.f32 %v12072_v59, %v15401_v39  ;;  %v12074_v20 = vadd.f32 %v9863_v16, %v5503_v2  ;;  %v9865_v6 = vpop.f32.mrb[71].mxu0 }
 0x56a   : > { %v10601_v50 = vadd.f32 %v12073_v34, %v15403_v27  ;;  %v12075_v19 = vadd.f32 %v9865_v6, %v5505_v35 }
 0x56b   : > { %v10728_v38 = vmax.f32 %v10600_v18, 0.0  ;;  %v10602_v47 = vadd.f32 %v12074_v20, %v15401_v39 }
 0x56c   : > { %v10729_v63 = vmax.f32 %v10601_v50, 0.0  ;;  %v10603_v22 = vadd.f32 %v12075_v19, %v15403_v27 }
 0x56d   : > { %v10821_v36 = vadd.f32 %v10820_v31, %v10728_v38  ;;  %v10730_v9 = vmax.f32 %v10602_v47, 0.0  ;;  %v5509_v37 = vpop.f32.mrb[72].mxu1 }
 0x56e   : > { %v10884_v1 = vadd.f32 %v10883_v60, %v10729_v63  ;;  %v10731_v14 = vmax.f32 %v10603_v22, 0.0  ;;  %v9869_v23 = vpop.f32.mrb[72].mxu0  ;;  %v5511_v40 = vpop.f32.mrb[73].mxu1 }
 0x56f   : > { %v10822_v10 = vadd.f32 %v10821_v36, %v10730_v9  ;;  %v12076_v13 = vadd.f32 %v9869_v23, %v5509_v37  ;;  %v9871_v33 = vpop.f32.mrb[73].mxu0  ;;  %v5513_v41 = vpop.f32.mrb[74].mxu1 }
 0x570   : > { %v10885_v57 = vadd.f32 %v10884_v1, %v10731_v14  ;;  %v12077_v0 = vadd.f32 %v9871_v33, %v5511_v40  ;;  %v9873_v51 = vpop.f32.mrb[74].mxu0  ;;  %v5515_v45 = vpop.f32.mrb[75].mxu1 }
 0x571   : > { %v10604_v3 = vadd.f32 %v12076_v13, %v15401_v39  ;;  %v12078_v24 = vadd.f32 %v9873_v51, %v5513_v41  ;;  %v9875_v32 = vpop.f32.mrb[75].mxu0 }
 0x572   : > { %v10605_v46 = vadd.f32 %v12077_v0, %v15403_v27  ;;  %v12079_v25 = vadd.f32 %v9875_v32, %v5515_v45 }
 0x573   : > { %v10732_v42 = vmax.f32 %v10604_v3, 0.0  ;;  %v10606_v11 = vadd.f32 %v12078_v24, %v15401_v39 }
 0x574   : > { %v10733_v4 = vmax.f32 %v10605_v46, 0.0  ;;  %v10607_v21 = vadd.f32 %v12079_v25, %v15403_v27 }
 0x575   : > { %v10823_v43 = vadd.f32 %v10822_v10, %v10732_v42  ;;  %v10734_v28 = vmax.f32 %v10606_v11, 0.0  ;;  %v5519_v48 = vpop.f32.mrb[76].mxu1 }
 0x576   : > { %v10886_v58 = vadd.f32 %v10885_v57, %v10733_v4  ;;  %v10735_v12 = vmax.f32 %v10607_v21, 0.0  ;;  %v9879_v8 = vpop.f32.mrb[76].mxu0  ;;  %v5521_v53 = vpop.f32.mrb[77].mxu1 }
 0x577   : > { %v10824_v29 = vadd.f32 %v10823_v43, %v10734_v28  ;;  %v12080_v61 = vadd.f32 %v9879_v8, %v5519_v48  ;;  %v9881_v44 = vpop.f32.mrb[77].mxu0  ;;  %v5523_v7 = vpop.f32.mrb[78].mxu1 }
 0x578   : > { %v10887_v15 = vadd.f32 %v10886_v58, %v10735_v12  ;;  %v12081_v52 = vadd.f32 %v9881_v44, %v5521_v53  ;;  %v9883_v55 = vpop.f32.mrb[78].mxu0  ;;  %v5525_v62 = vpop.f32.mrb[79].mxu1 }
 0x579   : > { %v10608_v17 = vadd.f32 %v12080_v61, %v15401_v39  ;;  %v12082_v30 = vadd.f32 %v9883_v55, %v5523_v7  ;;  %v9885_v54 = vpop.f32.mrb[79].mxu0 }
 0x57a   : > { %v10609_v5 = vadd.f32 %v12081_v52, %v15403_v27  ;;  %v12083_v26 = vadd.f32 %v9885_v54, %v5525_v62 }
 0x57b   : > { %v10736_v31 = vmax.f32 %v10608_v17, 0.0  ;;  %v10610_v59 = vadd.f32 %v12082_v30, %v15401_v39 }
 0x57c   : > { %v10737_v49 = vmax.f32 %v10609_v5, 0.0  ;;  %v10611_v56 = vadd.f32 %v12083_v26, %v15403_v27 }
 0x57d   : > { %v10825_v60 = vadd.f32 %v10824_v29, %v10736_v31  ;;  %v10738_v34 = vmax.f32 %v10610_v59, 0.0  ;;  %v5529_v18 = vpop.f32.mrb[80].mxu1 }
 0x57e   : > { %v10888_v2 = vadd.f32 %v10887_v15, %v10737_v49  ;;  %v10739_v16 = vmax.f32 %v10611_v56, 0.0  ;;  %v9889_v20 = vpop.f32.mrb[80].mxu0  ;;  %v5531_v50 = vpop.f32.mrb[81].mxu1 }
 0x57f   : > { %v10826_v35 = vadd.f32 %v10825_v60, %v10738_v34  ;;  %v12084_v6 = vadd.f32 %v9889_v20, %v5529_v18  ;;  %v9891_v19 = vpop.f32.mrb[81].mxu0  ;;  %v5533_v63 = vpop.f32.mrb[82].mxu1 }
 0x580   : > { %v10889_v38 = vadd.f32 %v10888_v2, %v10739_v16  ;;  %v12085_v47 = vadd.f32 %v9891_v19, %v5531_v50  ;;  %v9893_v22 = vpop.f32.mrb[82].mxu0  ;;  %v5535_v1 = vpop.f32.mrb[83].mxu1 }
 0x581   : > { %v10612_v36 = vadd.f32 %v12084_v6, %v15401_v39  ;;  %v12086_v9 = vadd.f32 %v9893_v22, %v5533_v63  ;;  %v9895_v14 = vpop.f32.mrb[83].mxu0 }
 0x582   : > { %v10613_v37 = vadd.f32 %v12085_v47, %v15403_v27  ;;  %v12087_v23 = vadd.f32 %v9895_v14, %v5535_v1 }
 0x583   : > { %v10740_v10 = vmax.f32 %v10612_v36, 0.0  ;;  %v10614_v13 = vadd.f32 %v12086_v9, %v15401_v39 }
 0x584   : > { %v10741_v40 = vmax.f32 %v10613_v37, 0.0  ;;  %v10615_v33 = vadd.f32 %v12087_v23, %v15403_v27 }
 0x585   : > { %v10827_v57 = vadd.f32 %v10826_v35, %v10740_v10  ;;  %v10742_v0 = vmax.f32 %v10614_v13, 0.0  ;;  %v5539_v3 = vpop.f32.mrb[84].mxu1 }
 0x586   : > { %v10890_v41 = vadd.f32 %v10889_v38, %v10741_v40  ;;  %v10743_v51 = vmax.f32 %v10615_v33, 0.0  ;;  %v9899_v24 = vpop.f32.mrb[84].mxu0  ;;  %v5541_v46 = vpop.f32.mrb[85].mxu1 }
 0x587   : > { %v10828_v45 = vadd.f32 %v10827_v57, %v10742_v0  ;;  %v12088_v32 = vadd.f32 %v9899_v24, %v5539_v3  ;;  %v9901_v25 = vpop.f32.mrb[85].mxu0  ;;  %v5543_v4 = vpop.f32.mrb[86].mxu1 }
 0x588   : > { %v10891_v42 = vadd.f32 %v10890_v41, %v10743_v51  ;;  %v12089_v11 = vadd.f32 %v9901_v25, %v5541_v46  ;;  %v9903_v21 = vpop.f32.mrb[86].mxu0  ;;  %v5545_v58 = vpop.f32.mrb[87].mxu1 }
 0x589   : > { %v10616_v43 = vadd.f32 %v12088_v32, %v15401_v39  ;;  %v12090_v28 = vadd.f32 %v9903_v21, %v5543_v4  ;;  %v9905_v12 = vpop.f32.mrb[87].mxu0 }
 0x58a   : > { %v10617_v48 = vadd.f32 %v12089_v11, %v15403_v27  ;;  %v12091_v8 = vadd.f32 %v9905_v12, %v5545_v58 }
 0x58b   : > { %v10744_v29 = vmax.f32 %v10616_v43, 0.0  ;;  %v10618_v61 = vadd.f32 %v12090_v28, %v15401_v39 }
 0x58c   : > { %v10745_v53 = vmax.f32 %v10617_v48, 0.0  ;;  %v10619_v44 = vadd.f32 %v12091_v8, %v15403_v27 }
 0x58d   : > { %v10829_v15 = vadd.f32 %v10828_v45, %v10744_v29  ;;  %v10746_v52 = vmax.f32 %v10618_v61, 0.0  ;;  %v5549_v17 = vpop.f32.mrb[88].mxu1 }
 0x58e   : > { %v10892_v7 = vadd.f32 %v10891_v42, %v10745_v53  ;;  %v10747_v55 = vmax.f32 %v10619_v44, 0.0  ;;  %v9909_v30 = vpop.f32.mrb[88].mxu0  ;;  %v5551_v5 = vpop.f32.mrb[89].mxu1 }
 0x58f   : > { %v10830_v62 = vadd.f32 %v10829_v15, %v10746_v52  ;;  %v12092_v54 = vadd.f32 %v9909_v30, %v5549_v17  ;;  %v9911_v26 = vpop.f32.mrb[89].mxu0  ;;  %v5553_v49 = vpop.f32.mrb[90].mxu1 }
 0x590   : > { %v10893_v31 = vadd.f32 %v10892_v7, %v10747_v55  ;;  %v12093_v59 = vadd.f32 %v9911_v26, %v5551_v5  ;;  %v9913_v56 = vpop.f32.mrb[90].mxu0  ;;  %v5555_v2 = vpop.f32.mrb[91].mxu1 }
 0x591   : > { %v10620_v60 = vadd.f32 %v12092_v54, %v15401_v39  ;;  %v12094_v34 = vadd.f32 %v9913_v56, %v5553_v49  ;;  %v9915_v16 = vpop.f32.mrb[91].mxu0 }
 0x592   : > { %v10621_v18 = vadd.f32 %v12093_v59, %v15403_v27  ;;  %v12095_v20 = vadd.f32 %v9915_v16, %v5555_v2 }
 0x593   : > { %v10748_v35 = vmax.f32 %v10620_v60, 0.0  ;;  %v10622_v6 = vadd.f32 %v12094_v34, %v15401_v39 }
 0x594   : > { %v10749_v50 = vmax.f32 %v10621_v18, 0.0  ;;  %v10623_v19 = vadd.f32 %v12095_v20, %v15403_v27 }
 0x595   : > { %v10831_v38 = vadd.f32 %v10830_v62, %v10748_v35  ;;  %v10750_v47 = vmax.f32 %v10622_v6, 0.0  ;;  %v5559_v36 = vpop.f32.mrb[92].mxu1 }
 0x596   : > { %v10894_v63 = vadd.f32 %v10893_v31, %v10749_v50  ;;  %v10751_v22 = vmax.f32 %v10623_v19, 0.0  ;;  %v9919_v9 = vpop.f32.mrb[92].mxu0  ;;  %v5561_v37 = vpop.f32.mrb[93].mxu1 }
 0x597   : > { %v10832_v1 = vadd.f32 %v10831_v38, %v10750_v47  ;;  %v12096_v14 = vadd.f32 %v9919_v9, %v5559_v36  ;;  %v9921_v23 = vpop.f32.mrb[93].mxu0  ;;  %v5563_v40 = vpop.f32.mrb[94].mxu1 }
 0x598   : > { %v10895_v10 = vadd.f32 %v10894_v63, %v10751_v22  ;;  %v12097_v13 = vadd.f32 %v9921_v23, %v5561_v37  ;;  %v9923_v33 = vpop.f32.mrb[94].mxu0  ;;  %v5565_v41 = vpop.f32.mrb[95].mxu1 }
 0x599   : > { %v10624_v57 = vadd.f32 %v12096_v14, %v15401_v39  ;;  %v12098_v0 = vadd.f32 %v9923_v33, %v5563_v40  ;;  %v9925_v51 = vpop.f32.mrb[95].mxu0 }
 0x59a   : > { %v10625_v3 = vadd.f32 %v12097_v13, %v15403_v27  ;;  %v12099_v24 = vadd.f32 %v9925_v51, %v5565_v41 }
 0x59b   : > { %v10752_v45 = vmax.f32 %v10624_v57, 0.0  ;;  %v10626_v32 = vadd.f32 %v12098_v0, %v15401_v39 }
 0x59c   : > { %v10753_v46 = vmax.f32 %v10625_v3, 0.0  ;;  %v10627_v25 = vadd.f32 %v12099_v24, %v15403_v27 }
 0x59d   : > { %v10833_v42 = vadd.f32 %v10832_v1, %v10752_v45  ;;  %v10754_v11 = vmax.f32 %v10626_v32, 0.0  ;;  %v5569_v43 = vpop.f32.mrb[96].mxu1 }
 0x59e   : > { %v10896_v4 = vadd.f32 %v10895_v10, %v10753_v46  ;;  %v10755_v21 = vmax.f32 %v10627_v25, 0.0  ;;  %v9929_v28 = vpop.f32.mrb[96].mxu0  ;;  %v5571_v48 = vpop.f32.mrb[97].mxu1 }
 0x59f   : > { %v10834_v58 = vadd.f32 %v10833_v42, %v10754_v11  ;;  %v12100_v12 = vadd.f32 %v9929_v28, %v5569_v43  ;;  %v9931_v8 = vpop.f32.mrb[97].mxu0  ;;  %v5573_v53 = vpop.f32.mrb[98].mxu1 }
 0x5a0   : > { %v10897_v29 = vadd.f32 %v10896_v4, %v10755_v21  ;;  %v12101_v61 = vadd.f32 %v9931_v8, %v5571_v48  ;;  %v9933_v44 = vpop.f32.mrb[98].mxu0  ;;  %v5575_v7 = vpop.f32.mrb[99].mxu1 }
 0x5a1   : > { %v10628_v15 = vadd.f32 %v12100_v12, %v15401_v39  ;;  %v12102_v52 = vadd.f32 %v9933_v44, %v5573_v53  ;;  %v9935_v55 = vpop.f32.mrb[99].mxu0 }
 0x5a2   : > { %v10629_v17 = vadd.f32 %v12101_v61, %v15403_v27  ;;  %v12103_v30 = vadd.f32 %v9935_v55, %v5575_v7 }
 0x5a3   : > { %v10756_v62 = vmax.f32 %v10628_v15, 0.0  ;;  %v10630_v54 = vadd.f32 %v12102_v52, %v15401_v39 }
 0x5a4   : > { %v10757_v5 = vmax.f32 %v10629_v17, 0.0  ;;  %v10631_v26 = vadd.f32 %v12103_v30, %v15403_v27 }
 0x5a5   : > { %v10835_v31 = vadd.f32 %v10834_v58, %v10756_v62  ;;  %v10758_v59 = vmax.f32 %v10630_v54, 0.0  ;;  %v5579_v60 = vpop.f32.mrb[100].mxu1 }
 0x5a6   : > { %v10898_v49 = vadd.f32 %v10897_v29, %v10757_v5  ;;  %v10759_v56 = vmax.f32 %v10631_v26, 0.0  ;;  %v9939_v34 = vpop.f32.mrb[100].mxu0  ;;  %v5581_v18 = vpop.f32.mrb[101].mxu1 }
 0x5a7   : > { %v10836_v2 = vadd.f32 %v10835_v31, %v10758_v59  ;;  %v12104_v16 = vadd.f32 %v9939_v34, %v5579_v60  ;;  %v9941_v20 = vpop.f32.mrb[101].mxu0  ;;  %v5583_v50 = vpop.f32.mrb[102].mxu1 }
 0x5a8   : > { %v10899_v35 = vadd.f32 %v10898_v49, %v10759_v56  ;;  %v12105_v6 = vadd.f32 %v9941_v20, %v5581_v18  ;;  %v9943_v19 = vpop.f32.mrb[102].mxu0  ;;  %v5585_v63 = vpop.f32.mrb[103].mxu1 }
 0x5a9   : > { %v10632_v38 = vadd.f32 %v12104_v16, %v15401_v39  ;;  %v12106_v47 = vadd.f32 %v9943_v19, %v5583_v50  ;;  %v9945_v22 = vpop.f32.mrb[103].mxu0 }
 0x5aa   : > { %v10633_v36 = vadd.f32 %v12105_v6, %v15403_v27  ;;  %v12107_v9 = vadd.f32 %v9945_v22, %v5585_v63 }
 0x5ab   : > { %v10760_v1 = vmax.f32 %v10632_v38, 0.0  ;;  %v10634_v14 = vadd.f32 %v12106_v47, %v15401_v39 }
 0x5ac   : > { %v10761_v37 = vmax.f32 %v10633_v36, 0.0  ;;  %v10635_v23 = vadd.f32 %v12107_v9, %v15403_v27 }
 0x5ad   : > { %v10837_v10 = vadd.f32 %v10836_v2, %v10760_v1  ;;  %v10762_v13 = vmax.f32 %v10634_v14, 0.0  ;;  %v5589_v57 = vpop.f32.mrb[104].mxu1 }
 0x5ae   : > { %v10900_v40 = vadd.f32 %v10899_v35, %v10761_v37  ;;  %v10763_v33 = vmax.f32 %v10635_v23, 0.0  ;;  %v9949_v0 = vpop.f32.mrb[104].mxu0  ;;  %v5591_v3 = vpop.f32.mrb[105].mxu1 }
 0x5af   : > { %v10838_v41 = vadd.f32 %v10837_v10, %v10762_v13  ;;  %v12108_v51 = vadd.f32 %v9949_v0, %v5589_v57  ;;  %v9951_v24 = vpop.f32.mrb[105].mxu0  ;;  %v5593_v46 = vpop.f32.mrb[106].mxu1 }
 0x5b0   : > { %v10901_v45 = vadd.f32 %v10900_v40, %v10763_v33  ;;  %v12109_v32 = vadd.f32 %v9951_v24, %v5591_v3  ;;  %v9953_v25 = vpop.f32.mrb[106].mxu0  ;;  %v5595_v4 = vpop.f32.mrb[107].mxu1 }
 0x5b1   : > { %v10636_v42 = vadd.f32 %v12108_v51, %v15401_v39  ;;  %v12110_v11 = vadd.f32 %v9953_v25, %v5593_v46  ;;  %v9955_v21 = vpop.f32.mrb[107].mxu0 }
 0x5b2   : > { %v10637_v43 = vadd.f32 %v12109_v32, %v15403_v27  ;;  %v12111_v28 = vadd.f32 %v9955_v21, %v5595_v4 }
 0x5b3   : > { %v10764_v58 = vmax.f32 %v10636_v42, 0.0  ;;  %v10638_v12 = vadd.f32 %v12110_v11, %v15401_v39 }
 0x5b4   : > { %v10765_v48 = vmax.f32 %v10637_v43, 0.0  ;;  %v10639_v8 = vadd.f32 %v12111_v28, %v15403_v27 }
 0x5b5   : > { %v10839_v29 = vadd.f32 %v10838_v41, %v10764_v58  ;;  %v10766_v61 = vmax.f32 %v10638_v12, 0.0  ;;  %v5599_v15 = vpop.f32.mrb[108].mxu1 }
 0x5b6   : > { %v10902_v53 = vadd.f32 %v10901_v45, %v10765_v48  ;;  %v10767_v44 = vmax.f32 %v10639_v8, 0.0  ;;  %v9959_v52 = vpop.f32.mrb[108].mxu0  ;;  %v5601_v17 = vpop.f32.mrb[109].mxu1 }
 0x5b7   : > { %v10840_v7 = vadd.f32 %v10839_v29, %v10766_v61  ;;  %v12112_v55 = vadd.f32 %v9959_v52, %v5599_v15  ;;  %v9961_v30 = vpop.f32.mrb[109].mxu0  ;;  %v5603_v5 = vpop.f32.mrb[110].mxu1 }
 0x5b8   : > { %v10903_v62 = vadd.f32 %v10902_v53, %v10767_v44  ;;  %v12113_v54 = vadd.f32 %v9961_v30, %v5601_v17  ;;  %v9963_v26 = vpop.f32.mrb[110].mxu0  ;;  %v5605_v49 = vpop.f32.mrb[111].mxu1 }
 0x5b9   : > { %v10640_v31 = vadd.f32 %v12112_v55, %v15401_v39  ;;  %v12114_v59 = vadd.f32 %v9963_v26, %v5603_v5  ;;  %v9965_v56 = vpop.f32.mrb[111].mxu0 }
 0x5ba   : > { %v10641_v60 = vadd.f32 %v12113_v54, %v15403_v27  ;;  %v12115_v34 = vadd.f32 %v9965_v56, %v5605_v49 }
 0x5bb   : > { %v10768_v2 = vmax.f32 %v10640_v31, 0.0  ;;  %v10642_v16 = vadd.f32 %v12114_v59, %v15401_v39 }
 0x5bc   : > { %v10769_v18 = vmax.f32 %v10641_v60, 0.0  ;;  %v10643_v20 = vadd.f32 %v12115_v34, %v15403_v27 }
 0x5bd   : > { %v10841_v35 = vadd.f32 %v10840_v7, %v10768_v2  ;;  %v10770_v6 = vmax.f32 %v10642_v16, 0.0  ;;  %v5609_v38 = vpop.f32.mrb[112].mxu1 }
 0x5be   : > { %v10904_v50 = vadd.f32 %v10903_v62, %v10769_v18  ;;  %v10771_v19 = vmax.f32 %v10643_v20, 0.0  ;;  %v9969_v47 = vpop.f32.mrb[112].mxu0  ;;  %v5611_v36 = vpop.f32.mrb[113].mxu1 }
 0x5bf   : > { %v10842_v63 = vadd.f32 %v10841_v35, %v10770_v6  ;;  %v12116_v22 = vadd.f32 %v9969_v47, %v5609_v38  ;;  %v9971_v9 = vpop.f32.mrb[113].mxu0  ;;  %v5613_v37 = vpop.f32.mrb[114].mxu1 }
 0x5c0   : > { %v10905_v1 = vadd.f32 %v10904_v50, %v10771_v19  ;;  %v12117_v14 = vadd.f32 %v9971_v9, %v5611_v36  ;;  %v9973_v23 = vpop.f32.mrb[114].mxu0  ;;  %v5615_v40 = vpop.f32.mrb[115].mxu1 }
 0x5c1   : > { %v10644_v10 = vadd.f32 %v12116_v22, %v15401_v39  ;;  %v12118_v13 = vadd.f32 %v9973_v23, %v5613_v37  ;;  %v9975_v33 = vpop.f32.mrb[115].mxu0 }
 0x5c2   : > { %v10645_v57 = vadd.f32 %v12117_v14, %v15403_v27  ;;  %v12119_v0 = vadd.f32 %v9975_v33, %v5615_v40 }
 0x5c3   : > { %v10772_v41 = vmax.f32 %v10644_v10, 0.0  ;;  %v10646_v51 = vadd.f32 %v12118_v13, %v15401_v39 }
 0x5c4   : > { %v10773_v3 = vmax.f32 %v10645_v57, 0.0  ;;  %v10647_v24 = vadd.f32 %v12119_v0, %v15403_v27 }
 0x5c5   : > { %v10843_v45 = vadd.f32 %v10842_v63, %v10772_v41  ;;  %v10774_v32 = vmax.f32 %v10646_v51, 0.0  ;;  %v5619_v42 = vpop.f32.mrb[116].mxu1 }
 0x5c6   : > { %v10906_v46 = vadd.f32 %v10905_v1, %v10773_v3  ;;  %v10775_v25 = vmax.f32 %v10647_v24, 0.0  ;;  %v9979_v11 = vpop.f32.mrb[116].mxu0  ;;  %v5621_v43 = vpop.f32.mrb[117].mxu1 }
 0x5c7   : > { %v10844_v4 = vadd.f32 %v10843_v45, %v10774_v32  ;;  %v12120_v21 = vadd.f32 %v9979_v11, %v5619_v42  ;;  %v9981_v28 = vpop.f32.mrb[117].mxu0  ;;  %v5623_v48 = vpop.f32.mrb[118].mxu1 }
 0x5c8   : > { %v10907_v58 = vadd.f32 %v10906_v46, %v10775_v25  ;;  %v12121_v12 = vadd.f32 %v9981_v28, %v5621_v43  ;;  %v9983_v8 = vpop.f32.mrb[118].mxu0  ;;  %v5625_v53 = vpop.f32.mrb[119].mxu1 }
 0x5c9   : > { %v10648_v29 = vadd.f32 %v12120_v21, %v15401_v39  ;;  %v12122_v61 = vadd.f32 %v9983_v8, %v5623_v48  ;;  %v9985_v44 = vpop.f32.mrb[119].mxu0 }
 0x5ca   : > { %v10649_v15 = vadd.f32 %v12121_v12, %v15403_v27  ;;  %v12123_v52 = vadd.f32 %v9985_v44, %v5625_v53 }
 0x5cb   : > { %v10776_v7 = vmax.f32 %v10648_v29, 0.0  ;;  %v10650_v55 = vadd.f32 %v12122_v61, %v15401_v39 }
 0x5cc   : > { %v10777_v17 = vmax.f32 %v10649_v15, 0.0  ;;  %v10651_v30 = vadd.f32 %v12123_v52, %v15403_v27 }
 0x5cd   : > { %v10845_v62 = vadd.f32 %v10844_v4, %v10776_v7  ;;  %v10778_v54 = vmax.f32 %v10650_v55, 0.0  ;;  %v5629_v31 = vpop.f32.mrb[120].mxu1 }
 0x5ce   : > { %v10908_v5 = vadd.f32 %v10907_v58, %v10777_v17  ;;  %v10779_v26 = vmax.f32 %v10651_v30, 0.0  ;;  %v9989_v59 = vpop.f32.mrb[120].mxu0  ;;  %v5631_v60 = vpop.f32.mrb[121].mxu1 }
 0x5cf   : > { %v10846_v49 = vadd.f32 %v10845_v62, %v10778_v54  ;;  %v12124_v56 = vadd.f32 %v9989_v59, %v5629_v31  ;;  %v9991_v34 = vpop.f32.mrb[121].mxu0  ;;  %v5633_v18 = vpop.f32.mrb[122].mxu1 }
 0x5d0   : > { %v10909_v2 = vadd.f32 %v10908_v5, %v10779_v26  ;;  %v12125_v16 = vadd.f32 %v9991_v34, %v5631_v60  ;;  %v9993_v20 = vpop.f32.mrb[122].mxu0  ;;  %v5635_v50 = vpop.f32.mrb[123].mxu1 }
 0x5d1   : > { %v10652_v35 = vadd.f32 %v12124_v56, %v15401_v39  ;;  %v12126_v6 = vadd.f32 %v9993_v20, %v5633_v18  ;;  %v9995_v19 = vpop.f32.mrb[123].mxu0 }
 0x5d2   : > { %v10653_v38 = vadd.f32 %v12125_v16, %v15403_v27  ;;  %v12127_v47 = vadd.f32 %v9995_v19, %v5635_v50 }
 0x5d3   : > { %v10780_v63 = vmax.f32 %v10652_v35, 0.0  ;;  %v10654_v22 = vadd.f32 %v12126_v6, %v15401_v39 }
 0x5d4   : > { %v10781_v36 = vmax.f32 %v10653_v38, 0.0  ;;  %v10655_v9 = vadd.f32 %v12127_v47, %v15403_v27 }
 0x5d5   : > { %v10847_v1 = vadd.f32 %v10846_v49, %v10780_v63  ;;  %v10782_v14 = vmax.f32 %v10654_v22, 0.0  ;;  %v5639_v10 = vpop.f32.mrb[124].mxu1 }
 0x5d6   : > { %v10910_v37 = vadd.f32 %v10909_v2, %v10781_v36  ;;  %v10783_v23 = vmax.f32 %v10655_v9, 0.0  ;;  %v9999_v13 = vpop.f32.mrb[124].mxu0  ;;  %v5641_v57 = vpop.f32.mrb[125].mxu1 }
 0x5d7   : > { %v10848_v40 = vadd.f32 %v10847_v1, %v10782_v14  ;;  %v12128_v33 = vadd.f32 %v9999_v13, %v5639_v10  ;;  %v10001_v0 = vpop.f32.mrb[125].mxu0  ;;  %v5643_v3 = vpop.f32.mrb[126].mxu1 }
 0x5d8   : > { %v10911_v41 = vadd.f32 %v10910_v37, %v10783_v23  ;;  %v12129_v51 = vadd.f32 %v10001_v0, %v5641_v57  ;;  %v10003_v24 = vpop.f32.mrb[126].mxu0  ;;  %v5645_v46 = vpop.f32.mrb[127].mxu1 }
 0x5d9   : > { %v10656_v45 = vadd.f32 %v12128_v33, %v15401_v39  ;;  %v12130_v32 = vadd.f32 %v10003_v24, %v5643_v3  ;;  %v10005_v25 = vpop.f32.mrb[127].mxu0 }
 0x5da   : > { %v10657_v42 = vadd.f32 %v12129_v51, %v15403_v27  ;;  %v12131_v11 = vadd.f32 %v10005_v25, %v5645_v46 }
 0x5db   : > { %v10784_v4 = vmax.f32 %v10656_v45, 0.0  ;;  %v10658_v21 = vadd.f32 %v12130_v32, %v15401_v39 }
 0x5dc   : > { %v10785_v43 = vmax.f32 %v10657_v42, 0.0  ;;  %v10659_v28 = vadd.f32 %v12131_v11, %v15403_v27 }
 0x5dd   : > { %v10849_v58 = vadd.f32 %v10848_v40, %v10784_v4  ;;  %v10786_v12 = vmax.f32 %v10658_v21, 0.0 }
 0x5de   : > { %v10912_v48 = vadd.f32 %v10911_v41, %v10785_v43  ;;  %v10787_v8 = vmax.f32 %v10659_v28, 0.0 }
 0x5df   : > { %v10850_v29 = vadd.f32 %v10849_v58, %v10786_v12 }
 0x5e0   : > { %v10913_v61 = vadd.f32 %v10912_v48, %v10787_v8 }
 0x5e1   : > { %v10915_v53 = vmul.f32 0.015625, %v10850_v29 }
 0x5e2   : > { %v10916_v44 = vmul.f32 0.015625, %v10913_v61 }
 0x5e3   : > { %10917 = vst [vmem:[%s836_s23] sm:$0xff] %v10915_v53 }
 0x5e4   : > { %10918 = vst [vmem:[%s836_s23 + $0x8] sm:$0xff] %v10916_v44 }
 0x5e5 PF: > { %s13_s16 = sadd.s32 1, %s13629_s16   ;;  %s15695_s12 = smov %s13617_s13 }
 0x5e6   : > { %p10_p10 = scmp.ge.s32.totalorder %s13_s16, 4   ;;  %s15696_s13 = smov %s13687_s20 }
 0x5e7   : > { %s15697_s14 = smov %s13625_s15  ;;  %s15698_s15 = smov %s15700_s17 }
 0x5e8   :  { %12 = sbr.rel (!%p10_p10) target bundleno = 3 (0x3), region = 119 }

</bundles_post_ra>
